<compile_context>
chip_gen: v5e
topology: v5e:2x2
jax: 0.10.0
libtpu: 0.0.40
codegen_flags: <defaults>
</compile_context>

<pallas_src>
import math
import functools

import jax
import jax.numpy as jnp
from jax.experimental import pallas as pl
from jax.experimental.pallas import tpu as pltpu


# ----------------------------- Pallas kernels -----------------------------

def _fused_mm_kernel(a_ref, w_ref, ps_ref, pb_ref, es_ref, eb_ref, o_ref, *,
                     prologue, prologue_relu, epilogue, epilogue_relu):
    """o = epi( prologue(a) @ w ).

    prologue(a) = relu?(a * pscale + pshift)   (per input channel, bf16 math)
    epi(y)      = relu?(y * escale + eshift)   (per output channel, f32 math)
    The matmul runs in bf16 on the MXU with f32 accumulation.
    """
    a = a_ref[...]
    if prologue:
        a = a * ps_ref[...] + pb_ref[...]          # stays in a's (bf16) dtype
        if prologue_relu:
            a = jnp.maximum(a, 0)
    acc = jnp.dot(a.astype(w_ref.dtype), w_ref[...],
                  preferred_element_type=jnp.float32)
    if epilogue:
        acc = acc * es_ref[...] + eb_ref[...]
        if epilogue_relu:
            acc = jnp.maximum(acc, 0.0)
    o_ref[...] = acc.astype(o_ref.dtype)


def _conv3x3_kernel(x_ref, w_ref, o_ref):
    """3x3, stride-1, pad-1 conv by whole-image tap accumulation (no im2col).

    x_ref: (H+2, W+2, C) padded input (batch squeezed), bf16
    w_ref: (9, C, F) taps, bf16
    o_ref: (H, W, F)
    """
    H, W, F = o_ref.shape
    acc = jnp.zeros((H * W, F), jnp.float32)
    for dy in range(3):
        for dx in range(3):
            tap = x_ref[dy:dy + H, dx:dx + W, :].reshape(H * W, -1)
            acc = acc + jnp.dot(tap, w_ref[3 * dy + dx],
                                preferred_element_type=jnp.float32)
    o_ref[...] = acc.reshape(H, W, F).astype(o_ref.dtype)


def _maxpool3x3_s2_kernel(x_ref, o_ref):
    """MaxPool2d(3, stride=2, pad=1), decimation fused in-kernel.

    x_ref: ((H+2)/2, 2, (W+2)/2, 2*C) phase-split padded input (batch squeezed)
           where element (yo, a, xo, b*C+c) == x_pad[2*yo+a, 2*xo+b, c].
    o_ref: (H/2, W/2, C)
    """
    Ho, Wo, C = o_ref.shape
    sel = ((0, 0), (0, 1), (1, 0))   # (block offset, phase): covers rows 2y, 2y+1, 2y+2
    m = None
    for oy, a in sel:
        for ox, b in sel:
            t = x_ref[oy:oy + Ho, a, ox:ox + Wo, b * C:(b + 1) * C]
            m = t if m is None else jnp.maximum(m, t)
    o_ref[...] = m


def _bn_relu_avgpool2x2_s2_kernel(x_ref, s_ref, b_ref, o_ref):
    """Fused BN + ReLU + AvgPool2d(2, 2), decimation fused in-kernel.

    x_ref: (H/2, 2, W/2, 2*C) phase-split input (batch squeezed)
    s_ref/b_ref: (1, 1, 2*C) BN scale/shift tiled over the two column phases
    o_ref: (H/2, W/2, C)
    """
    Ho, Wo, C = o_ref.shape
    s = s_ref[...]
    b = b_ref[...]
    v0 = jnp.maximum(x_ref[:, 0, :, :].astype(jnp.float32) * s + b, 0.0)
    v1 = jnp.maximum(x_ref[:, 1, :, :].astype(jnp.float32) * s + b, 0.0)
    t = v0 + v1                                    # (Ho, Wo, 2C): row-pair sums
    acc = t[:, :, 0:C] + t[:, :, C:2 * C]          # combine even/odd columns
    o_ref[...] = (acc * 0.25).astype(o_ref.dtype)


def _bn_relu_gap_kernel(x_ref, s_ref, b_ref, o_ref):
    """Fused norm5 + ReLU + global average pool (per image)."""
    v = x_ref[...].astype(jnp.float32) * s_ref[...] + b_ref[...]
    v = jnp.maximum(v, 0.0)
    hw = v.shape[0] * v.shape[1]
    m = jnp.sum(v, axis=0)                      # (W, C)
    m = jnp.sum(m, axis=0, keepdims=True)       # (1, C)
    o_ref[...] = m * (1.0 / hw)


# ----------------------------- kernel wrappers -----------------------------

_PAR = pltpu.CompilerParams(dimension_semantics=("parallel",))


def fused_matmul(a, w, *, pscale=None, pshift=None, escale=None, eshift=None,
                 prologue_relu=False, epilogue_relu=False,
                 out_dtype=jnp.bfloat16, k_width=None, bm_max=1024):
    """Y = epi(relu?(a*pscale+pshift) @ w).

    a:(M, K_arr), w:(Kb, N) bf16.  Only the first Kb = k_width columns of `a` are
    DMA'd/used (Kb must be a multiple of 128 or equal K_arr); pscale/pshift have
    width Kb (zero-padded rows contribute exactly zero).
    """
    M, K_arr = a.shape
    Kb = K_arr if k_width is None else k_width
    Kw, Nc = w.shape
    assert Kw == Kb and Kb <= K_arr
    a_dt = a.dtype
    prologue = (pscale is not None) or (pshift is not None)
    epilogue = (escale is not None) or (eshift is not None) or epilogue_relu

    ps = jnp.ones((1, Kb), a_dt) if pscale is None else pscale.reshape(1, Kb).astype(a_dt)
    pb = jnp.zeros((1, Kb), a_dt) if pshift is None else pshift.reshape(1, Kb).astype(a_dt)
    es = (jnp.ones((1, Nc), jnp.float32) if escale is None
          else escale.reshape(1, Nc).astype(jnp.float32))
    eb = (jnp.zeros((1, Nc), jnp.float32) if eshift is None
          else eshift.reshape(1, Nc).astype(jnp.float32))

    bm = min(bm_max, M)                 # bm == M (full) or bm_max (multiple of 8)
    grid = (pl.cdiv(M, bm),)
    kern = functools.partial(_fused_mm_kernel,
                             prologue=prologue, prologue_relu=prologue_relu,
                             epilogue=epilogue, epilogue_relu=epilogue_relu)
    return pl.pallas_call(
        kern,
        out_shape=jax.ShapeDtypeStruct((M, Nc), out_dtype),
        grid=grid,
        in_specs=[pl.BlockSpec((bm, Kb), lambda i: (i, 0)),
                  pl.BlockSpec((Kb, Nc), lambda i: (0, 0)),
                  pl.BlockSpec((1, Kb), lambda i: (0, 0)),
                  pl.BlockSpec((1, Kb), lambda i: (0, 0)),
                  pl.BlockSpec((1, Nc), lambda i: (0, 0)),
                  pl.BlockSpec((1, Nc), lambda i: (0, 0))],
        out_specs=pl.BlockSpec((bm, Nc), lambda i: (i, 0)),
        compiler_params=_PAR,
    )(a, w, ps, pb, es, eb)


def conv3x3_same(x, w9):
    """3x3 / stride 1 / pad 1 conv (bias=False). x:(N,H,W,C) bf16, w9:(9,C,F) bf16."""
    N, H, W, C = x.shape
    F = w9.shape[-1]
    xp = jnp.pad(x, ((0, 0), (1, 1), (1, 1), (0, 0)))
    return pl.pallas_call(
        _conv3x3_kernel,
        out_shape=jax.ShapeDtypeStruct((N, H, W, F), jnp.bfloat16),
        grid=(N,),
        in_specs=[pl.BlockSpec((None, H + 2, W + 2, C), lambda n: (n, 0, 0, 0)),
                  pl.BlockSpec((9, C, F), lambda n: (0, 0, 0))],
        out_specs=pl.BlockSpec((None, H, W, F), lambda n: (n, 0, 0, 0)),
        compiler_params=_PAR,
    )(xp, w9)


def maxpool3x3_s2_p1(x):
    """MaxPool2d(kernel=3, stride=2, pad=1) on NHWC; decimation done in-kernel."""
    N, H, W, C = x.shape
    assert H % 2 == 0 and W % 2 == 0
    Ho, Wo = H // 2, W // 2
    neg = float(jnp.finfo(x.dtype).min)   # inputs are post-ReLU (>= 0), so this is safe
    xp = jnp.pad(x, ((0, 0), (1, 1), (1, 1), (0, 0)), constant_values=neg)
    Hp, Wp = H + 2, W + 2
    xr = xp.reshape(N, Hp // 2, 2, Wp // 2, 2 * C)       # free, contiguous reshape
    return pl.pallas_call(
        _maxpool3x3_s2_kernel,
        out_shape=jax.ShapeDtypeStruct((N, Ho, Wo, C), x.dtype),
        grid=(N,),
        in_specs=[pl.BlockSpec((None, Hp // 2, 2, Wp // 2, 2 * C),
                               lambda n: (n, 0, 0, 0, 0))],
        out_specs=pl.BlockSpec((None, Ho, Wo, C), lambda n: (n, 0, 0, 0)),
        compiler_params=_PAR,
    )(xr)


def bn_relu_avgpool2x2_s2(x, scale2c, shift2c):
    """Fused BN + ReLU + AvgPool2d(2, 2) on NHWC; decimation done in-kernel."""
    N, H, W, C = x.shape
    assert H % 2 == 0 and W % 2 == 0
    H2, W2 = H // 2, W // 2
    xr = x.reshape(N, H2, 2, W2, 2 * C)                  # free, contiguous reshape
    s = scale2c.reshape(1, 1, 2 * C).astype(jnp.float32)
    b = shift2c.reshape(1, 1, 2 * C).astype(jnp.float32)
    return pl.pallas_call(
        _bn_relu_avgpool2x2_s2_kernel,
        out_shape=jax.ShapeDtypeStruct((N, H2, W2, C), jnp.bfloat16),
        grid=(N,),
        in_specs=[pl.BlockSpec((None, H2, 2, W2, 2 * C), lambda n: (n, 0, 0, 0, 0)),
                  pl.BlockSpec((1, 1, 2 * C), lambda n: (0, 0, 0)),
                  pl.BlockSpec((1, 1, 2 * C), lambda n: (0, 0, 0))],
        out_specs=pl.BlockSpec((None, H2, W2, C), lambda n: (n, 0, 0, 0)),
        compiler_params=_PAR,
    )(xr, s, b)


def bn_relu_gap(x, scale, shift):
    """Fused norm5 + ReLU + adaptive_avg_pool2d((1,1)) + flatten -> (N, C) f32."""
    N, H, W, C = x.shape
    s = scale.reshape(1, 1, C).astype(jnp.float32)
    b = shift.reshape(1, 1, C).astype(jnp.float32)
    out = pl.pallas_call(
        _bn_relu_gap_kernel,
        out_shape=jax.ShapeDtypeStruct((N, 1, C), jnp.float32),
        grid=(N,),
        in_specs=[pl.BlockSpec((None, H, W, C), lambda n: (n, 0, 0, 0)),
                  pl.BlockSpec((1, 1, C), lambda n: (0, 0, 0)),
                  pl.BlockSpec((1, 1, C), lambda n: (0, 0, 0))],
        out_specs=pl.BlockSpec((None, 1, C), lambda n: (n, 0, 0)),
        compiler_params=_PAR,
    )(x, s, b)
    return out.reshape(N, C)


# ----------------------------- forward building blocks -----------------------------

def conv0_stem(x_nhwc, w0r, scale0, shift0, k=7, stride=2, pad=3):
    """conv0 (7x7 s2 p3, bias=False) + fused norm0 + relu0 epilogue."""
    N, H, W, Cin = x_nhwc.shape
    Ho = (H + 2 * pad - k) // stride + 1
    Wo = (W + 2 * pad - k) // stride + 1
    xp = jnp.pad(x_nhwc, ((0, 0), (pad, pad), (pad, pad), (0, 0)))
    cols = []
    for dy in range(k):
        for dx in range(k):
            cols.append(xp[:, dy:dy + stride * (Ho - 1) + 1:stride,
                              dx:dx + stride * (Wo - 1) + 1:stride, :])
    A = jnp.concatenate(cols, axis=-1).reshape(N * Ho * Wo, k * k * Cin)
    y = fused_matmul(A, w0r, escale=scale0, eshift=shift0, epilogue_relu=True,
                     out_dtype=jnp.bfloat16)
    return y.reshape(N, Ho, Wo, -1)


def dense_block(x, layers):
    """One _DenseBlock: features written in place into a fixed-width buffer."""
    N, H, W, C0 = x.shape
    g = layers[0]["w2"].shape[-1]
    C_final = C0 + len(layers) * g
    M = N * H * W

    buf = jnp.zeros((N, H, W, C_final), jnp.bfloat16)
    buf = jax.lax.dynamic_update_slice(buf, x.astype(jnp.bfloat16), (0, 0, 0, 0))

    for j, lp in enumerate(layers):
        Cin = C0 + j * g
        # K extent = Cin rounded up to 128 (capped at C_final); padding (zero scale,
        # zero shift, zero weight rows) was done once in prepare_params, so unwritten
        # channels contribute exactly zero and no extra channels are DMA'd.
        Kblk = lp["w1"].shape[0]
        # norm1+relu1+conv1(1x1)+norm2+relu2 fused into a single matmul call.
        h = fused_matmul(buf.reshape(M, C_final), lp["w1"],
                         pscale=lp["s1"], pshift=lp["b1"],
                         escale=lp["s2"], eshift=lp["b2"],
                         prologue_relu=True, epilogue_relu=True,
                         out_dtype=jnp.bfloat16, k_width=Kblk)
        h = h.reshape(N, H, W, -1)
        new_feat = conv3x3_same(h, lp["w2"])                 # conv2 (3x3), bias=False
        # TODO(synk): replace the per-layer dynamic_update_slice with an aliased
        #             in-kernel channel write (input_output_aliases) to remove the
        #             full-buffer RMW when XLA cannot update in place.
        buf = jax.lax.dynamic_update_slice(buf, new_feat, (0, 0, 0, Cin))
    return buf


def transition(x, tp):
    """_Transition: norm+relu fused into the 2x2 avg-pool, then the 1x1 conv.

    (pool and 1x1 conv are both linear, so applying the conv after pooling is
    mathematically identical to the PyTorch order and does 4x less matmul work.)
    """
    pooled = bn_relu_avgpool2x2_s2(x, tp["s2c"], tp["b2c"])
    N, Ho, Wo, C = pooled.shape
    y = fused_matmul(pooled.reshape(N * Ho * Wo, C), tp["w"],
                     out_dtype=jnp.bfloat16)
    return y.reshape(N, Ho, Wo, -1)


def densenet_forward(x_nchw, p):
    # NCHW (PyTorch) -> NHWC (kernel layout), bf16 activations.
    x = jnp.transpose(x_nchw, (0, 2, 3, 1)).astype(jnp.bfloat16)

    # features: conv0 -> norm0 -> relu0 -> pool0
    x = conv0_stem(x, p["conv0_w"], p["norm0"][0], p["norm0"][1])
    x = maxpool3x3_s2_p1(x)

    nb = len(p["blocks"])
    for i, layers in enumerate(p["blocks"]):
        x = dense_block(x, layers)
        if i != nb - 1:
            x = transition(x, p["transitions"][i])

    # norm5 -> F.relu -> adaptive_avg_pool2d -> flatten -> classifier
    feat = bn_relu_gap(x, p["norm5"][0], p["norm5"][1])
    logits = fused_matmul(feat, p["cls_w"], eshift=p["cls_b"],
                          out_dtype=jnp.float32)
    return logits


# ----------------------------- parameters -----------------------------

def init_params(key, growth_rate, block_config, num_init_features, bn_size, num_classes):
    keys = iter(jax.random.split(key, 512))

    def conv_w(cout, cin, kh, kw):
        fan_in = cin * kh * kw
        std = math.sqrt(2.0 / fan_in)  # kaiming_normal_
        return std * jax.random.normal(next(keys), (cout, cin, kh, kw), jnp.float32)

    def bn_p(c):
        return {"gamma": jnp.ones((c,), jnp.float32),
                "beta": jnp.zeros((c,), jnp.float32),
                "mean": jnp.zeros((c,), jnp.float32),
                "var": jnp.ones((c,), jnp.float32)}

    params = {"conv0": conv_w(num_init_features, 3, 7, 7),
              "norm0": bn_p(num_init_features),
              "blocks": [],
              "transitions": []}
    num_features = num_init_features
    for i, num_layers in enumerate(block_config):
        layers = []
        for j in range(num_layers):
            nin = num_features + j * growth_rate
            layers.append({
                "norm1": bn_p(nin),
                "conv1": conv_w(bn_size * growth_rate, nin, 1, 1),
                "norm2": bn_p(bn_size * growth_rate),
                "conv2": conv_w(growth_rate, bn_size * growth_rate, 3, 3),
            })
        params["blocks"].append(layers)
        num_features += num_layers * growth_rate
        if i != len(block_config) - 1:
            params["transitions"].append({
                "norm": bn_p(num_features),
                "conv": conv_w(num_features // 2, num_features, 1, 1),
            })
            num_features //= 2
    params["norm5"] = bn_p(num_features)
    bound = 1.0 / math.sqrt(num_features)
    params["classifier_w"] = jax.random.uniform(
        next(keys), (num_classes, num_features), jnp.float32, -bound, bound)
    params["classifier_b"] = jnp.zeros((num_classes,), jnp.float32)
    return params


def _bn_fold(bn, eps=1e-5):
    scale = bn["gamma"] / jnp.sqrt(bn["var"] + eps)
    shift = bn["beta"] - bn["mean"] * scale
    return scale.astype(jnp.float32), shift.astype(jnp.float32)


def _round_up(v, m):
    return ((v + m - 1) // m) * m


def prepare_params(params):
    """Fold BN into per-channel scale/shift, cast conv weights to bf16, and pad
    each dense layer's K extent to its 128-aligned width once (not per forward)."""
    bf16 = jnp.bfloat16
    p = {}
    c0 = params["conv0"].shape[0]
    p["conv0_w"] = jnp.transpose(params["conv0"], (2, 3, 1, 0)).reshape(-1, c0).astype(bf16)
    p["norm0"] = _bn_fold(params["norm0"])
    p["blocks"] = []
    for layers in params["blocks"]:
        L = len(layers)
        C0 = layers[0]["norm1"]["gamma"].shape[0]
        g = layers[0]["conv2"].shape[0]
        C_final = C0 + L * g
        prepped = []
        for j, lp in enumerate(layers):
            Cin = C0 + j * g
            Kblk = min(_round_up(Cin, 128), C_final)
            s1, b1 = _bn_fold(lp["norm1"])
            s2, b2 = _bn_fold(lp["norm2"])
            cb = lp["conv1"].shape[0]
            gg = lp["conv2"].shape[0]
            # Zero-padded scale/shift/weight rows -> padded channels contribute 0.
            s1p = jnp.pad(s1, (0, Kblk - Cin)).astype(bf16)
            b1p = jnp.pad(b1, (0, Kblk - Cin)).astype(bf16)
            w1 = jnp.pad(lp["conv1"].reshape(cb, -1).T,
                         ((0, Kblk - Cin), (0, 0))).astype(bf16)                   # (Kblk, Cb)
            w2 = jnp.transpose(lp["conv2"], (2, 3, 1, 0)).reshape(9, -1, gg).astype(bf16)
            prepped.append({"s1": s1p, "b1": b1p, "w1": w1,
                            "s2": s2, "b2": b2, "w2": w2})
        p["blocks"].append(prepped)
    p["transitions"] = []
    for tp in params["transitions"]:
        s, b = _bn_fold(tp["norm"])
        cout = tp["conv"].shape[0]
        p["transitions"].append({
            "s2c": jnp.concatenate([s, s]),     # (2C,) matches the phase-split pool layout
            "b2c": jnp.concatenate([b, b]),
            "w": tp["conv"].reshape(cout, -1).T.astype(bf16)})
    p["norm5"] = _bn_fold(params["norm5"])
    p["cls_w"] = params["classifier_w"].T.astype(bf16)
    p["cls_b"] = params["classifier_b"].astype(jnp.float32)
    return p


# ----------------------------- main -----------------------------

if __name__ == "__main__":
    # Small DenseNet-BC config (same structure as the PyTorch module, scaled down)
    growth_rate = 8
    block_config = (2, 2)
    num_init_features = 16
    bn_size = 2
    num_classes = 10

    key = jax.random.PRNGKey(0)
    pkey, xkey = jax.random.split(key)
    params = init_params(pkey, growth_rate, block_config,
                         num_init_features, bn_size, num_classes)
    prepared = prepare_params(params)
    x = jax.random.normal(xkey, (2, 3, 32, 32), jnp.float32)  # NCHW, like PyTorch

    fwd = jax.jit(densenet_forward)
    out = fwd(x, prepared)
    jax.block_until_ready(out)
    assert out.shape == (2, num_classes)
    assert bool(jnp.all(jnp.isfinite(out)))
    print("KERNEL_OK")
</pallas_src>

<mosaic_0001>
module attributes {stable_mosaic.version = 11 : i64} {
  func.func @_fused_mm_kernel(%arg0: i32, %arg1: memref<512x147xbf16, #tpu.memory_space<vmem>>, %arg2: memref<147x16xbf16, #tpu.memory_space<vmem>>, %arg3: memref<1x147xbf16, #tpu.memory_space<vmem>>, %arg4: memref<1x147xbf16, #tpu.memory_space<vmem>>, %arg5: memref<1x16xf32, #tpu.memory_space<vmem>>, %arg6: memref<1x16xf32, #tpu.memory_space<vmem>>, %arg7: memref<512x16xbf16, #tpu.memory_space<vmem>>) attributes {dimension_semantics = [#tpu.dimension_semantics<parallel>], iteration_bounds = array<i64: 1>, scalar_prefetch = 0 : i64, scratch_operands = 0 : i64, tpu.core_type = #tpu.core_type<tc>, window_params = [{transform_indices = @transform_0, window_bounds = array<i64: 512, 147>}, {pipeline_mode = #tpu.pipeline_mode<synchronous>, transform_indices = @transform_1, window_bounds = array<i64: 147, 16>}, {pipeline_mode = #tpu.pipeline_mode<synchronous>, transform_indices = @transform_2, window_bounds = array<i64: 1, 147>}, {pipeline_mode = #tpu.pipeline_mode<synchronous>, transform_indices = @transform_3, window_bounds = array<i64: 1, 147>}, {pipeline_mode = #tpu.pipeline_mode<synchronous>, transform_indices = @transform_4, window_bounds = array<i64: 1, 16>}, {pipeline_mode = #tpu.pipeline_mode<synchronous>, transform_indices = @transform_5, window_bounds = array<i64: 1, 16>}, {transform_indices = @transform_6, window_bounds = array<i64: 512, 16>}]} {
    %c0 = arith.constant 0 : index
    %c0_0 = arith.constant 0 : index
    %0 = vector.load %arg1[%c0, %c0_0] : memref<512x147xbf16, #tpu.memory_space<vmem>>, vector<512x147xbf16>
    %c0_1 = arith.constant 0 : index
    %c0_2 = arith.constant 0 : index
    %1 = vector.load %arg2[%c0_1, %c0_2] : memref<147x16xbf16, #tpu.memory_space<vmem>>, vector<147x16xbf16>
    %cst = arith.constant dense<0.000000e+00> : vector<512x16xf32>
    %2 = tpu.matmul %0, %1, %cst {dimension_numbers = #tpu.dot_dimension_numbers<[1], [0], [0], [1], [0, 0, 1, 1], [], []>} : vector<512x147xbf16>, vector<147x16xbf16>, vector<512x16xf32> -> vector<512x16xf32>
    %c0_3 = arith.constant 0 : index
    %c0_4 = arith.constant 0 : index
    %3 = vector.load %arg5[%c0_3, %c0_4] : memref<1x16xf32, #tpu.memory_space<vmem>>, vector<1x16xf32>
    %4 = vector.broadcast %3 : vector<1x16xf32> to vector<512x16xf32>
    %5 = arith.mulf %2, %4 : vector<512x16xf32>
    %c0_5 = arith.constant 0 : index
    %c0_6 = arith.constant 0 : index
    %6 = vector.load %arg6[%c0_5, %c0_6] : memref<1x16xf32, #tpu.memory_space<vmem>>, vector<1x16xf32>
    %7 = vector.broadcast %6 : vector<1x16xf32> to vector<512x16xf32>
    %8 = arith.addf %5, %7 : vector<512x16xf32>
    %cst_7 = arith.constant 0.000000e+00 : f32
    %9 = vector.broadcast %cst_7 : f32 to vector<512x16xf32>
    %10 = arith.maximumf %8, %9 : vector<512x16xf32>
    %11 = arith.truncf %10 : vector<512x16xf32> to vector<512x16xbf16>
    %c0_8 = arith.constant 0 : index
    %c0_9 = arith.constant 0 : index
    %12 = vector.load %arg7[%c0_8, %c0_9] : memref<512x16xbf16, #tpu.memory_space<vmem>>, vector<512x16xbf16>
    tpu.vector_store %arg7[%c0_8, %c0_9], %11 {strides = array<i32>} : memref<512x16xbf16, #tpu.memory_space<vmem>>, vector<512x16xbf16>,
    return
  }
  func.func @transform_0(%arg0: i32) -> (i32, i32) {
    %c0_i32 = arith.constant 0 : i32
    %c0_i32_0 = arith.constant 0 : i32
    return %arg0, %c0_i32 : i32, i32
  }
  func.func @transform_1(%arg0: i32) -> (i32, i32) {
    %c0_i32 = arith.constant 0 : i32
    %c0_i32_0 = arith.constant 0 : i32
    %c0_i32_1 = arith.constant 0 : i32
    return %c0_i32, %c0_i32_0 : i32, i32
  }
  func.func @transform_2(%arg0: i32) -> (i32, i32) {
    %c0_i32 = arith.constant 0 : i32
    %c0_i32_0 = arith.constant 0 : i32
    %c0_i32_1 = arith.constant 0 : i32
    return %c0_i32, %c0_i32_0 : i32, i32
  }
  func.func @transform_3(%arg0: i32) -> (i32, i32) {
    %c0_i32 = arith.constant 0 : i32
    %c0_i32_0 = arith.constant 0 : i32
    %c0_i32_1 = arith.constant 0 : i32
    return %c0_i32, %c0_i32_0 : i32, i32
  }
  func.func @transform_4(%arg0: i32) -> (i32, i32) {
    %c0_i32 = arith.constant 0 : i32
    %c0_i32_0 = arith.constant 0 : i32
    %c0_i32_1 = arith.constant 0 : i32
    return %c0_i32, %c0_i32_0 : i32, i32
  }
  func.func @transform_5(%arg0: i32) -> (i32, i32) {
    %c0_i32 = arith.constant 0 : i32
    %c0_i32_0 = arith.constant 0 : i32
    %c0_i32_1 = arith.constant 0 : i32
    return %c0_i32, %c0_i32_0 : i32, i32
  }
  func.func @transform_6(%arg0: i32) -> (i32, i32) {
    %c0_i32 = arith.constant 0 : i32
    %c0_i32_0 = arith.constant 0 : i32
    return %arg0, %c0_i32 : i32, i32
  }
}

module attributes {stable_mosaic.version = 11 : i64} {
  func.func @_maxpool3x3_s2_kernel(%arg0: i32, %arg1: memref<1x9x2x9x32xbf16, #tpu.memory_space<vmem>>, %arg2: memref<1x8x8x16xbf16, #tpu.memory_space<vmem>>) attributes {dimension_semantics = [#tpu.dimension_semantics<parallel>], iteration_bounds = array<i64: 2>, scalar_prefetch = 0 : i64, scratch_operands = 0 : i64, tpu.core_type = #tpu.core_type<tc>, window_params = [{transform_indices = @transform_0, window_bounds = array<i64: 1, 9, 2, 9, 32>}, {transform_indices = @transform_1, window_bounds = array<i64: 1, 8, 8, 16>}]} {
    %c0 = arith.constant 0 : index
    %c0_0 = arith.constant 0 : index
    %c0_1 = arith.constant 0 : index
    %c0_2 = arith.constant 0 : index
    %c0_3 = arith.constant 0 : index
    %0 = vector.load %arg1[%c0, %c0_0, %c0_1, %c0_2, %c0_3] : memref<1x9x2x9x32xbf16, #tpu.memory_space<vmem>>, vector<1x8x1x8x16xbf16>
    %1 = vector.shape_cast %0 : vector<1x8x1x8x16xbf16> to vector<8x8x16xbf16>
    %c0_4 = arith.constant 0 : index
    %c0_5 = arith.constant 0 : index
    %c0_6 = arith.constant 0 : index
    %c0_7 = arith.constant 0 : index
    %c16 = arith.constant 16 : index
    %2 = vector.load %arg1[%c0_4, %c0_5, %c0_6, %c0_7, %c16] : memref<1x9x2x9x32xbf16, #tpu.memory_space<vmem>>, vector<1x8x1x8x16xbf16>
    %3 = vector.shape_cast %2 : vector<1x8x1x8x16xbf16> to vector<8x8x16xbf16>
    %4 = arith.maximumf %1, %3 : vector<8x8x16xbf16>
    %c0_8 = arith.constant 0 : index
    %c0_9 = arith.constant 0 : index
    %c0_10 = arith.constant 0 : index
    %c1 = arith.constant 1 : index
    %c0_11 = arith.constant 0 : index
    %5 = vector.load %arg1[%c0_8, %c0_9, %c0_10, %c1, %c0_11] : memref<1x9x2x9x32xbf16, #tpu.memory_space<vmem>>, vector<1x8x1x8x16xbf16>
    %6 = vector.shape_cast %5 : vector<1x8x1x8x16xbf16> to vector<8x8x16xbf16>
    %7 = arith.maximumf %4, %6 : vector<8x8x16xbf16>
    %c0_12 = arith.constant 0 : index
    %c0_13 = arith.constant 0 : index
    %c1_14 = arith.constant 1 : index
    %c0_15 = arith.constant 0 : index
    %c0_16 = arith.constant 0 : index
    %8 = vector.load %arg1[%c0_12, %c0_13, %c1_14, %c0_15, %c0_16] : memref<1x9x2x9x32xbf16, #tpu.memory_space<vmem>>, vector<1x8x1x8x16xbf16>
    %9 = vector.shape_cast %8 : vector<1x8x1x8x16xbf16> to vector<8x8x16xbf16>
    %10 = arith.maximumf %7, %9 : vector<8x8x16xbf16>
    %c0_17 = arith.constant 0 : index
    %c0_18 = arith.constant 0 : index
    %c1_19 = arith.constant 1 : index
    %c0_20 = arith.constant 0 : index
    %c16_21 = arith.constant 16 : index
    %11 = vector.load %arg1[%c0_17, %c0_18, %c1_19, %c0_20, %c16_21] : memref<1x9x2x9x32xbf16, #tpu.memory_space<vmem>>, vector<1x8x1x8x16xbf16>
    %12 = vector.shape_cast %11 : vector<1x8x1x8x16xbf16> to vector<8x8x16xbf16>
    %13 = arith.maximumf %10, %12 : vector<8x8x16xbf16>
    %c0_22 = arith.constant 0 : index
    %c0_23 = arith.constant 0 : index
    %c1_24 = arith.constant 1 : index
    %c1_25 = arith.constant 1 : index
    %c0_26 = arith.constant 0 : index
    %14 = vector.load %arg1[%c0_22, %c0_23, %c1_24, %c1_25, %c0_26] : memref<1x9x2x9x32xbf16, #tpu.memory_space<vmem>>, vector<1x8x1x8x16xbf16>
    %15 = vector.shape_cast %14 : vector<1x8x1x8x16xbf16> to vector<8x8x16xbf16>
    %16 = arith.maximumf %13, %15 : vector<8x8x16xbf16>
    %c0_27 = arith.constant 0 : index
    %c1_28 = arith.constant 1 : index
    %c0_29 = arith.constant 0 : index
    %c0_30 = arith.constant 0 : index
    %c0_31 = arith.constant 0 : index
    %17 = vector.load %arg1[%c0_27, %c1_28, %c0_29, %c0_30, %c0_31] : memref<1x9x2x9x32xbf16, #tpu.memory_space<vmem>>, vector<1x8x1x8x16xbf16>
    %18 = vector.shape_cast %17 : vector<1x8x1x8x16xbf16> to vector<8x8x16xbf16>
    %19 = arith.maximumf %16, %18 : vector<8x8x16xbf16>
    %c0_32 = arith.constant 0 : index
    %c1_33 = arith.constant 1 : index
    %c0_34 = arith.constant 0 : index
    %c0_35 = arith.constant 0 : index
    %c16_36 = arith.constant 16 : index
    %20 = vector.load %arg1[%c0_32, %c1_33, %c0_34, %c0_35, %c16_36] : memref<1x9x2x9x32xbf16, #tpu.memory_space<vmem>>, vector<1x8x1x8x16xbf16>
    %21 = vector.shape_cast %20 : vector<1x8x1x8x16xbf16> to vector<8x8x16xbf16>
    %22 = arith.maximumf %19, %21 : vector<8x8x16xbf16>
    %c0_37 = arith.constant 0 : index
    %c1_38 = arith.constant 1 : index
    %c0_39 = arith.constant 0 : index
    %c1_40 = arith.constant 1 : index
    %c0_41 = arith.constant 0 : index
    %23 = vector.load %arg1[%c0_37, %c1_38, %c0_39, %c1_40, %c0_41] : memref<1x9x2x9x32xbf16, #tpu.memory_space<vmem>>, vector<1x8x1x8x16xbf16>
    %24 = vector.shape_cast %23 : vector<1x8x1x8x16xbf16> to vector<8x8x16xbf16>
    %25 = arith.maximumf %22, %24 : vector<8x8x16xbf16>
    %c0_42 = arith.constant 0 : index
    %c0_43 = arith.constant 0 : index
    %c0_44 = arith.constant 0 : index
    %c0_45 = arith.constant 0 : index
    %26 = vector.load %arg2[%c0_42, %c0_43, %c0_44, %c0_45] : memref<1x8x8x16xbf16, #tpu.memory_space<vmem>>, vector<1x8x8x16xbf16>
    %27 = vector.shape_cast %26 : vector<1x8x8x16xbf16> to vector<8x8x16xbf16>
    %28 = vector.shape_cast %25 : vector<8x8x16xbf16> to vector<1x8x8x16xbf16>
    tpu.vector_store %arg2[%c0_42, %c0_43, %c0_44, %c0_45], %28 {strides = array<i32>} : memref<1x8x8x16xbf16, #tpu.memory_space<vmem>>, vector<1x8x8x16xbf16>,
    return
  }
  func.func @transform_0(%arg0: i32) -> (i32, i32, i32, i32, i32) {
    %c0_i32 = arith.constant 0 : i32
    %c0_i32_0 = arith.constant 0 : i32
    %c0_i32_1 = arith.constant 0 : i32
    %c0_i32_2 = arith.constant 0 : i32
    %c0_i32_3 = arith.constant 0 : i32
    return %arg0, %c0_i32, %c0_i32_0, %c0_i32_1, %c0_i32_2 : i32, i32, i32, i32, i32
  }
  func.func @transform_1(%arg0: i32) -> (i32, i32, i32, i32) {
    %c0_i32 = arith.constant 0 : i32
    %c0_i32_0 = arith.constant 0 : i32
    %c0_i32_1 = arith.constant 0 : i32
    %c0_i32_2 = arith.constant 0 : i32
    return %arg0, %c0_i32, %c0_i32_0, %c0_i32_1 : i32, i32, i32, i32
  }
}

module attributes {stable_mosaic.version = 11 : i64} {
  func.func @_fused_mm_kernel(%arg0: i32, %arg1: memref<128x32xbf16, #tpu.memory_space<vmem>>, %arg2: memref<32x16xbf16, #tpu.memory_space<vmem>>, %arg3: memref<1x32xbf16, #tpu.memory_space<vmem>>, %arg4: memref<1x32xbf16, #tpu.memory_space<vmem>>, %arg5: memref<1x16xf32, #tpu.memory_space<vmem>>, %arg6: memref<1x16xf32, #tpu.memory_space<vmem>>, %arg7: memref<128x16xbf16, #tpu.memory_space<vmem>>) attributes {dimension_semantics = [#tpu.dimension_semantics<parallel>], iteration_bounds = array<i64: 1>, scalar_prefetch = 0 : i64, scratch_operands = 0 : i64, tpu.core_type = #tpu.core_type<tc>, window_params = [{transform_indices = @transform_0, window_bounds = array<i64: 128, 32>}, {pipeline_mode = #tpu.pipeline_mode<synchronous>, transform_indices = @transform_1, window_bounds = array<i64: 32, 16>}, {pipeline_mode = #tpu.pipeline_mode<synchronous>, transform_indices = @transform_2, window_bounds = array<i64: 1, 32>}, {pipeline_mode = #tpu.pipeline_mode<synchronous>, transform_indices = @transform_3, window_bounds = array<i64: 1, 32>}, {pipeline_mode = #tpu.pipeline_mode<synchronous>, transform_indices = @transform_4, window_bounds = array<i64: 1, 16>}, {pipeline_mode = #tpu.pipeline_mode<synchronous>, transform_indices = @transform_5, window_bounds = array<i64: 1, 16>}, {transform_indices = @transform_6, window_bounds = array<i64: 128, 16>}]} {
    %c0 = arith.constant 0 : index
    %c0_0 = arith.constant 0 : index
    %0 = vector.load %arg1[%c0, %c0_0] : memref<128x32xbf16, #tpu.memory_space<vmem>>, vector<128x32xbf16>
    %c0_1 = arith.constant 0 : index
    %c0_2 = arith.constant 0 : index
    %1 = vector.load %arg3[%c0_1, %c0_2] : memref<1x32xbf16, #tpu.memory_space<vmem>>, vector<1x32xbf16>
    %2 = vector.broadcast %1 : vector<1x32xbf16> to vector<128x32xbf16>
    %3 = arith.mulf %0, %2 : vector<128x32xbf16>
    %c0_3 = arith.constant 0 : index
    %c0_4 = arith.constant 0 : index
    %4 = vector.load %arg4[%c0_3, %c0_4] : memref<1x32xbf16, #tpu.memory_space<vmem>>, vector<1x32xbf16>
    %5 = vector.broadcast %4 : vector<1x32xbf16> to vector<128x32xbf16>
    %6 = arith.addf %3, %5 : vector<128x32xbf16>
    %cst = arith.constant 0.000000e+00 : bf16
    %7 = vector.broadcast %cst : bf16 to vector<128x32xbf16>
    %8 = arith.maximumf %6, %7 : vector<128x32xbf16>
    %c0_5 = arith.constant 0 : index
    %c0_6 = arith.constant 0 : index
    %9 = vector.load %arg2[%c0_5, %c0_6] : memref<32x16xbf16, #tpu.memory_space<vmem>>, vector<32x16xbf16>
    %cst_7 = arith.constant dense<0.000000e+00> : vector<128x16xf32>
    %10 = tpu.matmul %8, %9, %cst_7 {dimension_numbers = #tpu.dot_dimension_numbers<[1], [0], [0], [1], [0, 0, 1, 1], [], []>} : vector<128x32xbf16>, vector<32x16xbf16>, vector<128x16xf32> -> vector<128x16xf32>
    %c0_8 = arith.constant 0 : index
    %c0_9 = arith.constant 0 : index
    %11 = vector.load %arg5[%c0_8, %c0_9] : memref<1x16xf32, #tpu.memory_space<vmem>>, vector<1x16xf32>
    %12 = vector.broadcast %11 : vector<1x16xf32> to vector<128x16xf32>
    %13 = arith.mulf %10, %12 : vector<128x16xf32>
    %c0_10 = arith.constant 0 : index
    %c0_11 = arith.constant 0 : index
    %14 = vector.load %arg6[%c0_10, %c0_11] : memref<1x16xf32, #tpu.memory_space<vmem>>, vector<1x16xf32>
    %15 = vector.broadcast %14 : vector<1x16xf32> to vector<128x16xf32>
    %16 = arith.addf %13, %15 : vector<128x16xf32>
    %cst_12 = arith.constant 0.000000e+00 : f32
    %17 = vector.broadcast %cst_12 : f32 to vector<128x16xf32>
    %18 = arith.maximumf %16, %17 : vector<128x16xf32>
    %19 = arith.truncf %18 : vector<128x16xf32> to vector<128x16xbf16>
    %c0_13 = arith.constant 0 : index
    %c0_14 = arith.constant 0 : index
    %20 = vector.load %arg7[%c0_13, %c0_14] : memref<128x16xbf16, #tpu.memory_space<vmem>>, vector<128x16xbf16>
    tpu.vector_store %arg7[%c0_13, %c0_14], %19 {strides = array<i32>} : memref<128x16xbf16, #tpu.memory_space<vmem>>, vector<128x16xbf16>,
    return
  }
  func.func @transform_0(%arg0: i32) -> (i32, i32) {
    %c0_i32 = arith.constant 0 : i32
    %c0_i32_0 = arith.constant 0 : i32
    return %arg0, %c0_i32 : i32, i32
  }
  func.func @transform_1(%arg0: i32) -> (i32, i32) {
    %c0_i32 = arith.constant 0 : i32
    %c0_i32_0 = arith.constant 0 : i32
    %c0_i32_1 = arith.constant 0 : i32
    return %c0_i32, %c0_i32_0 : i32, i32
  }
  func.func @transform_2(%arg0: i32) -> (i32, i32) {
    %c0_i32 = arith.constant 0 : i32
    %c0_i32_0 = arith.constant 0 : i32
    %c0_i32_1 = arith.constant 0 : i32
    return %c0_i32, %c0_i32_0 : i32, i32
  }
  func.func @transform_3(%arg0: i32) -> (i32, i32) {
    %c0_i32 = arith.constant 0 : i32
    %c0_i32_0 = arith.constant 0 : i32
    %c0_i32_1 = arith.constant 0 : i32
    return %c0_i32, %c0_i32_0 : i32, i32
  }
  func.func @transform_4(%arg0: i32) -> (i32, i32) {
    %c0_i32 = arith.constant 0 : i32
    %c0_i32_0 = arith.constant 0 : i32
    %c0_i32_1 = arith.constant 0 : i32
    return %c0_i32, %c0_i32_0 : i32, i32
  }
  func.func @transform_5(%arg0: i32) -> (i32, i32) {
    %c0_i32 = arith.constant 0 : i32
    %c0_i32_0 = arith.constant 0 : i32
    %c0_i32_1 = arith.constant 0 : i32
    return %c0_i32, %c0_i32_0 : i32, i32
  }
  func.func @transform_6(%arg0: i32) -> (i32, i32) {
    %c0_i32 = arith.constant 0 : i32
    %c0_i32_0 = arith.constant 0 : i32
    return %arg0, %c0_i32 : i32, i32
  }
}

module attributes {stable_mosaic.version = 11 : i64} {
  func.func @_conv3x3_kernel(%arg0: i32, %arg1: memref<1x10x10x16xbf16, #tpu.memory_space<vmem>>, %arg2: memref<9x16x8xbf16, #tpu.memory_space<vmem>>, %arg3: memref<1x8x8x8xbf16, #tpu.memory_space<vmem>>) attributes {dimension_semantics = [#tpu.dimension_semantics<parallel>], iteration_bounds = array<i64: 2>, scalar_prefetch = 0 : i64, scratch_operands = 0 : i64, tpu.core_type = #tpu.core_type<tc>, window_params = [{transform_indices = @transform_0, window_bounds = array<i64: 1, 10, 10, 16>}, {pipeline_mode = #tpu.pipeline_mode<synchronous>, transform_indices = @transform_1, window_bounds = array<i64: 9, 16, 8>}, {transform_indices = @transform_2, window_bounds = array<i64: 1, 8, 8, 8>}]} {
    %cst = arith.constant 0.000000e+00 : f32
    %0 = vector.broadcast %cst : f32 to vector<64x8xf32>
    %c0 = arith.constant 0 : index
    %c0_0 = arith.constant 0 : index
    %c0_1 = arith.constant 0 : index
    %c0_2 = arith.constant 0 : index
    %1 = vector.load %arg1[%c0, %c0_0, %c0_1, %c0_2] : memref<1x10x10x16xbf16, #tpu.memory_space<vmem>>, vector<1x8x8x16xbf16>
    %2 = vector.shape_cast %1 : vector<1x8x8x16xbf16> to vector<8x8x16xbf16>
    %3 = vector.shape_cast %2 : vector<8x8x16xbf16> to vector<64x16xbf16>
    %c0_3 = arith.constant 0 : index
    %c0_4 = arith.constant 0 : index
    %c0_5 = arith.constant 0 : index
    %4 = vector.load %arg2[%c0_3, %c0_4, %c0_5] : memref<9x16x8xbf16, #tpu.memory_space<vmem>>, vector<1x16x8xbf16>
    %5 = vector.shape_cast %4 : vector<1x16x8xbf16> to vector<16x8xbf16>
    %cst_6 = arith.constant dense<0.000000e+00> : vector<64x8xf32>
    %6 = tpu.matmul %3, %5, %cst_6 {dimension_numbers = #tpu.dot_dimension_numbers<[1], [0], [0], [1], [0, 0, 1, 1], [], []>} : vector<64x16xbf16>, vector<16x8xbf16>, vector<64x8xf32> -> vector<64x8xf32>
    %7 = arith.addf %0, %6 : vector<64x8xf32>
    %c0_7 = arith.constant 0 : index
    %c0_8 = arith.constant 0 : index
    %c1 = arith.constant 1 : index
    %c0_9 = arith.constant 0 : index
    %8 = vector.load %arg1[%c0_7, %c0_8, %c1, %c0_9] : memref<1x10x10x16xbf16, #tpu.memory_space<vmem>>, vector<1x8x8x16xbf16>
    %9 = vector.shape_cast %8 : vector<1x8x8x16xbf16> to vector<8x8x16xbf16>
    %10 = vector.shape_cast %9 : vector<8x8x16xbf16> to vector<64x16xbf16>
    %c1_10 = arith.constant 1 : index
    %c0_11 = arith.constant 0 : index
    %c0_12 = arith.constant 0 : index
    %11 = vector.load %arg2[%c1_10, %c0_11, %c0_12] : memref<9x16x8xbf16, #tpu.memory_space<vmem>>, vector<1x16x8xbf16>
    %12 = vector.shape_cast %11 : vector<1x16x8xbf16> to vector<16x8xbf16>
    %cst_13 = arith.constant dense<0.000000e+00> : vector<64x8xf32>
    %13 = tpu.matmul %10, %12, %cst_13 {dimension_numbers = #tpu.dot_dimension_numbers<[1], [0], [0], [1], [0, 0, 1, 1], [], []>} : vector<64x16xbf16>, vector<16x8xbf16>, vector<64x8xf32> -> vector<64x8xf32>
    %14 = arith.addf %7, %13 : vector<64x8xf32>
    %c0_14 = arith.constant 0 : index
    %c0_15 = arith.constant 0 : index
    %c2 = arith.constant 2 : index
    %c0_16 = arith.constant 0 : index
    %15 = vector.load %arg1[%c0_14, %c0_15, %c2, %c0_16] : memref<1x10x10x16xbf16, #tpu.memory_space<vmem>>, vector<1x8x8x16xbf16>
    %16 = vector.shape_cast %15 : vector<1x8x8x16xbf16> to vector<8x8x16xbf16>
    %17 = vector.shape_cast %16 : vector<8x8x16xbf16> to vector<64x16xbf16>
    %c2_17 = arith.constant 2 : index
    %c0_18 = arith.constant 0 : index
    %c0_19 = arith.constant 0 : index
    %18 = vector.load %arg2[%c2_17, %c0_18, %c0_19] : memref<9x16x8xbf16, #tpu.memory_space<vmem>>, vector<1x16x8xbf16>
    %19 = vector.shape_cast %18 : vector<1x16x8xbf16> to vector<16x8xbf16>
    %cst_20 = arith.constant dense<0.000000e+00> : vector<64x8xf32>
    %20 = tpu.matmul %17, %19, %cst_20 {dimension_numbers = #tpu.dot_dimension_numbers<[1], [0], [0], [1], [0, 0, 1, 1], [], []>} : vector<64x16xbf16>, vector<16x8xbf16>, vector<64x8xf32> -> vector<64x8xf32>
    %21 = arith.addf %14, %20 : vector<64x8xf32>
    %c0_21 = arith.constant 0 : index
    %c1_22 = arith.constant 1 : index
    %c0_23 = arith.constant 0 : index
    %c0_24 = arith.constant 0 : index
    %22 = vector.load %arg1[%c0_21, %c1_22, %c0_23, %c0_24] : memref<1x10x10x16xbf16, #tpu.memory_space<vmem>>, vector<1x8x8x16xbf16>
    %23 = vector.shape_cast %22 : vector<1x8x8x16xbf16> to vector<8x8x16xbf16>
    %24 = vector.shape_cast %23 : vector<8x8x16xbf16> to vector<64x16xbf16>
    %c3 = arith.constant 3 : index
    %c0_25 = arith.constant 0 : index
    %c0_26 = arith.constant 0 : index
    %25 = vector.load %arg2[%c3, %c0_25, %c0_26] : memref<9x16x8xbf16, #tpu.memory_space<vmem>>, vector<1x16x8xbf16>
    %26 = vector.shape_cast %25 : vector<1x16x8xbf16> to vector<16x8xbf16>
    %cst_27 = arith.constant dense<0.000000e+00> : vector<64x8xf32>
    %27 = tpu.matmul %24, %26, %cst_27 {dimension_numbers = #tpu.dot_dimension_numbers<[1], [0], [0], [1], [0, 0, 1, 1], [], []>} : vector<64x16xbf16>, vector<16x8xbf16>, vector<64x8xf32> -> vector<64x8xf32>
    %28 = arith.addf %21, %27 : vector<64x8xf32>
    %c0_28 = arith.constant 0 : index
    %c1_29 = arith.constant 1 : index
    %c1_30 = arith.constant 1 : index
    %c0_31 = arith.constant 0 : index
    %29 = vector.load %arg1[%c0_28, %c1_29, %c1_30, %c0_31] : memref<1x10x10x16xbf16, #tpu.memory_space<vmem>>, vector<1x8x8x16xbf16>
    %30 = vector.shape_cast %29 : vector<1x8x8x16xbf16> to vector<8x8x16xbf16>
    %31 = vector.shape_cast %30 : vector<8x8x16xbf16> to vector<64x16xbf16>
    %c4 = arith.constant 4 : index
    %c0_32 = arith.constant 0 : index
    %c0_33 = arith.constant 0 : index
    %32 = vector.load %arg2[%c4, %c0_32, %c0_33] : memref<9x16x8xbf16, #tpu.memory_space<vmem>>, vector<1x16x8xbf16>
    %33 = vector.shape_cast %32 : vector<1x16x8xbf16> to vector<16x8xbf16>
    %cst_34 = arith.constant dense<0.000000e+00> : vector<64x8xf32>
    %34 = tpu.matmul %31, %33, %cst_34 {dimension_numbers = #tpu.dot_dimension_numbers<[1], [0], [0], [1], [0, 0, 1, 1], [], []>} : vector<64x16xbf16>, vector<16x8xbf16>, vector<64x8xf32> -> vector<64x8xf32>
    %35 = arith.addf %28, %34 : vector<64x8xf32>
    %c0_35 = arith.constant 0 : index
    %c1_36 = arith.constant 1 : index
    %c2_37 = arith.constant 2 : index
    %c0_38 = arith.constant 0 : index
    %36 = vector.load %arg1[%c0_35, %c1_36, %c2_37, %c0_38] : memref<1x10x10x16xbf16, #tpu.memory_space<vmem>>, vector<1x8x8x16xbf16>
    %37 = vector.shape_cast %36 : vector<1x8x8x16xbf16> to vector<8x8x16xbf16>
    %38 = vector.shape_cast %37 : vector<8x8x16xbf16> to vector<64x16xbf16>
    %c5 = arith.constant 5 : index
    %c0_39 = arith.constant 0 : index
    %c0_40 = arith.constant 0 : index
    %39 = vector.load %arg2[%c5, %c0_39, %c0_40] : memref<9x16x8xbf16, #tpu.memory_space<vmem>>, vector<1x16x8xbf16>
    %40 = vector.shape_cast %39 : vector<1x16x8xbf16> to vector<16x8xbf16>
    %cst_41 = arith.constant dense<0.000000e+00> : vector<64x8xf32>
    %41 = tpu.matmul %38, %40, %cst_41 {dimension_numbers = #tpu.dot_dimension_numbers<[1], [0], [0], [1], [0, 0, 1, 1], [], []>} : vector<64x16xbf16>, vector<16x8xbf16>, vector<64x8xf32> -> vector<64x8xf32>
    %42 = arith.addf %35, %41 : vector<64x8xf32>
    %c0_42 = arith.constant 0 : index
    %c2_43 = arith.constant 2 : index
    %c0_44 = arith.constant 0 : index
    %c0_45 = arith.constant 0 : index
    %43 = vector.load %arg1[%c0_42, %c2_43, %c0_44, %c0_45] : memref<1x10x10x16xbf16, #tpu.memory_space<vmem>>, vector<1x8x8x16xbf16>
    %44 = vector.shape_cast %43 : vector<1x8x8x16xbf16> to vector<8x8x16xbf16>
    %45 = vector.shape_cast %44 : vector<8x8x16xbf16> to vector<64x16xbf16>
    %c6 = arith.constant 6 : index
    %c0_46 = arith.constant 0 : index
    %c0_47 = arith.constant 0 : index
    %46 = vector.load %arg2[%c6, %c0_46, %c0_47] : memref<9x16x8xbf16, #tpu.memory_space<vmem>>, vector<1x16x8xbf16>
    %47 = vector.shape_cast %46 : vector<1x16x8xbf16> to vector<16x8xbf16>
    %cst_48 = arith.constant dense<0.000000e+00> : vector<64x8xf32>
    %48 = tpu.matmul %45, %47, %cst_48 {dimension_numbers = #tpu.dot_dimension_numbers<[1], [0], [0], [1], [0, 0, 1, 1], [], []>} : vector<64x16xbf16>, vector<16x8xbf16>, vector<64x8xf32> -> vector<64x8xf32>
    %49 = arith.addf %42, %48 : vector<64x8xf32>
    %c0_49 = arith.constant 0 : index
    %c2_50 = arith.constant 2 : index
    %c1_51 = arith.constant 1 : index
    %c0_52 = arith.constant 0 : index
    %50 = vector.load %arg1[%c0_49, %c2_50, %c1_51, %c0_52] : memref<1x10x10x16xbf16, #tpu.memory_space<vmem>>, vector<1x8x8x16xbf16>
    %51 = vector.shape_cast %50 : vector<1x8x8x16xbf16> to vector<8x8x16xbf16>
    %52 = vector.shape_cast %51 : vector<8x8x16xbf16> to vector<64x16xbf16>
    %c7 = arith.constant 7 : index
    %c0_53 = arith.constant 0 : index
    %c0_54 = arith.constant 0 : index
    %53 = vector.load %arg2[%c7, %c0_53, %c0_54] : memref<9x16x8xbf16, #tpu.memory_space<vmem>>, vector<1x16x8xbf16>
    %54 = vector.shape_cast %53 : vector<1x16x8xbf16> to vector<16x8xbf16>
    %cst_55 = arith.constant dense<0.000000e+00> : vector<64x8xf32>
    %55 = tpu.matmul %52, %54, %cst_55 {dimension_numbers = #tpu.dot_dimension_numbers<[1], [0], [0], [1], [0, 0, 1, 1], [], []>} : vector<64x16xbf16>, vector<16x8xbf16>, vector<64x8xf32> -> vector<64x8xf32>
    %56 = arith.addf %49, %55 : vector<64x8xf32>
    %c0_56 = arith.constant 0 : index
    %c2_57 = arith.constant 2 : index
    %c2_58 = arith.constant 2 : index
    %c0_59 = arith.constant 0 : index
    %57 = vector.load %arg1[%c0_56, %c2_57, %c2_58, %c0_59] : memref<1x10x10x16xbf16, #tpu.memory_space<vmem>>, vector<1x8x8x16xbf16>
    %58 = vector.shape_cast %57 : vector<1x8x8x16xbf16> to vector<8x8x16xbf16>
    %59 = vector.shape_cast %58 : vector<8x8x16xbf16> to vector<64x16xbf16>
    %c8 = arith.constant 8 : index
    %c0_60 = arith.constant 0 : index
    %c0_61 = arith.constant 0 : index
    %60 = vector.load %arg2[%c8, %c0_60, %c0_61] : memref<9x16x8xbf16, #tpu.memory_space<vmem>>, vector<1x16x8xbf16>
    %61 = vector.shape_cast %60 : vector<1x16x8xbf16> to vector<16x8xbf16>
    %cst_62 = arith.constant dense<0.000000e+00> : vector<64x8xf32>
    %62 = tpu.matmul %59, %61, %cst_62 {dimension_numbers = #tpu.dot_dimension_numbers<[1], [0], [0], [1], [0, 0, 1, 1], [], []>} : vector<64x16xbf16>, vector<16x8xbf16>, vector<64x8xf32> -> vector<64x8xf32>
    %63 = arith.addf %56, %62 : vector<64x8xf32>
    %64 = vector.shape_cast %63 : vector<64x8xf32> to vector<8x8x8xf32>
    %65 = arith.truncf %64 : vector<8x8x8xf32> to vector<8x8x8xbf16>
    %c0_63 = arith.constant 0 : index
    %c0_64 = arith.constant 0 : index
    %c0_65 = arith.constant 0 : index
    %c0_66 = arith.constant 0 : index
    %66 = vector.load %arg3[%c0_63, %c0_64, %c0_65, %c0_66] : memref<1x8x8x8xbf16, #tpu.memory_space<vmem>>, vector<1x8x8x8xbf16>
    %67 = vector.shape_cast %66 : vector<1x8x8x8xbf16> to vector<8x8x8xbf16>
    %68 = vector.shape_cast %65 : vector<8x8x8xbf16> to vector<1x8x8x8xbf16>
    tpu.vector_store %arg3[%c0_63, %c0_64, %c0_65, %c0_66], %68 {strides = array<i32>} : memref<1x8x8x8xbf16, #tpu.memory_space<vmem>>, vector<1x8x8x8xbf16>,
    return
  }
  func.func @transform_0(%arg0: i32) -> (i32, i32, i32, i32) {
    %c0_i32 = arith.constant 0 : i32
    %c0_i32_0 = arith.constant 0 : i32
    %c0_i32_1 = arith.constant 0 : i32
    %c0_i32_2 = arith.constant 0 : i32
    return %arg0, %c0_i32, %c0_i32_0, %c0_i32_1 : i32, i32, i32, i32
  }
  func.func @transform_1(%arg0: i32) -> (i32, i32, i32) {
    %c0_i32 = arith.constant 0 : i32
    %c0_i32_0 = arith.constant 0 : i32
    %c0_i32_1 = arith.constant 0 : i32
    %c0_i32_2 = arith.constant 0 : i32
    return %c0_i32, %c0_i32_0, %c0_i32_1 : i32, i32, i32
  }
  func.func @transform_2(%arg0: i32) -> (i32, i32, i32, i32) {
    %c0_i32 = arith.constant 0 : i32
    %c0_i32_0 = arith.constant 0 : i32
    %c0_i32_1 = arith.constant 0 : i32
    %c0_i32_2 = arith.constant 0 : i32
    return %arg0, %c0_i32, %c0_i32_0, %c0_i32_1 : i32, i32, i32, i32
  }
}

module attributes {stable_mosaic.version = 11 : i64} {
  func.func @_bn_relu_avgpool2x2_s2_kernel(%arg0: i32, %arg1: memref<1x4x2x4x64xbf16, #tpu.memory_space<vmem>>, %arg2: memref<1x1x64xf32, #tpu.memory_space<vmem>>, %arg3: memref<1x1x64xf32, #tpu.memory_space<vmem>>, %arg4: memref<1x4x4x32xbf16, #tpu.memory_space<vmem>>) attributes {dimension_semantics = [#tpu.dimension_semantics<parallel>], iteration_bounds = array<i64: 2>, scalar_prefetch = 0 : i64, scratch_operands = 0 : i64, tpu.core_type = #tpu.core_type<tc>, window_params = [{transform_indices = @transform_0, window_bounds = array<i64: 1, 4, 2, 4, 64>}, {pipeline_mode = #tpu.pipeline_mode<synchronous>, transform_indices = @transform_1, window_bounds = array<i64: 1, 1, 64>}, {pipeline_mode = #tpu.pipeline_mode<synchronous>, transform_indices = @transform_2, window_bounds = array<i64: 1, 1, 64>}, {transform_indices = @transform_3, window_bounds = array<i64: 1, 4, 4, 32>}]} {
    %c0 = arith.constant 0 : index
    %c0_0 = arith.constant 0 : index
    %c0_1 = arith.constant 0 : index
    %0 = vector.load %arg2[%c0, %c0_0, %c0_1] : memref<1x1x64xf32, #tpu.memory_space<vmem>>, vector<1x1x64xf32>
    %c0_2 = arith.constant 0 : index
    %c0_3 = arith.constant 0 : index
    %c0_4 = arith.constant 0 : index
    %1 = vector.load %arg3[%c0_2, %c0_3, %c0_4] : memref<1x1x64xf32, #tpu.memory_space<vmem>>, vector<1x1x64xf32>
    %c0_5 = arith.constant 0 : index
    %c0_6 = arith.constant 0 : index
    %c0_7 = arith.constant 0 : index
    %c0_8 = arith.constant 0 : index
    %c0_9 = arith.constant 0 : index
    %2 = vector.load %arg1[%c0_5, %c0_6, %c0_7, %c0_8, %c0_9] : memref<1x4x2x4x64xbf16, #tpu.memory_space<vmem>>, vector<1x4x1x4x64xbf16>
    %3 = vector.shape_cast %2 : vector<1x4x1x4x64xbf16> to vector<4x4x64xbf16>
    %4 = arith.extf %3 : vector<4x4x64xbf16> to vector<4x4x64xf32>
    %5 = vector.broadcast %0 : vector<1x1x64xf32> to vector<4x4x64xf32>
    %6 = arith.mulf %4, %5 : vector<4x4x64xf32>
    %7 = vector.broadcast %1 : vector<1x1x64xf32> to vector<4x4x64xf32>
    %8 = arith.addf %6, %7 : vector<4x4x64xf32>
    %cst = arith.constant 0.000000e+00 : f32
    %9 = vector.broadcast %cst : f32 to vector<4x4x64xf32>
    %10 = arith.maximumf %8, %9 : vector<4x4x64xf32>
    %c0_10 = arith.constant 0 : index
    %c0_11 = arith.constant 0 : index
    %c1 = arith.constant 1 : index
    %c0_12 = arith.constant 0 : index
    %c0_13 = arith.constant 0 : index
    %11 = vector.load %arg1[%c0_10, %c0_11, %c1, %c0_12, %c0_13] : memref<1x4x2x4x64xbf16, #tpu.memory_space<vmem>>, vector<1x4x1x4x64xbf16>
    %12 = vector.shape_cast %11 : vector<1x4x1x4x64xbf16> to vector<4x4x64xbf16>
    %13 = arith.extf %12 : vector<4x4x64xbf16> to vector<4x4x64xf32>
    %14 = vector.broadcast %0 : vector<1x1x64xf32> to vector<4x4x64xf32>
    %15 = arith.mulf %13, %14 : vector<4x4x64xf32>
    %16 = vector.broadcast %1 : vector<1x1x64xf32> to vector<4x4x64xf32>
    %17 = arith.addf %15, %16 : vector<4x4x64xf32>
    %cst_14 = arith.constant 0.000000e+00 : f32
    %18 = vector.broadcast %cst_14 : f32 to vector<4x4x64xf32>
    %19 = arith.maximumf %17, %18 : vector<4x4x64xf32>
    %20 = arith.addf %10, %19 : vector<4x4x64xf32>
    %21 = vector.extract_strided_slice %20 {offsets = [0, 0, 0], sizes = [4, 4, 32], strides = [1, 1, 1]} : vector<4x4x64xf32> to vector<4x4x32xf32>
    %22 = vector.extract_strided_slice %20 {offsets = [0, 0, 32], sizes = [4, 4, 32], strides = [1, 1, 1]} : vector<4x4x64xf32> to vector<4x4x32xf32>
    %23 = arith.addf %21, %22 : vector<4x4x32xf32>
    %cst_15 = arith.constant 2.500000e-01 : f32
    %24 = vector.broadcast %cst_15 : f32 to vector<4x4x32xf32>
    %25 = arith.mulf %23, %24 : vector<4x4x32xf32>
    %26 = arith.truncf %25 : vector<4x4x32xf32> to vector<4x4x32xbf16>
    %c0_16 = arith.constant 0 : index
    %c0_17 = arith.constant 0 : index
    %c0_18 = arith.constant 0 : index
    %c0_19 = arith.constant 0 : index
    %27 = vector.load %arg4[%c0_16, %c0_17, %c0_18, %c0_19] : memref<1x4x4x32xbf16, #tpu.memory_space<vmem>>, vector<1x4x4x32xbf16>
    %28 = vector.shape_cast %27 : vector<1x4x4x32xbf16> to vector<4x4x32xbf16>
    %29 = vector.shape_cast %26 : vector<4x4x32xbf16> to vector<1x4x4x32xbf16>
    tpu.vector_store %arg4[%c0_16, %c0_17, %c0_18, %c0_19], %29 {strides = array<i32>} : memref<1x4x4x32xbf16, #tpu.memory_space<vmem>>, vector<1x4x4x32xbf16>,
    return
  }
  func.func @transform_0(%arg0: i32) -> (i32, i32, i32, i32, i32) {
    %c0_i32 = arith.constant 0 : i32
    %c0_i32_0 = arith.constant 0 : i32
    %c0_i32_1 = arith.constant 0 : i32
    %c0_i32_2 = arith.constant 0 : i32
    %c0_i32_3 = arith.constant 0 : i32
    return %arg0, %c0_i32, %c0_i32_0, %c0_i32_1, %c0_i32_2 : i32, i32, i32, i32, i32
  }
  func.func @transform_1(%arg0: i32) -> (i32, i32, i32) {
    %c0_i32 = arith.constant 0 : i32
    %c0_i32_0 = arith.constant 0 : i32
    %c0_i32_1 = arith.constant 0 : i32
    %c0_i32_2 = arith.constant 0 : i32
    return %c0_i32, %c0_i32_0, %c0_i32_1 : i32, i32, i32
  }
  func.func @transform_2(%arg0: i32) -> (i32, i32, i32) {
    %c0_i32 = arith.constant 0 : i32
    %c0_i32_0 = arith.constant 0 : i32
    %c0_i32_1 = arith.constant 0 : i32
    %c0_i32_2 = arith.constant 0 : i32
    return %c0_i32, %c0_i32_0, %c0_i32_1 : i32, i32, i32
  }
  func.func @transform_3(%arg0: i32) -> (i32, i32, i32, i32) {
    %c0_i32 = arith.constant 0 : i32
    %c0_i32_0 = arith.constant 0 : i32
    %c0_i32_1 = arith.constant 0 : i32
    %c0_i32_2 = arith.constant 0 : i32
    return %arg0, %c0_i32, %c0_i32_0, %c0_i32_1 : i32, i32, i32, i32
  }
}

module attributes {stable_mosaic.version = 11 : i64} {
  func.func @_fused_mm_kernel(%arg0: i32, %arg1: memref<32x32xbf16, #tpu.memory_space<vmem>>, %arg2: memref<32x16xbf16, #tpu.memory_space<vmem>>, %arg3: memref<1x32xbf16, #tpu.memory_space<vmem>>, %arg4: memref<1x32xbf16, #tpu.memory_space<vmem>>, %arg5: memref<1x16xf32, #tpu.memory_space<vmem>>, %arg6: memref<1x16xf32, #tpu.memory_space<vmem>>, %arg7: memref<32x16xbf16, #tpu.memory_space<vmem>>) attributes {dimension_semantics = [#tpu.dimension_semantics<parallel>], iteration_bounds = array<i64: 1>, scalar_prefetch = 0 : i64, scratch_operands = 0 : i64, tpu.core_type = #tpu.core_type<tc>, window_params = [{transform_indices = @transform_0, window_bounds = array<i64: 32, 32>}, {pipeline_mode = #tpu.pipeline_mode<synchronous>, transform_indices = @transform_1, window_bounds = array<i64: 32, 16>}, {pipeline_mode = #tpu.pipeline_mode<synchronous>, transform_indices = @transform_2, window_bounds = array<i64: 1, 32>}, {pipeline_mode = #tpu.pipeline_mode<synchronous>, transform_indices = @transform_3, window_bounds = array<i64: 1, 32>}, {pipeline_mode = #tpu.pipeline_mode<synchronous>, transform_indices = @transform_4, window_bounds = array<i64: 1, 16>}, {pipeline_mode = #tpu.pipeline_mode<synchronous>, transform_indices = @transform_5, window_bounds = array<i64: 1, 16>}, {transform_indices = @transform_6, window_bounds = array<i64: 32, 16>}]} {
    %c0 = arith.constant 0 : index
    %c0_0 = arith.constant 0 : index
    %0 = vector.load %arg1[%c0, %c0_0] : memref<32x32xbf16, #tpu.memory_space<vmem>>, vector<32x32xbf16>
    %c0_1 = arith.constant 0 : index
    %c0_2 = arith.constant 0 : index
    %1 = vector.load %arg2[%c0_1, %c0_2] : memref<32x16xbf16, #tpu.memory_space<vmem>>, vector<32x16xbf16>
    %cst = arith.constant dense<0.000000e+00> : vector<32x16xf32>
    %2 = tpu.matmul %0, %1, %cst {dimension_numbers = #tpu.dot_dimension_numbers<[1], [0], [0], [1], [0, 0, 1, 1], [], []>} : vector<32x32xbf16>, vector<32x16xbf16>, vector<32x16xf32> -> vector<32x16xf32>
    %3 = arith.truncf %2 : vector<32x16xf32> to vector<32x16xbf16>
    %c0_3 = arith.constant 0 : index
    %c0_4 = arith.constant 0 : index
    %4 = vector.load %arg7[%c0_3, %c0_4] : memref<32x16xbf16, #tpu.memory_space<vmem>>, vector<32x16xbf16>
    tpu.vector_store %arg7[%c0_3, %c0_4], %3 {strides = array<i32>} : memref<32x16xbf16, #tpu.memory_space<vmem>>, vector<32x16xbf16>,
    return
  }
  func.func @transform_0(%arg0: i32) -> (i32, i32) {
    %c0_i32 = arith.constant 0 : i32
    %c0_i32_0 = arith.constant 0 : i32
    return %arg0, %c0_i32 : i32, i32
  }
  func.func @transform_1(%arg0: i32) -> (i32, i32) {
    %c0_i32 = arith.constant 0 : i32
    %c0_i32_0 = arith.constant 0 : i32
    %c0_i32_1 = arith.constant 0 : i32
    return %c0_i32, %c0_i32_0 : i32, i32
  }
  func.func @transform_2(%arg0: i32) -> (i32, i32) {
    %c0_i32 = arith.constant 0 : i32
    %c0_i32_0 = arith.constant 0 : i32
    %c0_i32_1 = arith.constant 0 : i32
    return %c0_i32, %c0_i32_0 : i32, i32
  }
  func.func @transform_3(%arg0: i32) -> (i32, i32) {
    %c0_i32 = arith.constant 0 : i32
    %c0_i32_0 = arith.constant 0 : i32
    %c0_i32_1 = arith.constant 0 : i32
    return %c0_i32, %c0_i32_0 : i32, i32
  }
  func.func @transform_4(%arg0: i32) -> (i32, i32) {
    %c0_i32 = arith.constant 0 : i32
    %c0_i32_0 = arith.constant 0 : i32
    %c0_i32_1 = arith.constant 0 : i32
    return %c0_i32, %c0_i32_0 : i32, i32
  }
  func.func @transform_5(%arg0: i32) -> (i32, i32) {
    %c0_i32 = arith.constant 0 : i32
    %c0_i32_0 = arith.constant 0 : i32
    %c0_i32_1 = arith.constant 0 : i32
    return %c0_i32, %c0_i32_0 : i32, i32
  }
  func.func @transform_6(%arg0: i32) -> (i32, i32) {
    %c0_i32 = arith.constant 0 : i32
    %c0_i32_0 = arith.constant 0 : i32
    return %arg0, %c0_i32 : i32, i32
  }
}

module attributes {stable_mosaic.version = 11 : i64} {
  func.func @_fused_mm_kernel(%arg0: i32, %arg1: memref<32x32xbf16, #tpu.memory_space<vmem>>, %arg2: memref<32x16xbf16, #tpu.memory_space<vmem>>, %arg3: memref<1x32xbf16, #tpu.memory_space<vmem>>, %arg4: memref<1x32xbf16, #tpu.memory_space<vmem>>, %arg5: memref<1x16xf32, #tpu.memory_space<vmem>>, %arg6: memref<1x16xf32, #tpu.memory_space<vmem>>, %arg7: memref<32x16xbf16, #tpu.memory_space<vmem>>) attributes {dimension_semantics = [#tpu.dimension_semantics<parallel>], iteration_bounds = array<i64: 1>, scalar_prefetch = 0 : i64, scratch_operands = 0 : i64, tpu.core_type = #tpu.core_type<tc>, window_params = [{transform_indices = @transform_0, window_bounds = array<i64: 32, 32>}, {pipeline_mode = #tpu.pipeline_mode<synchronous>, transform_indices = @transform_1, window_bounds = array<i64: 32, 16>}, {pipeline_mode = #tpu.pipeline_mode<synchronous>, transform_indices = @transform_2, window_bounds = array<i64: 1, 32>}, {pipeline_mode = #tpu.pipeline_mode<synchronous>, transform_indices = @transform_3, window_bounds = array<i64: 1, 32>}, {pipeline_mode = #tpu.pipeline_mode<synchronous>, transform_indices = @transform_4, window_bounds = array<i64: 1, 16>}, {pipeline_mode = #tpu.pipeline_mode<synchronous>, transform_indices = @transform_5, window_bounds = array<i64: 1, 16>}, {transform_indices = @transform_6, window_bounds = array<i64: 32, 16>}]} {
    %c0 = arith.constant 0 : index
    %c0_0 = arith.constant 0 : index
    %0 = vector.load %arg1[%c0, %c0_0] : memref<32x32xbf16, #tpu.memory_space<vmem>>, vector<32x32xbf16>
    %c0_1 = arith.constant 0 : index
    %c0_2 = arith.constant 0 : index
    %1 = vector.load %arg3[%c0_1, %c0_2] : memref<1x32xbf16, #tpu.memory_space<vmem>>, vector<1x32xbf16>
    %2 = vector.broadcast %1 : vector<1x32xbf16> to vector<32x32xbf16>
    %3 = arith.mulf %0, %2 : vector<32x32xbf16>
    %c0_3 = arith.constant 0 : index
    %c0_4 = arith.constant 0 : index
    %4 = vector.load %arg4[%c0_3, %c0_4] : memref<1x32xbf16, #tpu.memory_space<vmem>>, vector<1x32xbf16>
    %5 = vector.broadcast %4 : vector<1x32xbf16> to vector<32x32xbf16>
    %6 = arith.addf %3, %5 : vector<32x32xbf16>
    %cst = arith.constant 0.000000e+00 : bf16
    %7 = vector.broadcast %cst : bf16 to vector<32x32xbf16>
    %8 = arith.maximumf %6, %7 : vector<32x32xbf16>
    %c0_5 = arith.constant 0 : index
    %c0_6 = arith.constant 0 : index
    %9 = vector.load %arg2[%c0_5, %c0_6] : memref<32x16xbf16, #tpu.memory_space<vmem>>, vector<32x16xbf16>
    %cst_7 = arith.constant dense<0.000000e+00> : vector<32x16xf32>
    %10 = tpu.matmul %8, %9, %cst_7 {dimension_numbers = #tpu.dot_dimension_numbers<[1], [0], [0], [1], [0, 0, 1, 1], [], []>} : vector<32x32xbf16>, vector<32x16xbf16>, vector<32x16xf32> -> vector<32x16xf32>
    %c0_8 = arith.constant 0 : index
    %c0_9 = arith.constant 0 : index
    %11 = vector.load %arg5[%c0_8, %c0_9] : memref<1x16xf32, #tpu.memory_space<vmem>>, vector<1x16xf32>
    %12 = vector.broadcast %11 : vector<1x16xf32> to vector<32x16xf32>
    %13 = arith.mulf %10, %12 : vector<32x16xf32>
    %c0_10 = arith.constant 0 : index
    %c0_11 = arith.constant 0 : index
    %14 = vector.load %arg6[%c0_10, %c0_11] : memref<1x16xf32, #tpu.memory_space<vmem>>, vector<1x16xf32>
    %15 = vector.broadcast %14 : vector<1x16xf32> to vector<32x16xf32>
    %16 = arith.addf %13, %15 : vector<32x16xf32>
    %cst_12 = arith.constant 0.000000e+00 : f32
    %17 = vector.broadcast %cst_12 : f32 to vector<32x16xf32>
    %18 = arith.maximumf %16, %17 : vector<32x16xf32>
    %19 = arith.truncf %18 : vector<32x16xf32> to vector<32x16xbf16>
    %c0_13 = arith.constant 0 : index
    %c0_14 = arith.constant 0 : index
    %20 = vector.load %arg7[%c0_13, %c0_14] : memref<32x16xbf16, #tpu.memory_space<vmem>>, vector<32x16xbf16>
    tpu.vector_store %arg7[%c0_13, %c0_14], %19 {strides = array<i32>} : memref<32x16xbf16, #tpu.memory_space<vmem>>, vector<32x16xbf16>,
    return
  }
  func.func @transform_0(%arg0: i32) -> (i32, i32) {
    %c0_i32 = arith.constant 0 : i32
    %c0_i32_0 = arith.constant 0 : i32
    return %arg0, %c0_i32 : i32, i32
  }
  func.func @transform_1(%arg0: i32) -> (i32, i32) {
    %c0_i32 = arith.constant 0 : i32
    %c0_i32_0 = arith.constant 0 : i32
    %c0_i32_1 = arith.constant 0 : i32
    return %c0_i32, %c0_i32_0 : i32, i32
  }
  func.func @transform_2(%arg0: i32) -> (i32, i32) {
    %c0_i32 = arith.constant 0 : i32
    %c0_i32_0 = arith.constant 0 : i32
    %c0_i32_1 = arith.constant 0 : i32
    return %c0_i32, %c0_i32_0 : i32, i32
  }
  func.func @transform_3(%arg0: i32) -> (i32, i32) {
    %c0_i32 = arith.constant 0 : i32
    %c0_i32_0 = arith.constant 0 : i32
    %c0_i32_1 = arith.constant 0 : i32
    return %c0_i32, %c0_i32_0 : i32, i32
  }
  func.func @transform_4(%arg0: i32) -> (i32, i32) {
    %c0_i32 = arith.constant 0 : i32
    %c0_i32_0 = arith.constant 0 : i32
    %c0_i32_1 = arith.constant 0 : i32
    return %c0_i32, %c0_i32_0 : i32, i32
  }
  func.func @transform_5(%arg0: i32) -> (i32, i32) {
    %c0_i32 = arith.constant 0 : i32
    %c0_i32_0 = arith.constant 0 : i32
    %c0_i32_1 = arith.constant 0 : i32
    return %c0_i32, %c0_i32_0 : i32, i32
  }
  func.func @transform_6(%arg0: i32) -> (i32, i32) {
    %c0_i32 = arith.constant 0 : i32
    %c0_i32_0 = arith.constant 0 : i32
    return %arg0, %c0_i32 : i32, i32
  }
}

module attributes {stable_mosaic.version = 11 : i64} {
  func.func @_conv3x3_kernel(%arg0: i32, %arg1: memref<1x6x6x16xbf16, #tpu.memory_space<vmem>>, %arg2: memref<9x16x8xbf16, #tpu.memory_space<vmem>>, %arg3: memref<1x4x4x8xbf16, #tpu.memory_space<vmem>>) attributes {dimension_semantics = [#tpu.dimension_semantics<parallel>], iteration_bounds = array<i64: 2>, scalar_prefetch = 0 : i64, scratch_operands = 0 : i64, tpu.core_type = #tpu.core_type<tc>, window_params = [{transform_indices = @transform_0, window_bounds = array<i64: 1, 6, 6, 16>}, {pipeline_mode = #tpu.pipeline_mode<synchronous>, transform_indices = @transform_1, window_bounds = array<i64: 9, 16, 8>}, {transform_indices = @transform_2, window_bounds = array<i64: 1, 4, 4, 8>}]} {
    %cst = arith.constant 0.000000e+00 : f32
    %0 = vector.broadcast %cst : f32 to vector<16x8xf32>
    %c0 = arith.constant 0 : index
    %c0_0 = arith.constant 0 : index
    %c0_1 = arith.constant 0 : index
    %c0_2 = arith.constant 0 : index
    %1 = vector.load %arg1[%c0, %c0_0, %c0_1, %c0_2] : memref<1x6x6x16xbf16, #tpu.memory_space<vmem>>, vector<1x4x4x16xbf16>
    %2 = vector.shape_cast %1 : vector<1x4x4x16xbf16> to vector<4x4x16xbf16>
    %3 = vector.shape_cast %2 : vector<4x4x16xbf16> to vector<16x16xbf16>
    %c0_3 = arith.constant 0 : index
    %c0_4 = arith.constant 0 : index
    %c0_5 = arith.constant 0 : index
    %4 = vector.load %arg2[%c0_3, %c0_4, %c0_5] : memref<9x16x8xbf16, #tpu.memory_space<vmem>>, vector<1x16x8xbf16>
    %5 = vector.shape_cast %4 : vector<1x16x8xbf16> to vector<16x8xbf16>
    %cst_6 = arith.constant dense<0.000000e+00> : vector<16x8xf32>
    %6 = tpu.matmul %3, %5, %cst_6 {dimension_numbers = #tpu.dot_dimension_numbers<[1], [0], [0], [1], [0, 0, 1, 1], [], []>} : vector<16x16xbf16>, vector<16x8xbf16>, vector<16x8xf32> -> vector<16x8xf32>
    %7 = arith.addf %0, %6 : vector<16x8xf32>
    %c0_7 = arith.constant 0 : index
    %c0_8 = arith.constant 0 : index
    %c1 = arith.constant 1 : index
    %c0_9 = arith.constant 0 : index
    %8 = vector.load %arg1[%c0_7, %c0_8, %c1, %c0_9] : memref<1x6x6x16xbf16, #tpu.memory_space<vmem>>, vector<1x4x4x16xbf16>
    %9 = vector.shape_cast %8 : vector<1x4x4x16xbf16> to vector<4x4x16xbf16>
    %10 = vector.shape_cast %9 : vector<4x4x16xbf16> to vector<16x16xbf16>
    %c1_10 = arith.constant 1 : index
    %c0_11 = arith.constant 0 : index
    %c0_12 = arith.constant 0 : index
    %11 = vector.load %arg2[%c1_10, %c0_11, %c0_12] : memref<9x16x8xbf16, #tpu.memory_space<vmem>>, vector<1x16x8xbf16>
    %12 = vector.shape_cast %11 : vector<1x16x8xbf16> to vector<16x8xbf16>
    %cst_13 = arith.constant dense<0.000000e+00> : vector<16x8xf32>
    %13 = tpu.matmul %10, %12, %cst_13 {dimension_numbers = #tpu.dot_dimension_numbers<[1], [0], [0], [1], [0, 0, 1, 1], [], []>} : vector<16x16xbf16>, vector<16x8xbf16>, vector<16x8xf32> -> vector<16x8xf32>
    %14 = arith.addf %7, %13 : vector<16x8xf32>
    %c0_14 = arith.constant 0 : index
    %c0_15 = arith.constant 0 : index
    %c2 = arith.constant 2 : index
    %c0_16 = arith.constant 0 : index
    %15 = vector.load %arg1[%c0_14, %c0_15, %c2, %c0_16] : memref<1x6x6x16xbf16, #tpu.memory_space<vmem>>, vector<1x4x4x16xbf16>
    %16 = vector.shape_cast %15 : vector<1x4x4x16xbf16> to vector<4x4x16xbf16>
    %17 = vector.shape_cast %16 : vector<4x4x16xbf16> to vector<16x16xbf16>
    %c2_17 = arith.constant 2 : index
    %c0_18 = arith.constant 0 : index
    %c0_19 = arith.constant 0 : index
    %18 = vector.load %arg2[%c2_17, %c0_18, %c0_19] : memref<9x16x8xbf16, #tpu.memory_space<vmem>>, vector<1x16x8xbf16>
    %19 = vector.shape_cast %18 : vector<1x16x8xbf16> to vector<16x8xbf16>
    %cst_20 = arith.constant dense<0.000000e+00> : vector<16x8xf32>
    %20 = tpu.matmul %17, %19, %cst_20 {dimension_numbers = #tpu.dot_dimension_numbers<[1], [0], [0], [1], [0, 0, 1, 1], [], []>} : vector<16x16xbf16>, vector<16x8xbf16>, vector<16x8xf32> -> vector<16x8xf32>
    %21 = arith.addf %14, %20 : vector<16x8xf32>
    %c0_21 = arith.constant 0 : index
    %c1_22 = arith.constant 1 : index
    %c0_23 = arith.constant 0 : index
    %c0_24 = arith.constant 0 : index
    %22 = vector.load %arg1[%c0_21, %c1_22, %c0_23, %c0_24] : memref<1x6x6x16xbf16, #tpu.memory_space<vmem>>, vector<1x4x4x16xbf16>
    %23 = vector.shape_cast %22 : vector<1x4x4x16xbf16> to vector<4x4x16xbf16>
    %24 = vector.shape_cast %23 : vector<4x4x16xbf16> to vector<16x16xbf16>
    %c3 = arith.constant 3 : index
    %c0_25 = arith.constant 0 : index
    %c0_26 = arith.constant 0 : index
    %25 = vector.load %arg2[%c3, %c0_25, %c0_26] : memref<9x16x8xbf16, #tpu.memory_space<vmem>>, vector<1x16x8xbf16>
    %26 = vector.shape_cast %25 : vector<1x16x8xbf16> to vector<16x8xbf16>
    %cst_27 = arith.constant dense<0.000000e+00> : vector<16x8xf32>
    %27 = tpu.matmul %24, %26, %cst_27 {dimension_numbers = #tpu.dot_dimension_numbers<[1], [0], [0], [1], [0, 0, 1, 1], [], []>} : vector<16x16xbf16>, vector<16x8xbf16>, vector<16x8xf32> -> vector<16x8xf32>
    %28 = arith.addf %21, %27 : vector<16x8xf32>
    %c0_28 = arith.constant 0 : index
    %c1_29 = arith.constant 1 : index
    %c1_30 = arith.constant 1 : index
    %c0_31 = arith.constant 0 : index
    %29 = vector.load %arg1[%c0_28, %c1_29, %c1_30, %c0_31] : memref<1x6x6x16xbf16, #tpu.memory_space<vmem>>, vector<1x4x4x16xbf16>
    %30 = vector.shape_cast %29 : vector<1x4x4x16xbf16> to vector<4x4x16xbf16>
    %31 = vector.shape_cast %30 : vector<4x4x16xbf16> to vector<16x16xbf16>
    %c4 = arith.constant 4 : index
    %c0_32 = arith.constant 0 : index
    %c0_33 = arith.constant 0 : index
    %32 = vector.load %arg2[%c4, %c0_32, %c0_33] : memref<9x16x8xbf16, #tpu.memory_space<vmem>>, vector<1x16x8xbf16>
    %33 = vector.shape_cast %32 : vector<1x16x8xbf16> to vector<16x8xbf16>
    %cst_34 = arith.constant dense<0.000000e+00> : vector<16x8xf32>
    %34 = tpu.matmul %31, %33, %cst_34 {dimension_numbers = #tpu.dot_dimension_numbers<[1], [0], [0], [1], [0, 0, 1, 1], [], []>} : vector<16x16xbf16>, vector<16x8xbf16>, vector<16x8xf32> -> vector<16x8xf32>
    %35 = arith.addf %28, %34 : vector<16x8xf32>
    %c0_35 = arith.constant 0 : index
    %c1_36 = arith.constant 1 : index
    %c2_37 = arith.constant 2 : index
    %c0_38 = arith.constant 0 : index
    %36 = vector.load %arg1[%c0_35, %c1_36, %c2_37, %c0_38] : memref<1x6x6x16xbf16, #tpu.memory_space<vmem>>, vector<1x4x4x16xbf16>
    %37 = vector.shape_cast %36 : vector<1x4x4x16xbf16> to vector<4x4x16xbf16>
    %38 = vector.shape_cast %37 : vector<4x4x16xbf16> to vector<16x16xbf16>
    %c5 = arith.constant 5 : index
    %c0_39 = arith.constant 0 : index
    %c0_40 = arith.constant 0 : index
    %39 = vector.load %arg2[%c5, %c0_39, %c0_40] : memref<9x16x8xbf16, #tpu.memory_space<vmem>>, vector<1x16x8xbf16>
    %40 = vector.shape_cast %39 : vector<1x16x8xbf16> to vector<16x8xbf16>
    %cst_41 = arith.constant dense<0.000000e+00> : vector<16x8xf32>
    %41 = tpu.matmul %38, %40, %cst_41 {dimension_numbers = #tpu.dot_dimension_numbers<[1], [0], [0], [1], [0, 0, 1, 1], [], []>} : vector<16x16xbf16>, vector<16x8xbf16>, vector<16x8xf32> -> vector<16x8xf32>
    %42 = arith.addf %35, %41 : vector<16x8xf32>
    %c0_42 = arith.constant 0 : index
    %c2_43 = arith.constant 2 : index
    %c0_44 = arith.constant 0 : index
    %c0_45 = arith.constant 0 : index
    %43 = vector.load %arg1[%c0_42, %c2_43, %c0_44, %c0_45] : memref<1x6x6x16xbf16, #tpu.memory_space<vmem>>, vector<1x4x4x16xbf16>
    %44 = vector.shape_cast %43 : vector<1x4x4x16xbf16> to vector<4x4x16xbf16>
    %45 = vector.shape_cast %44 : vector<4x4x16xbf16> to vector<16x16xbf16>
    %c6 = arith.constant 6 : index
    %c0_46 = arith.constant 0 : index
    %c0_47 = arith.constant 0 : index
    %46 = vector.load %arg2[%c6, %c0_46, %c0_47] : memref<9x16x8xbf16, #tpu.memory_space<vmem>>, vector<1x16x8xbf16>
    %47 = vector.shape_cast %46 : vector<1x16x8xbf16> to vector<16x8xbf16>
    %cst_48 = arith.constant dense<0.000000e+00> : vector<16x8xf32>
    %48 = tpu.matmul %45, %47, %cst_48 {dimension_numbers = #tpu.dot_dimension_numbers<[1], [0], [0], [1], [0, 0, 1, 1], [], []>} : vector<16x16xbf16>, vector<16x8xbf16>, vector<16x8xf32> -> vector<16x8xf32>
    %49 = arith.addf %42, %48 : vector<16x8xf32>
    %c0_49 = arith.constant 0 : index
    %c2_50 = arith.constant 2 : index
    %c1_51 = arith.constant 1 : index
    %c0_52 = arith.constant 0 : index
    %50 = vector.load %arg1[%c0_49, %c2_50, %c1_51, %c0_52] : memref<1x6x6x16xbf16, #tpu.memory_space<vmem>>, vector<1x4x4x16xbf16>
    %51 = vector.shape_cast %50 : vector<1x4x4x16xbf16> to vector<4x4x16xbf16>
    %52 = vector.shape_cast %51 : vector<4x4x16xbf16> to vector<16x16xbf16>
    %c7 = arith.constant 7 : index
    %c0_53 = arith.constant 0 : index
    %c0_54 = arith.constant 0 : index
    %53 = vector.load %arg2[%c7, %c0_53, %c0_54] : memref<9x16x8xbf16, #tpu.memory_space<vmem>>, vector<1x16x8xbf16>
    %54 = vector.shape_cast %53 : vector<1x16x8xbf16> to vector<16x8xbf16>
    %cst_55 = arith.constant dense<0.000000e+00> : vector<16x8xf32>
    %55 = tpu.matmul %52, %54, %cst_55 {dimension_numbers = #tpu.dot_dimension_numbers<[1], [0], [0], [1], [0, 0, 1, 1], [], []>} : vector<16x16xbf16>, vector<16x8xbf16>, vector<16x8xf32> -> vector<16x8xf32>
    %56 = arith.addf %49, %55 : vector<16x8xf32>
    %c0_56 = arith.constant 0 : index
    %c2_57 = arith.constant 2 : index
    %c2_58 = arith.constant 2 : index
    %c0_59 = arith.constant 0 : index
    %57 = vector.load %arg1[%c0_56, %c2_57, %c2_58, %c0_59] : memref<1x6x6x16xbf16, #tpu.memory_space<vmem>>, vector<1x4x4x16xbf16>
    %58 = vector.shape_cast %57 : vector<1x4x4x16xbf16> to vector<4x4x16xbf16>
    %59 = vector.shape_cast %58 : vector<4x4x16xbf16> to vector<16x16xbf16>
    %c8 = arith.constant 8 : index
    %c0_60 = arith.constant 0 : index
    %c0_61 = arith.constant 0 : index
    %60 = vector.load %arg2[%c8, %c0_60, %c0_61] : memref<9x16x8xbf16, #tpu.memory_space<vmem>>, vector<1x16x8xbf16>
    %61 = vector.shape_cast %60 : vector<1x16x8xbf16> to vector<16x8xbf16>
    %cst_62 = arith.constant dense<0.000000e+00> : vector<16x8xf32>
    %62 = tpu.matmul %59, %61, %cst_62 {dimension_numbers = #tpu.dot_dimension_numbers<[1], [0], [0], [1], [0, 0, 1, 1], [], []>} : vector<16x16xbf16>, vector<16x8xbf16>, vector<16x8xf32> -> vector<16x8xf32>
    %63 = arith.addf %56, %62 : vector<16x8xf32>
    %64 = vector.shape_cast %63 : vector<16x8xf32> to vector<4x4x8xf32>
    %65 = arith.truncf %64 : vector<4x4x8xf32> to vector<4x4x8xbf16>
    %c0_63 = arith.constant 0 : index
    %c0_64 = arith.constant 0 : index
    %c0_65 = arith.constant 0 : index
    %c0_66 = arith.constant 0 : index
    %66 = vector.load %arg3[%c0_63, %c0_64, %c0_65, %c0_66] : memref<1x4x4x8xbf16, #tpu.memory_space<vmem>>, vector<1x4x4x8xbf16>
    %67 = vector.shape_cast %66 : vector<1x4x4x8xbf16> to vector<4x4x8xbf16>
    %68 = vector.shape_cast %65 : vector<4x4x8xbf16> to vector<1x4x4x8xbf16>
    tpu.vector_store %arg3[%c0_63, %c0_64, %c0_65, %c0_66], %68 {strides = array<i32>} : memref<1x4x4x8xbf16, #tpu.memory_space<vmem>>, vector<1x4x4x8xbf16>,
    return
  }
  func.func @transform_0(%arg0: i32) -> (i32, i32, i32, i32) {
    %c0_i32 = arith.constant 0 : i32
    %c0_i32_0 = arith.constant 0 : i32
    %c0_i32_1 = arith.constant 0 : i32
    %c0_i32_2 = arith.constant 0 : i32
    return %arg0, %c0_i32, %c0_i32_0, %c0_i32_1 : i32, i32, i32, i32
  }
  func.func @transform_1(%arg0: i32) -> (i32, i32, i32) {
    %c0_i32 = arith.constant 0 : i32
    %c0_i32_0 = arith.constant 0 : i32
    %c0_i32_1 = arith.constant 0 : i32
    %c0_i32_2 = arith.constant 0 : i32
    return %c0_i32, %c0_i32_0, %c0_i32_1 : i32, i32, i32
  }
  func.func @transform_2(%arg0: i32) -> (i32, i32, i32, i32) {
    %c0_i32 = arith.constant 0 : i32
    %c0_i32_0 = arith.constant 0 : i32
    %c0_i32_1 = arith.constant 0 : i32
    %c0_i32_2 = arith.constant 0 : i32
    return %arg0, %c0_i32, %c0_i32_0, %c0_i32_1 : i32, i32, i32, i32
  }
}

module attributes {stable_mosaic.version = 11 : i64} {
  func.func @_bn_relu_gap_kernel(%arg0: i32, %arg1: memref<1x4x4x32xbf16, #tpu.memory_space<vmem>>, %arg2: memref<1x1x32xf32, #tpu.memory_space<vmem>>, %arg3: memref<1x1x32xf32, #tpu.memory_space<vmem>>, %arg4: memref<1x1x32xf32, #tpu.memory_space<vmem>>) attributes {dimension_semantics = [#tpu.dimension_semantics<parallel>], iteration_bounds = array<i64: 2>, scalar_prefetch = 0 : i64, scratch_operands = 0 : i64, tpu.core_type = #tpu.core_type<tc>, window_params = [{transform_indices = @transform_0, window_bounds = array<i64: 1, 4, 4, 32>}, {pipeline_mode = #tpu.pipeline_mode<synchronous>, transform_indices = @transform_1, window_bounds = array<i64: 1, 1, 32>}, {pipeline_mode = #tpu.pipeline_mode<synchronous>, transform_indices = @transform_2, window_bounds = array<i64: 1, 1, 32>}, {transform_indices = @transform_3, window_bounds = array<i64: 1, 1, 32>}]} {
    %c0 = arith.constant 0 : index
    %c0_0 = arith.constant 0 : index
    %c0_1 = arith.constant 0 : index
    %c0_2 = arith.constant 0 : index
    %0 = vector.load %arg1[%c0, %c0_0, %c0_1, %c0_2] : memref<1x4x4x32xbf16, #tpu.memory_space<vmem>>, vector<1x4x4x32xbf16>
    %1 = vector.shape_cast %0 : vector<1x4x4x32xbf16> to vector<4x4x32xbf16>
    %2 = arith.extf %1 : vector<4x4x32xbf16> to vector<4x4x32xf32>
    %c0_3 = arith.constant 0 : index
    %c0_4 = arith.constant 0 : index
    %c0_5 = arith.constant 0 : index
    %3 = vector.load %arg2[%c0_3, %c0_4, %c0_5] : memref<1x1x32xf32, #tpu.memory_space<vmem>>, vector<1x1x32xf32>
    %4 = vector.broadcast %3 : vector<1x1x32xf32> to vector<4x4x32xf32>
    %5 = arith.mulf %2, %4 : vector<4x4x32xf32>
    %c0_6 = arith.constant 0 : index
    %c0_7 = arith.constant 0 : index
    %c0_8 = arith.constant 0 : index
    %6 = vector.load %arg3[%c0_6, %c0_7, %c0_8] : memref<1x1x32xf32, #tpu.memory_space<vmem>>, vector<1x1x32xf32>
    %7 = vector.broadcast %6 : vector<1x1x32xf32> to vector<4x4x32xf32>
    %8 = arith.addf %5, %7 : vector<4x4x32xf32>
    %cst = arith.constant 0.000000e+00 : f32
    %9 = vector.broadcast %cst : f32 to vector<4x4x32xf32>
    %10 = arith.maximumf %8, %9 : vector<4x4x32xf32>
    %cst_9 = arith.constant dense<0.000000e+00> : vector<4x32xf32>
    %11 = vector.multi_reduction <add>, %10, %cst_9 [0] : vector<4x4x32xf32> to vector<4x32xf32>
    %cst_10 = arith.constant dense<0.000000e+00> : vector<32xf32>
    %12 = vector.multi_reduction <add>, %11, %cst_10 [0] : vector<4x32xf32> to vector<32xf32>
    %13 = vector.shape_cast %12 : vector<32xf32> to vector<1x32xf32>
    %cst_11 = arith.constant 6.250000e-02 : f32
    %14 = vector.broadcast %cst_11 : f32 to vector<1x32xf32>
    %15 = arith.mulf %13, %14 : vector<1x32xf32>
    %c0_12 = arith.constant 0 : index
    %c0_13 = arith.constant 0 : index
    %c0_14 = arith.constant 0 : index
    %16 = vector.load %arg4[%c0_12, %c0_13, %c0_14] : memref<1x1x32xf32, #tpu.memory_space<vmem>>, vector<1x1x32xf32>
    %17 = vector.shape_cast %16 : vector<1x1x32xf32> to vector<1x32xf32>
    %18 = vector.shape_cast %15 : vector<1x32xf32> to vector<1x1x32xf32>
    tpu.vector_store %arg4[%c0_12, %c0_13, %c0_14], %18 {strides = array<i32>} : memref<1x1x32xf32, #tpu.memory_space<vmem>>, vector<1x1x32xf32>,
    return
  }
  func.func @transform_0(%arg0: i32) -> (i32, i32, i32, i32) {
    %c0_i32 = arith.constant 0 : i32
    %c0_i32_0 = arith.constant 0 : i32
    %c0_i32_1 = arith.constant 0 : i32
    %c0_i32_2 = arith.constant 0 : i32
    return %arg0, %c0_i32, %c0_i32_0, %c0_i32_1 : i32, i32, i32, i32
  }
  func.func @transform_1(%arg0: i32) -> (i32, i32, i32) {
    %c0_i32 = arith.constant 0 : i32
    %c0_i32_0 = arith.constant 0 : i32
    %c0_i32_1 = arith.constant 0 : i32
    %c0_i32_2 = arith.constant 0 : i32
    return %c0_i32, %c0_i32_0, %c0_i32_1 : i32, i32, i32
  }
  func.func @transform_2(%arg0: i32) -> (i32, i32, i32) {
    %c0_i32 = arith.constant 0 : i32
    %c0_i32_0 = arith.constant 0 : i32
    %c0_i32_1 = arith.constant 0 : i32
    %c0_i32_2 = arith.constant 0 : i32
    return %c0_i32, %c0_i32_0, %c0_i32_1 : i32, i32, i32
  }
  func.func @transform_3(%arg0: i32) -> (i32, i32, i32) {
    %c0_i32 = arith.constant 0 : i32
    %c0_i32_0 = arith.constant 0 : i32
    %c0_i32_1 = arith.constant 0 : i32
    return %arg0, %c0_i32, %c0_i32_0 : i32, i32, i32
  }
}

module attributes {stable_mosaic.version = 11 : i64} {
  func.func @_fused_mm_kernel(%arg0: i32, %arg1: memref<2x32xf32, #tpu.memory_space<vmem>>, %arg2: memref<32x10xbf16, #tpu.memory_space<vmem>>, %arg3: memref<1x32xf32, #tpu.memory_space<vmem>>, %arg4: memref<1x32xf32, #tpu.memory_space<vmem>>, %arg5: memref<1x10xf32, #tpu.memory_space<vmem>>, %arg6: memref<1x10xf32, #tpu.memory_space<vmem>>, %arg7: memref<2x10xf32, #tpu.memory_space<vmem>>) attributes {dimension_semantics = [#tpu.dimension_semantics<parallel>], iteration_bounds = array<i64: 1>, scalar_prefetch = 0 : i64, scratch_operands = 0 : i64, tpu.core_type = #tpu.core_type<tc>, window_params = [{transform_indices = @transform_0, window_bounds = array<i64: 2, 32>}, {pipeline_mode = #tpu.pipeline_mode<synchronous>, transform_indices = @transform_1, window_bounds = array<i64: 32, 10>}, {pipeline_mode = #tpu.pipeline_mode<synchronous>, transform_indices = @transform_2, window_bounds = array<i64: 1, 32>}, {pipeline_mode = #tpu.pipeline_mode<synchronous>, transform_indices = @transform_3, window_bounds = array<i64: 1, 32>}, {pipeline_mode = #tpu.pipeline_mode<synchronous>, transform_indices = @transform_4, window_bounds = array<i64: 1, 10>}, {pipeline_mode = #tpu.pipeline_mode<synchronous>, transform_indices = @transform_5, window_bounds = array<i64: 1, 10>}, {transform_indices = @transform_6, window_bounds = array<i64: 2, 10>}]} {
    %c0 = arith.constant 0 : index
    %c0_0 = arith.constant 0 : index
    %0 = vector.load %arg1[%c0, %c0_0] : memref<2x32xf32, #tpu.memory_space<vmem>>, vector<2x32xf32>
    %1 = arith.truncf %0 : vector<2x32xf32> to vector<2x32xbf16>
    %c0_1 = arith.constant 0 : index
    %c0_2 = arith.constant 0 : index
    %2 = vector.load %arg2[%c0_1, %c0_2] : memref<32x10xbf16, #tpu.memory_space<vmem>>, vector<32x10xbf16>
    %cst = arith.constant dense<0.000000e+00> : vector<2x10xf32>
    %3 = tpu.matmul %1, %2, %cst {dimension_numbers = #tpu.dot_dimension_numbers<[1], [0], [0], [1], [0, 0, 1, 1], [], []>} : vector<2x32xbf16>, vector<32x10xbf16>, vector<2x10xf32> -> vector<2x10xf32>
    %c0_3 = arith.constant 0 : index
    %c0_4 = arith.constant 0 : index
    %4 = vector.load %arg5[%c0_3, %c0_4] : memref<1x10xf32, #tpu.memory_space<vmem>>, vector<1x10xf32>
    %5 = vector.broadcast %4 : vector<1x10xf32> to vector<2x10xf32>
    %6 = arith.mulf %3, %5 : vector<2x10xf32>
    %c0_5 = arith.constant 0 : index
    %c0_6 = arith.constant 0 : index
    %7 = vector.load %arg6[%c0_5, %c0_6] : memref<1x10xf32, #tpu.memory_space<vmem>>, vector<1x10xf32>
    %8 = vector.broadcast %7 : vector<1x10xf32> to vector<2x10xf32>
    %9 = arith.addf %6, %8 : vector<2x10xf32>
    %c0_7 = arith.constant 0 : index
    %c0_8 = arith.constant 0 : index
    %10 = vector.load %arg7[%c0_7, %c0_8] : memref<2x10xf32, #tpu.memory_space<vmem>>, vector<2x10xf32>
    tpu.vector_store %arg7[%c0_7, %c0_8], %9 {strides = array<i32>} : memref<2x10xf32, #tpu.memory_space<vmem>>, vector<2x10xf32>,
    return
  }
  func.func @transform_0(%arg0: i32) -> (i32, i32) {
    %c0_i32 = arith.constant 0 : i32
    %c0_i32_0 = arith.constant 0 : i32
    return %arg0, %c0_i32 : i32, i32
  }
  func.func @transform_1(%arg0: i32) -> (i32, i32) {
    %c0_i32 = arith.constant 0 : i32
    %c0_i32_0 = arith.constant 0 : i32
    %c0_i32_1 = arith.constant 0 : i32
    return %c0_i32, %c0_i32_0 : i32, i32
  }
  func.func @transform_2(%arg0: i32) -> (i32, i32) {
    %c0_i32 = arith.constant 0 : i32
    %c0_i32_0 = arith.constant 0 : i32
    %c0_i32_1 = arith.constant 0 : i32
    return %c0_i32, %c0_i32_0 : i32, i32
  }
  func.func @transform_3(%arg0: i32) -> (i32, i32) {
    %c0_i32 = arith.constant 0 : i32
    %c0_i32_0 = arith.constant 0 : i32
    %c0_i32_1 = arith.constant 0 : i32
    return %c0_i32, %c0_i32_0 : i32, i32
  }
  func.func @transform_4(%arg0: i32) -> (i32, i32) {
    %c0_i32 = arith.constant 0 : i32
    %c0_i32_0 = arith.constant 0 : i32
    %c0_i32_1 = arith.constant 0 : i32
    return %c0_i32, %c0_i32_0 : i32, i32
  }
  func.func @transform_5(%arg0: i32) -> (i32, i32) {
    %c0_i32 = arith.constant 0 : i32
    %c0_i32_0 = arith.constant 0 : i32
    %c0_i32_1 = arith.constant 0 : i32
    return %c0_i32, %c0_i32_0 : i32, i32
  }
  func.func @transform_6(%arg0: i32) -> (i32, i32) {
    %c0_i32 = arith.constant 0 : i32
    %c0_i32_0 = arith.constant 0 : i32
    return %arg0, %c0_i32 : i32, i32
  }
}

</mosaic_0001>

<bundles_post_ra>
// kernel: densenet_forward.15
= control target key start
LH: loop header
LB: loop body
LE: loop exit
PB: predicated region body
PF: predicated region fallthrough
CT: control target
= control target key end

     0   :  { %s812_s6 = smov 0   ;;  %s1143_s0 = inlined_call_operand.vmem [shape: bf16[2,9,2,9,32], index: 0, kind: input, shape index: {}]   ;;  %s1144_s1 = inlined_call_operand.vmem [shape: bf16[2,8,8,16], index: 1, kind: output, shape index: {}]  }
   0x1 LB: > { %s680_s7 = sadd.s32 4294967295, %s799_s6   ;;  %p684_p0 = scmp.ge.s32.totalorder %s799_s6, 1  ;;  %s799_s6 = sphi %s812_s6, %s11_s6  }
   0x2   : > { %p87_p1 = scmp.lt.s32.totalorder %s799_s6, 3 }
   0x4   : > { %p88_p2 = pnand %p684_p0, %p87_p1 }
   0x6   : > { %91 = sbr.rel (%p88_p2) target bundleno = 173 (0xad), region = 24 }
   0xb   : > { %p107_p3 = scmp.lt.s32.totalorder %s680_s7, 1  ;;  %s801_s12 = smov 112   ;;  %vm213_vm0 = vcmask 1046528   ;;  %vm616_vm1 = vcmask 125952  }
   0xd   : > { %s1167_s7 = smov (!%p107_p3, %s680_s7), 1 }
   0xe   : > { %s723_s8 = smul.u32 144, %s1167_s7  ;;  %s722_s13 = sshll.u32 %s1167_s7, 5 }
   0xf   : > { %s1094_s16 = scalar_lea.vmem %s1144_s1, %s722_s13 }
  0x10   : > { %s826_s11 = scalar_lea.vmem %s1143_s0, %s723_s8 }
  0x11   : > { %v121_v0 = vld [vmem:[%s826_s11 + $0x40] sm:$0xf]  ;;  %v122_v1 = vld [vmem:[%s826_s11 + $0x50] sm:$0xf]  ;;  %v688_v16 = vld [vmem:[%s826_s11 + $0x8] sm:$0xf] }
  0x12   : > { %v117_v2 = vld [vmem:[%s826_s11] sm:$0xf]  ;;  %v831_v3 = vunpack.c.l.bf16 %v121_v0  ;;  %v833_v4 = vunpack.c.l.bf16 %v122_v1  ;;  %v118_v5 = vld [vmem:[%s826_s11 + $0x10] sm:$0xf]  ;;  %v689_v17 = vld [vmem:[%s826_s11 + $0x18] sm:$0xf]  ;;  %v860_v20 = vunpack.c.l.bf16 %v688_v16 }
  0x13   : > { %v836_v6 = vunpack.c.l.bf16 %v117_v2  ;;  %v838_v7 = vunpack.c.l.bf16 %v118_v5  ;;  %v123_v8 = vld [vmem:[%s826_s11 + $0x60] sm:$0xf]  ;;  %v124_v9 = vld [vmem:[%s826_s11 + $0x70] sm:$0xf]  ;;  %v862_v21 = vunpack.c.l.bf16 %v689_v17  ;;  %v690_v22 = vld [vmem:[%s826_s11 + $0x28] sm:$0xf] }
  0x14   : > { %v743_v10 = vpack.i.bf16 %v833_v4, %v831_v3  ;;  %v119_v11 = vld [vmem:[%s826_s11 + $0x20] sm:$0xf]  ;;  %v120_v12 = vld [vmem:[%s826_s11 + $0x30] sm:$0xf]  ;;  %v849_v14 = vunpack.c.l.bf16 %v123_v8  ;;  %v851_v15 = vunpack.c.l.bf16 %v124_v9  ;;  %v691_v23 = vld [vmem:[%s826_s11 + $0x38] sm:$0xf]  ;;  %v875_v29 = vunpack.c.l.bf16 %v690_v22 }
  0x15   : > { %v733_v13 = vpack.i.bf16 %v838_v7, %v836_v6  ;;  %v856_v18 = vunpack.c.l.bf16 %v119_v11  ;;  %v858_v19 = vunpack.c.l.bf16 %v120_v12  ;;  %v753_v24 = vpack.i.bf16 %v862_v21, %v860_v20  ;;  %v694_v27 = vld [vmem:[%s826_s11 + $0x68] sm:$0xf]  ;;  %v695_v28 = vld [vmem:[%s826_s11 + $0x78] sm:$0xf]  ;;  %v704_v38 = vld [vmem:[%s826_s11 + $0x10] sm:$0xf] }
  0x16   : > { %744 = vrot.lane.b32.xlu1 %v743_v10, %s801_s12  ;;  %v748_v25 = vpack.i.bf16 %v851_v15, %v849_v14  ;;  %v877_v30 = vunpack.c.l.bf16 %v691_v23  ;;  %v692_v31 = vld [vmem:[%s826_s11 + $0x48] sm:$0xf]  ;;  %v693_v32 = vld [vmem:[%s826_s11 + $0x58] sm:$0xf]  ;;  %v882_v33 = vunpack.c.l.bf16 %v694_v27  ;;  %v884_v34 = vunpack.c.l.bf16 %v695_v28  ;;  %v705_v39 = vld [vmem:[%s826_s11 + $0x20] sm:$0xf] }
  0x17   : > { %734 = vrot.lane.b32.xlu0 %v733_v13, %s801_s12  ;;  %v738_v26 = vpack.i.bf16 %v858_v19, %v856_v18  ;;  %754 = vrot.lane.b32.xlu2 %v753_v24, %s801_s12  ;;  %v887_v35 = vunpack.c.l.bf16 %v692_v31  ;;  %v889_v36 = vunpack.c.l.bf16 %v693_v32  ;;  %v708_v42 = vld [vmem:[%s826_s11 + $0x50] sm:$0xf]  ;;  %v709_v43 = vld [vmem:[%s826_s11 + $0x60] sm:$0xf]  ;;  %v902_v44 = vunpack.c.l.bf16 %v704_v38 }
  0x18   : > { %1150 = vst [vmem:[#allocation2_spill] sm:$0xff] %v882_v33  ;;  %v758_v37 = vpack.i.bf16 %v877_v30, %v875_v29  ;;  %v768_v40 = vpack.i.bf16 %v884_v34, %v882_v33  ;;  %v904_v45 = vunpack.c.l.bf16 %v705_v39  ;;  %v706_v46 = vld [vmem:[%s826_s11 + $0x30] sm:$0xf]  ;;  %v707_v47 = vld [vmem:[%s826_s11 + $0x40] sm:$0xf]  ;;  %v909_v48 = vunpack.c.l.bf16 %v708_v42 }
  0x19   : > { %1151 = vst [vmem:[#allocation3_spill] sm:$0xff] %v884_v34  ;;  %v763_v41 = vpack.i.bf16 %v889_v36, %v887_v35  ;;  %v911_v49 = vunpack.c.l.bf16 %v709_v43  ;;  %v914_v50 = vunpack.c.l.bf16 %v706_v46  ;;  %v916_v51 = vunpack.c.l.bf16 %v707_v47  ;;  %v710_v53 = vld [vmem:[%s826_s11 + $0x70] sm:$0xf]  ;;  %v711_v54 = vld [vmem:[%s826_s11 + $0x80] sm:$0xf] }
  0x1a   : > { %v773_v52 = vpack.i.bf16 %v904_v45, %v902_v44  ;;  %v927_v57 = vunpack.c.l.bf16 %v710_v53  ;;  %v929_v58 = vunpack.c.l.bf16 %v711_v54  ;;  %v185_v60 = vld [vmem:[%s826_s11 + $0x44] sm:$0x1]  ;;  %v186_v61 = vld [vmem:[%s826_s11 + $0x54] sm:$0x1]  ;;  %v229_v63 = vrot.slane %v833_v4, 1 }
  0x1b   : > { %v783_v55 = vpack.i.bf16 %v911_v49, %v909_v48  ;;  %v778_v56 = vpack.i.bf16 %v916_v51, %v914_v50  ;;  %v181_v62 = vld [vmem:[%s826_s11 + $0x4] sm:$0x1]  ;;  %v226_v0 = vrot.slane %v831_v3, 1  ;;  %v182_v1 = vld [vmem:[%s826_s11 + $0x14] sm:$0x1]  ;;  %v201_v5 = vunpack.c.l.bf16 %v185_v60 }
  0x1c   : > { %1152 = vst [vmem:[#allocation4_spill] sm:$0xff] %v929_v58  ;;  %v788_v59 = vpack.i.bf16 %v929_v58, %v927_v57  ;;  %v696_v2 = vld [vmem:[%s826_s11 + $0xc] sm:$0x1]  ;;  %v202_v8 = vunpack.c.l.bf16 %v186_v61  ;;  %v187_v9 = vld [vmem:[%s826_s11 + $0x64] sm:$0x1]  ;;  %v217_v12 = vrot.slane %v838_v7, 1  ;;  %v197_v17 = vunpack.c.l.bf16 %v181_v62 }
  0x1d   : > { %v188_v10 = vld [vmem:[%s826_s11 + $0x74] sm:$0x1]  ;;  %v697_v11 = vld [vmem:[%s826_s11 + $0x1c] sm:$0x1]  ;;  %v214_v13 = vrot.slane %v836_v6, 1  ;;  %v394_v16 = vrot.slane %v862_v21, 1  ;;  %v198_v22 = vunpack.c.l.bf16 %v182_v1  ;;  %v375_v28 = vunpack.c.l.bf16 %v696_v2 }
  0x1e   : > { %749 = vrot.lane.b32.xlu1 %v748_v25, %s801_s12  ;;  %v183_v23 = vld [vmem:[%s826_s11 + $0x24] sm:$0x1]  ;;  %v184_v24 = vld [vmem:[%s826_s11 + $0x34] sm:$0x1]  ;;  %v204_v27 = vunpack.c.l.bf16 %v188_v10  ;;  %v376_v31 = vunpack.c.l.bf16 %v697_v11  ;;  %v227_v39 = vrot.slane %v201_v5, 1  ;;  %v235_v53 = vrot.slane %v851_v15, 1 }
  0x1f   : > { %739 = vrot.lane.b32.xlu0 %v738_v26, %s801_s12  ;;  %759 = vrot.lane.b32.xlu2 %v758_v37, %s801_s12  ;;  %v712_v25 = vld [vmem:[%s826_s11 + $0x14] sm:$0x1]  ;;  %v203_v26 = vunpack.c.l.bf16 %v187_v9  ;;  %v713_v32 = vld [vmem:[%s826_s11 + $0x24] sm:$0x1]  ;;  %v391_v37 = vrot.slane %v860_v20, 1  ;;  %v199_v42 = vunpack.c.l.bf16 %v183_v23  ;;  %v200_v43 = vunpack.c.l.bf16 %v184_v24 }
  0x20   : > { %v552_v46 = vunpack.c.l.bf16 %v712_v25  ;;  %v218_v47 = vrot.slane %v198_v22, 1  ;;  %v553_v54 = vunpack.c.l.bf16 %v713_v32  ;;  %v395_v60 = vrot.slane %v376_v31, 1  ;;  %v702_v5 = vld [vmem:[%s826_s11 + $0x6c] sm:$0x1] }
  0x21   : > { %v962_v62 = vsel %vm213_vm0, %v226_v0, %v227_v39  ;;  %v220_v1 = vrot.slane %v856_v18, 1  ;;  %v223_v2 = vrot.slane %v858_v19, 1  ;;  %v221_v9 = vrot.slane %v199_v42, 1  ;;  %v698_v22 = vld [vmem:[%s826_s11 + $0x2c] sm:$0x1] }
  0x22   : > { %v224_v10 = vrot.slane %v200_v43, 1  ;;  %v568_v11 = vrot.slane %v902_v44, 1  ;;  %v571_v0 = vrot.slane %v904_v45, 1  ;;  %v572_v24 = vrot.slane %v553_v54, 1  ;;  %v700_v25 = vld [vmem:[%s826_s11 + $0x4c] sm:$0x1] }
  0x23   : > { %v381_v31 = vunpack.c.l.bf16 %v702_v5  ;;  %v379_v43 = vunpack.c.l.bf16 %v700_v25  ;;  %v717_v39 = vld [vmem:[%s826_s11 + $0x64] sm:$0x1] }
  0x26   : > { %769 = vrot.lane.b32.xlu1 %v768_v40, %s801_s12  ;;  %v230_v40 = vrot.slane %v202_v8, 1  ;;  %v703_v8 = vld [vmem:[%s826_s11 + $0x7c] sm:$0x1] }
  0x27   : > { %764 = vrot.lane.b32.xlu0 %v763_v41, %s801_s12  ;;  %774 = vrot.lane.b32.xlu2 %v773_v52, %s801_s12  ;;  %v215_v41 = vrot.slane %v197_v17, 1  ;;  %v232_v52 = vrot.slane %v849_v14, 1  ;;  %v569_v17 = vrot.slane %v552_v46, 1  ;;  %v382_v32 = vunpack.c.l.bf16 %v703_v8  ;;  %v719_v46 = vld [vmem:[%s826_s11 + $0x84] sm:$0x1] }
  0x28   : > { %v959_v61 = vsel %vm213_vm0, %v229_v63, %v230_v40  ;;  %v971_v63 = vsel %vm213_vm0, %v217_v12, %v218_v47  ;;  %v701_v12 = vld [vmem:[%s826_s11 + $0x5c] sm:$0x1] }
  0x29   : > { %v974_v23 = vsel %vm213_vm0, %v214_v13, %v215_v41  ;;  %v377_v41 = vunpack.c.l.bf16 %v698_v22  ;;  %v413_v5 = vrot.slane %v382_v32, 1  ;;  %v397_v22 = vrot.slane %v875_v29, 1 }
  0x2e   : > { %784 = vrot.lane.b32.xlu1 %v783_v55, %s801_s12  ;;  %v233_v55 = vrot.slane %v203_v26, 1  ;;  %v699_v26 = vld [vmem:[%s826_s11 + $0x3c] sm:$0x1] }
  0x2f   : > { %779 = vrot.lane.b32.xlu0 %v778_v56, %s801_s12  ;;  %789 = vrot.lane.b32.xlu2 %v788_v59, %s801_s12  ;;  %v236_v56 = vrot.slane %v204_v27, 1  ;;  %v392_v59 = vrot.slane %v375_v28, 1  ;;  %v980_v27 = vsel %vm213_vm0, %v394_v16, %v395_v60  ;;  %v995_v16 = vsel %vm213_vm0, %v220_v1, %v221_v9 }
  0x30   : > { %v988_v13 = vsel %vm213_vm0, %v232_v52, %v233_v55  ;;  %v378_v47 = vunpack.c.l.bf16 %v699_v26  ;;  %v1005_v52 = vsel %vm213_vm0, %v568_v11, %v569_v17  ;;  %v380_v55 = vunpack.c.l.bf16 %v701_v12  ;;  %v716_v12 = vld [vmem:[%s826_s11 + $0x54] sm:$0x1] }
  0x31   : > { %v983_v28 = vsel %vm213_vm0, %v391_v37, %v392_v59  ;;  %v991_v40 = vsel %vm213_vm0, %v235_v53, %v236_v56  ;;  %v718_v37 = vld [vmem:[%s826_s11 + $0x74] sm:$0x1]  ;;  %v1002_v59 = vsel %vm213_vm0, %v223_v2, %v224_v10  ;;  %1154 = vst [vmem:[#allocation6_spill] sm:$0xff] %v1005_v52  ;;  %v1008_v53 = vsel %vm213_vm0, %v571_v0, %v572_v24  ;;  %v715_v52 = vld [vmem:[%s826_s11 + $0x44] sm:$0x1] }
  0x32   : > { %1155 = vst [vmem:[#allocation7_spill] sm:$0xff] %v1008_v53  ;;  %v409_v56 = vrot.slane %v882_v33, 1  ;;  %v410_v60 = vrot.slane %v381_v31, 1  ;;  %v412_v1 = vrot.slane %v884_v34, 1  ;;  %v558_v8 = vunpack.c.l.bf16 %v718_v37 }
  0x33   : > { %v559_v9 = vunpack.c.l.bf16 %v719_v46  ;;  %v398_v2 = vrot.slane %v377_v41, 1  ;;  %v403_v10 = vrot.slane %v887_v35, 1  ;;  %v404_v11 = vrot.slane %v379_v43, 1 }
  0x34   : > { %v400_v17 = vrot.slane %v877_v30, 1  ;;  %v401_v0 = vrot.slane %v378_v47, 1  ;;  %v406_v31 = vrot.slane %v889_v36, 1  ;;  %v407_v32 = vrot.slane %v380_v55, 1 }
  0x35   : > { %v1020_v41 = vsel %vm213_vm0, %v409_v56, %v410_v60  ;;  %v1023_v43 = vsel %vm213_vm0, %v412_v1, %v413_v5  ;;  %v586_v46 = vrot.slane %v927_v57, 1  ;;  %v589_v47 = vrot.slane %v929_v58, 1 }
  0x36   : > { %v587_v53 = vrot.slane %v558_v8, 1  ;;  %v590_v26 = vrot.slane %v559_v9, 1  ;;  %v1031_v33 = vsel %vm213_vm0, %v403_v10, %v404_v11  ;;  %v556_v56 = vunpack.c.l.bf16 %v716_v12 }
  0x37   : > { %v1036_v5 = vsel %vm213_vm0, %v406_v31, %v407_v32  ;;  %v557_v58 = vunpack.c.l.bf16 %v717_v39  ;;  %v1042_v8 = vsel %vm213_vm0, %v400_v17, %v401_v0 }
  0x71   : > { %v954_v38 = vpop.permute.xlu2 %754 }
  0x79   : > { %v999_v54 = vpop.permute.xlu2 %759 }
  0x7a   : > { %1153 = vst [vmem:[#allocation5_spill] sm:$0xff] %v999_v54  ;;  %v714_v54 = vld [vmem:[%s826_s11 + $0x34] sm:$0x1] }
  0x7b   : > { %v554_v9 = vunpack.c.l.bf16 %v714_v54 }
  0x81   : > { %v775_v12 = vpop.permute.xlu2 %774 }
  0x88   : > { %v745_v24 = vpop.permute.xlu1 %744 }
  0x89   : > { %v735_v37 = vpop.permute.xlu0 %734  ;;  %v747_v55 = vunpack.i.h.bf16 %v745_v24  ;;  %v746_v34 = vunpack.i.l.bf16 %v745_v24  ;;  %v555_v24 = vunpack.c.l.bf16 %v715_v52  ;;  %v583_v52 = vrot.slane %v911_v49, 1 }
  0x8a   : > { %v737_v25 = vunpack.i.h.bf16 %v735_v37  ;;  %v736_v42 = vunpack.i.l.bf16 %v735_v37  ;;  %v1039_v37 = vsel %vm213_vm0, %v397_v22, %v398_v2  ;;  %v580_v22 = vrot.slane %v909_v48, 1 }
  0x8b   : > { %v170_v39 = vmax.f32 %v833_v4, %v747_v55  ;;  %v1055_v2 = vrot.slane %v556_v56, 1  ;;  %v776_v4 = vunpack.i.l.bf16 %v775_v12 }
  0x8c   : > { %v166_v60 = vmax.f32 %v838_v7, %v737_v25  ;;  %v165_v1 = vmax.f32 %v836_v6, %v736_v42  ;;  %v1047_v7 = vsel %vm213_vm0, %v586_v46, %v587_v53  ;;  %v1050_v6 = vsel %vm213_vm0, %v589_v47, %v590_v26 }
  0x8d   : > { %v169_v42 = vmax.f32 %v831_v3, %v746_v34  ;;  %v1060_v53 = vrot.slane %v557_v58, 1  ;;  %v777_v26 = vunpack.i.h.bf16 %v775_v12  ;;  %v1156_v34 = vunpack.i.l.bf16 %v954_v38 }
  0x8e   : > { %v247_v10 = vmax.f32 %v166_v60, %v971_v63  ;;  %v246_v11 = vmax.f32 %v165_v1, %v974_v23  ;;  %v1157_v46 = vunpack.i.h.bf16 %v954_v38 }
  0x8f   : > { %v250_v47 = vmax.f32 %v169_v42, %v962_v62  ;;  %v574_v62 = vrot.slane %v914_v50, 1 }
  0x90   : > { %v288_v54 = vmax.f32 %v247_v10, %v862_v21  ;;  %v287_v63 = vmax.f32 %v246_v11, %v860_v20  ;;  %v750_v23 = vpop.permute.xlu1 %749  ;;  %v251_v20 = vmax.f32 %v170_v39, %v959_v61  ;;  %v575_v11 = vrot.slane %v554_v9, 1 }
  0x91   : > { %v752_v17 = vunpack.i.h.bf16 %v750_v23  ;;  %v751_v0 = vunpack.i.l.bf16 %v750_v23  ;;  %v740_v25 = vpop.permute.xlu0 %739 }
  0x92   : > { %v742_v31 = vunpack.i.h.bf16 %v740_v25  ;;  %v741_v3 = vunpack.i.l.bf16 %v740_v25  ;;  %v343_v32 = vmax.f32 %v287_v63, %v1156_v34  ;;  %v344_v21 = vmax.f32 %v288_v54, %v1157_v46 }
  0x93   : > { %v172_v58 = vmax.f32 %v851_v15, %v752_v17  ;;  %v171_v55 = vmax.f32 %v849_v14, %v751_v0  ;;  %v292_v12 = vmax.f32 %v251_v20, %v889_v36  ;;  %v1160_v17 = vld [vmem:[#allocation6_spill] sm:$0xff]  ;;  %v1161_v0 = vld [vmem:[#allocation7_spill] sm:$0xff] }
  0x94   : > { %v168_v56 = vmax.f32 %v858_v19, %v742_v31  ;;  %v167_v60 = vmax.f32 %v856_v18, %v741_v3  ;;  %v423_v1 = vmax.f32 %v343_v32, %v983_v28  ;;  %v424_v10 = vmax.f32 %v344_v21, %v980_v27 }
  0x95   : > { %v253_v38 = vmax.f32 %v172_v58, %v991_v40  ;;  %v252_v61 = vmax.f32 %v171_v55, %v988_v13  ;;  %v291_v28 = vmax.f32 %v250_v47, %v887_v35  ;;  %v577_v27 = vrot.slane %v916_v51, 1 }
  0x96   : > { %v249_v15 = vmax.f32 %v168_v56, %v1002_v59  ;;  %v248_v14 = vmax.f32 %v167_v60, %v995_v16  ;;  %v464_v19 = vmax.f32 %v423_v1, %v902_v44  ;;  %v465_v18 = vmax.f32 %v424_v10, %v904_v45  ;;  %v1158_v44 = vld [vmem:[#allocation2_spill] sm:$0xff]  ;;  %v1159_v45 = vld [vmem:[#allocation3_spill] sm:$0xff] }
  0x97   : > { %v578_v40 = vrot.slane %v555_v24, 1  ;;  %v293_v63 = vmax.f32 %v252_v61, %v1158_v44  ;;  %v294_v23 = vmax.f32 %v253_v38, %v1159_v45 }
  0x98   : > { %v290_v13 = vmax.f32 %v249_v15, %v877_v30  ;;  %v289_v39 = vmax.f32 %v248_v14, %v875_v29  ;;  %v520_v9 = vmax.f32 %v464_v19, %v776_v4  ;;  %v521_v59 = vmax.f32 %v465_v18, %v777_v26  ;;  %v770_v42 = vpop.permute.xlu1 %769  ;;  %v790_v30 = vpop.permute.xlu2 %789  ;;  %v1162_v4 = vld [vmem:[#allocation5_spill] sm:$0xff]  ;;  %v1165_v19 = vld [vmem:[#allocation4_spill] sm:$0xff] }
  0x99   : > { %v772_v16 = vunpack.i.h.bf16 %v770_v42  ;;  %v771_v54 = vunpack.i.l.bf16 %v770_v42  ;;  %v765_v35 = vpop.permute.xlu0 %764  ;;  %v1163_v3 = vunpack.i.l.bf16 %v1162_v4  ;;  %v1164_v32 = vunpack.i.h.bf16 %v1162_v4 }
  0x9a   : > { %v600_v36 = vmax.f32 %v520_v9, %v1160_v17  ;;  %v601_v25 = vmax.f32 %v521_v59, %v1161_v0  ;;  %v767_v24 = vunpack.i.h.bf16 %v765_v35  ;;  %v766_v31 = vunpack.i.l.bf16 %v765_v35 }
  0x9b   : > { %v349_v29 = vmax.f32 %v293_v63, %v771_v54  ;;  %v350_v26 = vmax.f32 %v294_v23, %v772_v16  ;;  %v345_v34 = vmax.f32 %v289_v39, %v1163_v3  ;;  %v346_v46 = vmax.f32 %v290_v13, %v1164_v32 }
  0x9c   : > { %v608_v21 = vpack.c.bf16 %v600_v36, %v600_v36  ;;  %v609_v20 = vpack.c.bf16 %v601_v25, %v601_v25  ;;  %v348_v47 = vmax.f32 %v292_v12, %v767_v24  ;;  %v347_v58 = vmax.f32 %v291_v28, %v766_v31 }
  0x9d   : > { %v429_v55 = vmax.f32 %v349_v29, %v1020_v41  ;;  %v430_v56 = vmax.f32 %v350_v26, %v1023_v43  ;;  %v792_v60 = vunpack.i.h.bf16 %v790_v30  ;;  %v791_v1 = vunpack.i.l.bf16 %v790_v30 }
  0x9e   : > { %617 = vst.msk [vmem:[%s1094_s16] sm:$0xf] %vm616_vm1, %v608_v21  ;;  %v428_v10 = vmax.f32 %v348_v47, %v1036_v5  ;;  %v427_v38 = vmax.f32 %v347_v58, %v1031_v33  ;;  %v425_v61 = vmax.f32 %v345_v34, %v1039_v37  ;;  %v426_v15 = vmax.f32 %v346_v46, %v1042_v8 }
  0x9f   : > { %618 = vst.msk [vmem:[%s1094_s16 + $0x4] sm:$0xf] %vm616_vm1, %v609_v20  ;;  %v470_v14 = vmax.f32 %v429_v55, %v927_v57  ;;  %v471_v41 = vmax.f32 %v430_v56, %v1165_v19  ;;  %v582_v43 = vsel %vm213_vm0, %v580_v22, %v1055_v2  ;;  %v585_v33 = vsel %vm213_vm0, %v583_v52, %v1060_v53 }
  0xa0   : > { %v785_v5 = vpop.permute.xlu1 %784  ;;  %v468_v37 = vmax.f32 %v427_v38, %v909_v48  ;;  %v469_v8 = vmax.f32 %v428_v10, %v911_v49  ;;  %v576_v18 = vsel %vm213_vm0, %v574_v62, %v575_v11  ;;  %v579_v57 = vsel %vm213_vm0, %v577_v27, %v578_v40 }
  0xa1   : > { %v526_v28 = vmax.f32 %v470_v14, %v791_v1  ;;  %v527_v12 = vmax.f32 %v471_v41, %v792_v60  ;;  %v787_v13 = vunpack.i.h.bf16 %v785_v5  ;;  %v786_v39 = vunpack.i.l.bf16 %v785_v5  ;;  %v780_v9 = vpop.permute.xlu0 %779 }
  0xa2   : > { %v782_v22 = vunpack.i.h.bf16 %v780_v9  ;;  %v781_v2 = vunpack.i.l.bf16 %v780_v9  ;;  %v466_v59 = vmax.f32 %v425_v61, %v914_v50  ;;  %v467_v52 = vmax.f32 %v426_v15, %v916_v51 }
  0xa3   : > { %v606_v48 = vmax.f32 %v526_v28, %v1047_v7  ;;  %v607_v49 = vmax.f32 %v527_v12, %v1050_v6  ;;  %v524_v53 = vmax.f32 %v468_v37, %v786_v39  ;;  %v525_v62 = vmax.f32 %v469_v8, %v787_v13 }
  0xa4   : > { %v522_v11 = vmax.f32 %v466_v59, %v781_v2  ;;  %v523_v27 = vmax.f32 %v467_v52, %v782_v22 }
  0xa5   : > { %v614_v40 = vpack.c.bf16 %v606_v48, %v606_v48  ;;  %v615_v42 = vpack.c.bf16 %v607_v49, %v607_v49  ;;  %v604_v16 = vmax.f32 %v524_v53, %v582_v43  ;;  %v605_v54 = vmax.f32 %v525_v62, %v585_v33 }
  0xa6   : > { %v602_v50 = vmax.f32 %v522_v11, %v576_v18  ;;  %v603_v44 = vmax.f32 %v523_v27, %v579_v57 }
  0xa7   : > { %623 = vst.msk [vmem:[%s1094_s16 + $0x18] sm:$0xf] %vm616_vm1, %v614_v40  ;;  %v612_v51 = vpack.c.bf16 %v604_v16, %v604_v16  ;;  %v613_v7 = vpack.c.bf16 %v605_v54, %v605_v54 }
  0xa8   : > { %624 = vst.msk [vmem:[%s1094_s16 + $0x1c] sm:$0xf] %vm616_vm1, %v615_v42  ;;  %v610_v6 = vpack.c.bf16 %v602_v50, %v602_v50  ;;  %v611_v63 = vpack.c.bf16 %v603_v44, %v603_v44 }
  0xa9   : > { %621 = vst.msk [vmem:[%s1094_s16 + $0x10] sm:$0xf] %vm616_vm1, %v612_v51 }
  0xaa   : > { %622 = vst.msk [vmem:[%s1094_s16 + $0x14] sm:$0xf] %vm616_vm1, %v613_v7 }
  0xab   : > { %619 = vst.msk [vmem:[%s1094_s16 + $0x8] sm:$0xf] %vm616_vm1, %v610_v6 }
  0xac   : > { %620 = vst.msk [vmem:[%s1094_s16 + $0xc] sm:$0xf] %vm616_vm1, %v611_v63 }
  0xad PF: > { %s11_s6 = sadd.s32 1, %s799_s6  }
  0xae   : > { %p8_p4 = scmp.ge.s32.totalorder %s11_s6, 4  }
  0xb0   :  { %10 = sbr.rel (!%p8_p4) target bundleno = 1 (0x1), region = 56 }

// kernel: densenet_forward.14
= control target key start
LH: loop header
LB: loop body
LE: loop exit
PB: predicated region body
PF: predicated region fallthrough
CT: control target
= control target key end

     0   :  { %vm549_vm0 = vcmask 1040384   ;;  %vm550_vm1 = vcmask 1041408   ;;  %v1639_v2 = vmov 65535   ;;  %vm452_vm2 = vcmask 154624   ;;  %s2576_s1 = inlined_call_operand.vmem [shape: bf16[147,16], index: 1, kind: input, shape index: {}]   ;;  %s2577_s2 = inlined_call_operand.vmem [shape: bf16[1,147], index: 2, kind: input, shape index: {}]   ;;  %s2578_s3 = inlined_call_operand.vmem [shape: bf16[1,147], index: 3, kind: input, shape index: {}]   ;;  %s2579_s0 = inlined_call_operand.vmem [shape: bf16[512,147], index: 0, kind: input, shape index: {}]   ;;  %s2580_s4 = inlined_call_operand.vmem [shape: f32[1,16], index: 4, kind: input, shape index: {}]   ;;  %s2581_s5 = inlined_call_operand.vmem [shape: f32[1,16], index: 5, kind: input, shape index: {}]   ;;  %s2582_s6 = inlined_call_operand.vmem [shape: bf16[512,16], index: 6, kind: output, shape index: {}]  }
   0x1   :  { %v1622_v0 = vld [vmem:[%s2576_s1 + $0x38] sm:$0xff]  ;;  %v106_v1 = vld [vmem:[%s2576_s1 + $0x48] sm:$0x3]  ;;  %v551_v3 = vsel %vm549_vm0, 4294967295, %v1639_v2  ;;  %v1621_v5 = vld [vmem:[%s2576_s1 + $0x30] sm:$0xff]  ;;  %vm1158_vm3 = vcmask 125952  }
   0x2   :  { %v432_v4 = vunpack.c.l.b16 %v106_v1  ;;  %556 = vmatpush.bf16.msra.mxu0 %v1622_v0  ;;  %1624 = vmatpush.bf16.msra.mxu2 %v1622_v0  ;;  %v552_v6 = vsel %vm550_vm1, %v551_v3, 0  ;;  %v1620_v9 = vld [vmem:[%s2576_s1 + $0x28] sm:$0xff]  ;;  %v1623_v10 = vld [vmem:[%s2576_s1 + $0x40] sm:$0xff]  ;;  %v1585_v13 = vld [vmem:[%s2579_s0 + $0x114] sm:$0xf] }
   0x3   :  { %v1551_v11 = vld [vmem:[%s2579_s0 + $0x4] sm:$0xf]  ;;  %v1231_v12 = vld [vmem:[%s2579_s0 + $0x8] sm:$0xf0]  ;;  %v1367_v14 = vld [vmem:[%s2579_s0 + $0x118] sm:$0xf0] }
   0x4   :  { %v442_v7 = vpack.c.b16 %v432_v4, %v432_v4  ;;  %v1234_v15 = vor.u32 %v1551_v11, %v1231_v12  ;;  %v1619_v16 = vld [vmem:[%s2576_s1 + $0x20] sm:$0xff]  ;;  %v1370_v17 = vor.u32 %v1585_v13, %v1367_v14  ;;  %v1618_v18 = vld [vmem:[%s2576_s1 + $0x18] sm:$0xff]  ;;  %v1617_v19 = vld [vmem:[%s2576_s1 + $0x10] sm:$0xff] }
   0x5   :  { %v1616_v20 = vld [vmem:[%s2576_s1 + $0x8] sm:$0xff]  ;;  %v1553_v21 = vld [vmem:[%s2579_s0 + $0x14] sm:$0xf]  ;;  %v1239_v22 = vld [vmem:[%s2579_s0 + $0x18] sm:$0xf0] }
   0x6   :  { %v554_v8 = vand.u32 %v552_v6, %v442_v7  ;;  %557 = vmatpush.bf16.msra.mxu0 %v1621_v5  ;;  %1625 = vmatpush.bf16.msra.mxu2 %v1621_v5  ;;  %v1587_v23 = vld [vmem:[%s2579_s0 + $0x124] sm:$0xf]  ;;  %v1375_v24 = vld [vmem:[%s2579_s0 + $0x128] sm:$0xf0]  ;;  %v1242_v25 = vor.u32 %v1553_v21, %v1239_v22  ;;  %v1229_v27 = vld [vmem:[%s2579_s0] sm:$0xf] }
   0x7   :  { %v1615_v26 = vld [vmem:[%s2576_s1] sm:$0xff]  ;;  %v1552_v28 = vld [vmem:[%s2579_s0 + $0x4] sm:$0xf0]  ;;  %v1378_v31 = vor.u32 %v1587_v23, %v1375_v24  ;;  %v1247_v35 = vld [vmem:[%s2579_s0 + $0x28] sm:$0xf0] }
   0x8   :  { %731 = vmatpush.bf16.msra.mxu1 %v554_v8  ;;  %1632 = vmatpush.bf16.msra.mxu3 %v554_v8  ;;  %v1357_v29 = vld [vmem:[%s2579_s0 + $0x100] sm:$0xf]  ;;  %v1584_v30 = vld [vmem:[%s2579_s0 + $0x104] sm:$0xf0]  ;;  %v1230_v32 = vor.u32 %v1552_v28, %v1229_v27  ;;  %v1555_v34 = vld [vmem:[%s2579_s0 + $0x24] sm:$0xf] }
   0x9   :  { %v1358_v33 = vor.u32 %v1584_v30, %v1357_v29  ;;  %v1589_v36 = vld [vmem:[%s2579_s0 + $0x134] sm:$0xf]  ;;  %v1383_v37 = vld [vmem:[%s2579_s0 + $0x138] sm:$0xf0]  ;;  %v1250_v38 = vor.u32 %v1555_v34, %v1247_v35  ;;  %v1237_v39 = vld [vmem:[%s2579_s0 + $0x10] sm:$0xf] }
   0xa   :  { %558 = vmatpush.bf16.msra.mxu0 %v1620_v9  ;;  %1626 = vmatpush.bf16.msra.mxu2 %v1620_v9  ;;  %v1554_v40 = vld [vmem:[%s2579_s0 + $0x14] sm:$0xf0]  ;;  %v1365_v41 = vld [vmem:[%s2579_s0 + $0x110] sm:$0xf]  ;;  %v1386_v43 = vor.u32 %v1589_v36, %v1383_v37  ;;  %v1557_v46 = vld [vmem:[%s2579_s0 + $0x34] sm:$0xf] }
   0xb   :  { %v1586_v42 = vld [vmem:[%s2579_s0 + $0x114] sm:$0xf0]  ;;  %v1238_v44 = vor.u32 %v1554_v40, %v1237_v39  ;;  %v1255_v47 = vld [vmem:[%s2579_s0 + $0x38] sm:$0xf0]  ;;  %v1591_v48 = vld [vmem:[%s2579_s0 + $0x144] sm:$0xf] }
   0xc   :  { %732 = vmatpush.bf16.msra.mxu1 %v1623_v10  ;;  %1633 = vmatpush.bf16.msra.mxu3 %v1623_v10  ;;  %v1366_v45 = vor.u32 %v1586_v42, %v1365_v41  ;;  %v1391_v49 = vld [vmem:[%s2579_s0 + $0x148] sm:$0xf0]  ;;  %v1258_v50 = vor.u32 %v1557_v46, %v1255_v47  ;;  %v1245_v51 = vld [vmem:[%s2579_s0 + $0x20] sm:$0xf]  ;;  %v1556_v52 = vld [vmem:[%s2579_s0 + $0x24] sm:$0xf0] }
   0xd   :  { %v1373_v53 = vld [vmem:[%s2579_s0 + $0x120] sm:$0xf]  ;;  %v1588_v54 = vld [vmem:[%s2579_s0 + $0x124] sm:$0xf0]  ;;  %v1394_v55 = vor.u32 %v1591_v48, %v1391_v49  ;;  %v1246_v56 = vor.u32 %v1556_v52, %v1245_v51  ;;  %v1559_v58 = vld [vmem:[%s2579_s0 + $0x44] sm:$0xf] }
   0xe   :  { %559 = vmatpush.bf16.msra.mxu0 %v1619_v16  ;;  %1627 = vmatpush.bf16.msra.mxu2 %v1619_v16  ;;  %v1374_v57 = vor.u32 %v1588_v54, %v1373_v53  ;;  %v1263_v59 = vld [vmem:[%s2579_s0 + $0x48] sm:$0xf0]  ;;  %v1593_v60 = vld [vmem:[%s2579_s0 + $0x154] sm:$0xf]  ;;  %v1399_v61 = vld [vmem:[%s2579_s0 + $0x158] sm:$0xf0] }
   0xf   :  { %1519 = vmatmul.msk.bf16.vlgmr.msra.gmra.mxu1 %vm452_vm2, %v1234_v15  ;;  %1536 = vmatmul.msk.bf16.vlgmr.msra.gmra.mxu3 %vm452_vm2, %v1370_v17  ;;  %v1266_v62 = vor.u32 %v1559_v58, %v1263_v59  ;;  %v1253_v63 = vld [vmem:[%s2579_s0 + $0x30] sm:$0xf]  ;;  %v1558_v0 = vld [vmem:[%s2579_s0 + $0x34] sm:$0xf0]  ;;  %v1402_v3 = vor.u32 %v1593_v60, %v1399_v61  ;;  %v1561_v6 = vld [vmem:[%s2579_s0 + $0x54] sm:$0xf] }
  0x10   :  { %v1381_v1 = vld [vmem:[%s2579_s0 + $0x130] sm:$0xf]  ;;  %v1590_v2 = vld [vmem:[%s2579_s0 + $0x134] sm:$0xf0]  ;;  %v1254_v4 = vor.u32 %v1558_v0, %v1253_v63  ;;  %v1271_v7 = vld [vmem:[%s2579_s0 + $0x58] sm:$0xf0] }
  0x11   :  { %v1382_v5 = vor.u32 %v1590_v2, %v1381_v1  ;;  %v1595_v8 = vld [vmem:[%s2579_s0 + $0x164] sm:$0xf]  ;;  %v1407_v9 = vld [vmem:[%s2579_s0 + $0x168] sm:$0xf0]  ;;  %v1274_v10 = vor.u32 %v1561_v6, %v1271_v7  ;;  %v1261_v11 = vld [vmem:[%s2579_s0 + $0x40] sm:$0xf] }
  0x12   :  { %560 = vmatpush.bf16.msra.mxu0 %v1618_v18  ;;  %1628 = vmatpush.bf16.msra.mxu2 %v1618_v18  ;;  %v1560_v12 = vld [vmem:[%s2579_s0 + $0x44] sm:$0xf0]  ;;  %v1389_v13 = vld [vmem:[%s2579_s0 + $0x140] sm:$0xf]  ;;  %v1410_v15 = vor.u32 %v1595_v8, %v1407_v9  ;;  %v1563_v18 = vld [vmem:[%s2579_s0 + $0x64] sm:$0xf] }
  0x13   :  { %v1592_v14 = vld [vmem:[%s2579_s0 + $0x144] sm:$0xf0]  ;;  %v1262_v16 = vor.u32 %v1560_v12, %v1261_v11  ;;  %v1415_v21 = vld [vmem:[%s2579_s0 + $0x178] sm:$0xf0]  ;;  %v1269_v23 = vld [vmem:[%s2579_s0 + $0x50] sm:$0xf] }
  0x14   :  { %v1390_v17 = vor.u32 %v1592_v14, %v1389_v13  ;;  %v1562_v24 = vld [vmem:[%s2579_s0 + $0x54] sm:$0xf0]  ;;  %v1565_v30 = vld [vmem:[%s2579_s0 + $0x74] sm:$0xf]  ;;  %v1277_v35 = vld [vmem:[%s2579_s0 + $0x60] sm:$0xf] }
  0x15   :  { %v1270_v28 = vor.u32 %v1562_v24, %v1269_v23  ;;  %v1564_v36 = vld [vmem:[%s2579_s0 + $0x64] sm:$0xf0]  ;;  %v1405_v37 = vld [vmem:[%s2579_s0 + $0x160] sm:$0xf]  ;;  %v1567_v42 = vld [vmem:[%s2579_s0 + $0x84] sm:$0xf] }
  0x16   :  { %561 = vmatpush.bf16.msra.mxu0 %v1617_v19  ;;  %1629 = vmatpush.bf16.msra.mxu2 %v1617_v19  ;;  %v1279_v19 = vld [vmem:[%s2579_s0 + $0x68] sm:$0xf0]  ;;  %v1278_v40 = vor.u32 %v1564_v36, %v1277_v35  ;;  %v1285_v47 = vld [vmem:[%s2579_s0 + $0x70] sm:$0xf]  ;;  %v1566_v48 = vld [vmem:[%s2579_s0 + $0x74] sm:$0xf0] }
  0x17   :  { %v1282_v22 = vor.u32 %v1563_v18, %v1279_v19  ;;  %v1598_v51 = vld [vmem:[%s2579_s0 + $0x174] sm:$0xf0]  ;;  %v1286_v53 = vor.u32 %v1566_v48, %v1285_v47  ;;  %v1303_v58 = vld [vmem:[%s2579_s0 + $0x98] sm:$0xf0]  ;;  %v1603_v59 = vld [vmem:[%s2579_s0 + $0x1a4] sm:$0xf] }
  0x18   :  { %v1439_v60 = vld [vmem:[%s2579_s0 + $0x1a8] sm:$0xf0]  ;;  %v1568_v63 = vld [vmem:[%s2579_s0 + $0x84] sm:$0xf0]  ;;  %v1421_v2 = vld [vmem:[%s2579_s0 + $0x180] sm:$0xf] }
  0x19   :  { %v1447_v23 = vld [vmem:[%s2579_s0 + $0x1b8] sm:$0xf0] }
  0x1a   :  { %562 = vmatpush.bf16.msra.mxu0 %v1616_v20  ;;  %1630 = vmatpush.bf16.msra.mxu2 %v1616_v20  ;;  %v1597_v20 = vld [vmem:[%s2579_s0 + $0x174] sm:$0xf] }
  0x1b   :  { %v1418_v27 = vor.u32 %v1597_v20, %v1415_v21  ;;  %v1571_v20 = vld [vmem:[%s2579_s0 + $0xa4] sm:$0xf]  ;;  %v1311_v21 = vld [vmem:[%s2579_s0 + $0xa8] sm:$0xf0] }
  0x1e   :  { %563 = vmatpush.bf16.msra.mxu0 %v1615_v26  ;;  %1631 = vmatpush.bf16.msra.mxu2 %v1615_v26  ;;  %v1594_v26 = vld [vmem:[%s2579_s0 + $0x154] sm:$0xf0] }
  0x1f   :  { %1520 = vmatmul.msk.bf16.gmra.mxu1 %vm452_vm2, %v1242_v25  ;;  %1537 = vmatmul.msk.bf16.gmra.mxu3 %vm452_vm2, %v1378_v31  ;;  %v1397_v25 = vld [vmem:[%s2579_s0 + $0x150] sm:$0xf]  ;;  %v1287_v31 = vld [vmem:[%s2579_s0 + $0x78] sm:$0xf0] }
  0x20   :  { %v1398_v29 = vor.u32 %v1594_v26, %v1397_v25  ;;  %v1290_v34 = vor.u32 %v1565_v30, %v1287_v31  ;;  %v1314_v25 = vor.u32 %v1571_v20, %v1311_v21  ;;  %v1301_v26 = vld [vmem:[%s2579_s0 + $0x90] sm:$0xf] }
  0x21   :  { %564 = vmatmul.bf16.vlgmr.msra.gmra.mxu0 %v1230_v32  ;;  %644 = vmatmul.bf16.vlgmr.msra.gmra.mxu2 %v1358_v33  ;;  %v1599_v32 = vld [vmem:[%s2579_s0 + $0x184] sm:$0xf]  ;;  %v1423_v33 = vld [vmem:[%s2579_s0 + $0x188] sm:$0xf0]  ;;  %v1429_v31 = vld [vmem:[%s2579_s0 + $0x190] sm:$0xf] }
  0x22   :  { %v1426_v39 = vor.u32 %v1599_v32, %v1423_v33  ;;  %v1602_v32 = vld [vmem:[%s2579_s0 + $0x194] sm:$0xf0] }
  0x2f   :  { %1521 = vmatmul.msk.bf16.gmra.mxu1 %vm452_vm2, %v1250_v38  ;;  %1538 = vmatmul.msk.bf16.gmra.mxu3 %vm452_vm2, %v1386_v43  ;;  %v1596_v38 = vld [vmem:[%s2579_s0 + $0x164] sm:$0xf0]  ;;  %v1295_v43 = vld [vmem:[%s2579_s0 + $0x88] sm:$0xf0] }
  0x30   :  { %v1406_v41 = vor.u32 %v1596_v38, %v1405_v37  ;;  %v1298_v46 = vor.u32 %v1567_v42, %v1295_v43  ;;  %v1430_v38 = vor.u32 %v1602_v32, %v1429_v31  ;;  %v1575_v32 = vld [vmem:[%s2579_s0 + $0xc4] sm:$0xf] }
  0x31   :  { %569 = vmatmul.bf16.gmra.mxu0 %v1238_v44  ;;  %649 = vmatmul.bf16.gmra.mxu2 %v1366_v45  ;;  %v1601_v44 = vld [vmem:[%s2579_s0 + $0x194] sm:$0xf]  ;;  %v1431_v45 = vld [vmem:[%s2579_s0 + $0x198] sm:$0xf0] }
  0x32   :  { %v1434_v52 = vor.u32 %v1601_v44, %v1431_v45 }
  0x3f   :  { %1522 = vmatmul.msk.bf16.gmra.mxu1 %vm452_vm2, %v1258_v50  ;;  %1539 = vmatmul.msk.bf16.gmra.mxu3 %vm452_vm2, %v1394_v55  ;;  %v1413_v50 = vld [vmem:[%s2579_s0 + $0x170] sm:$0xf] }
  0x40   :  { %v1414_v54 = vor.u32 %v1598_v51, %v1413_v50  ;;  %v1573_v51 = vld [vmem:[%s2579_s0 + $0xb4] sm:$0xf] }
  0x41   :  { %574 = vmatmul.bf16.gmra.mxu0 %v1246_v56  ;;  %654 = vmatmul.bf16.gmra.mxu2 %v1374_v57  ;;  %v1569_v57 = vld [vmem:[%s2579_s0 + $0x94] sm:$0xf] }
  0x42   :  { %v1306_v61 = vor.u32 %v1569_v57, %v1303_v58 }
  0x4f   :  { %1523 = vmatmul.msk.bf16.gmra.mxu1 %vm452_vm2, %v1266_v62  ;;  %1540 = vmatmul.msk.bf16.gmra.mxu3 %vm452_vm2, %v1402_v3  ;;  %v1293_v62 = vld [vmem:[%s2579_s0 + $0x80] sm:$0xf]  ;;  %v1600_v3 = vld [vmem:[%s2579_s0 + $0x184] sm:$0xf0] }
  0x50   :  { %v1294_v6 = vor.u32 %v1568_v63, %v1293_v62  ;;  %v1422_v8 = vor.u32 %v1600_v3, %v1421_v2  ;;  %v1604_v2 = vld [vmem:[%s2579_s0 + $0x1a4] sm:$0xf0] }
  0x51   :  { %579 = vmatmul.bf16.gmra.mxu0 %v1254_v4  ;;  %659 = vmatmul.bf16.gmra.mxu2 %v1382_v5  ;;  %v1442_v4 = vor.u32 %v1603_v59, %v1439_v60  ;;  %v1958_v5 = vld [vmem:[%s2580_s4] ss:$0 sm:$0xff]  ;;  %v1572_v60 = vld [vmem:[%s2579_s0 + $0xa4] sm:$0xf0] }
  0x52   :  { %v1309_v59 = vld [vmem:[%s2579_s0 + $0xa0] sm:$0xf] }
  0x5f   :  { %1524 = vmatmul.msk.bf16.gmra.mxu1 %vm452_vm2, %v1274_v10  ;;  %1541 = vmatmul.msk.bf16.gmra.mxu3 %vm452_vm2, %v1410_v15  ;;  %v1964_v10 = vld [vmem:[%s2581_s5] ss:$0 sm:$0xff] }
  0x61   :  { %584 = vmatmul.bf16.gmra.mxu0 %v1262_v16  ;;  %664 = vmatmul.bf16.gmra.mxu2 %v1390_v17 }
  0x6f   :  { %1525 = vmatmul.msk.bf16.gmra.mxu1 %vm452_vm2, %v1282_v22  ;;  %1542 = vmatmul.msk.bf16.gmra.mxu3 %vm452_vm2, %v1418_v27  ;;  %v1605_v22 = vld [vmem:[%s2579_s0 + $0x1b4] sm:$0xf]  ;;  %v1570_v27 = vld [vmem:[%s2579_s0 + $0x94] sm:$0xf0] }
  0x70   :  { %v1450_v33 = vor.u32 %v1605_v22, %v1447_v23  ;;  %v1302_v36 = vor.u32 %v1570_v27, %v1301_v26 }
  0x71   :  { %589 = vmatmul.bf16.gmra.mxu0 %v1270_v28  ;;  %669 = vmatmul.bf16.gmra.mxu2 %v1398_v29 }
  0x7f   :  { %1526 = vmatmul.msk.bf16.gmra.mxu1 %vm452_vm2, %v1290_v34  ;;  %1543 = vmatmul.msk.bf16.gmra.mxu3 %vm452_vm2, %v1426_v39 }
  0x81   :  { %594 = vmatmul.bf16.gmra.mxu0 %v1278_v40  ;;  %674 = vmatmul.bf16.gmra.mxu2 %v1406_v41 }
  0x8c   :  { %v734_v49 = vpop.f32.mrf.mxu1 }
  0x8f   :  { %1527 = vmatmul.msk.bf16.gmra.mxu1 %vm452_vm2, %v1298_v46  ;;  %1544 = vmatmul.msk.bf16.gmra.mxu3 %vm452_vm2, %v1434_v52  ;;  %v1319_v52 = vld [vmem:[%s2579_s0 + $0xb8] sm:$0xf0] }
  0x90   :  { %v1322_v58 = vor.u32 %v1573_v51, %v1319_v52 }
  0x91   :  { %599 = vmatmul.bf16.gmra.mxu0 %v1286_v53  ;;  %679 = vmatmul.bf16.gmra.mxu2 %v1414_v54  ;;  %v1607_v54 = vld [vmem:[%s2579_s0 + $0x1c4] sm:$0xf] }
  0x92   :  { %v1927_v55 = vpop.f32.mrf.mxu3 }
  0x94   :  { %v736_v56 = vpop.f32.mrf.mxu1 }
  0x9a   :  { %v1947_v0 = vpop.f32.mrf.mxu3 }
  0x9c   :  { %v739_v1 = vpop.f32.mrf.mxu1 }
  0x9e   :  { %v565_v7 = vpop.f32.mrf.mxu0 }
  0x9f   :  { %1528 = vmatmul.msk.bf16.gmra.mxu1 %vm452_vm2, %v1306_v61  ;;  %v735_v9 = vadd.f32 %v734_v49, %v565_v7  ;;  %1545 = vmatmul.msk.bf16.gmra.mxu3 %vm452_vm2, %v1442_v4 }
  0xa1   :  { %v898_v11 = vmul.f32 %v1958_v5, %v735_v9  ;;  %604 = vmatmul.bf16.gmra.mxu0 %v1294_v6  ;;  %684 = vmatmul.bf16.gmra.mxu2 %v1422_v8  ;;  %v1310_v8 = vor.u32 %v1572_v60, %v1309_v59 }
  0xa2   :  { %v1968_v12 = vpop.f32.mrf.mxu3 }
  0xa3   :  { %v966_v13 = vadd.f32 %v1964_v10, %v898_v11 }
  0xa4   :  { %v741_v14 = vpop.f32.mrf.mxu1  ;;  %v1971_v16 = vpop.f32.mrf.mxu2 }
  0xa5   :  { %v1030_v15 = vmax.f32 %v966_v13, 0.0 }
  0xa6   :  { %v567_v17 = vpop.f32.mrf.mxu0 }
  0xa7   :  { %v1094_v18 = vpack.c.bf16 %v1030_v15, %v1030_v15  ;;  %v737_v19 = vadd.f32 %v736_v56, %v567_v17 }
  0xa9   :  { %1159 = vst.msk [vmem:[%s2582_s6] sm:$0xf] %vm1158_vm3, %v1094_v18  ;;  %v899_v24 = vmul.f32 %v1958_v5, %v737_v19 }
  0xaa   :  { %v1996_v28 = vpop.f32.mrf.mxu3 }
  0xab   :  { %v967_v29 = vadd.f32 %v1964_v10, %v899_v24 }
  0xac   :  { %v744_v30 = vpop.f32.mrf.mxu1  ;;  %v2005_v35 = vpop.f32.mrf.mxu2 }
  0xad   :  { %v1031_v34 = vmax.f32 %v967_v29, 0.0 }
  0xae   :  { %v570_v37 = vpop.f32.mrf.mxu0 }
  0xaf   :  { %1529 = vmatmul.msk.bf16.gmra.mxu1 %vm452_vm2, %v1314_v25  ;;  %v1095_v39 = vpack.c.bf16 %v1031_v34, %v1031_v34  ;;  %v740_v40 = vadd.f32 %v739_v1, %v570_v37  ;;  %1546 = vmatmul.msk.bf16.gmra.mxu3 %vm452_vm2, %v1450_v33  ;;  %v1437_v1 = vld [vmem:[%s2579_s0 + $0x1a0] sm:$0xf]  ;;  %v1327_v33 = vld [vmem:[%s2579_s0 + $0xc8] sm:$0xf0] }
  0xb1   :  { %1160 = vst.msk [vmem:[%s2582_s6 + $0x4] sm:$0xf] %vm1158_vm3, %v1095_v39  ;;  %v900_v41 = vmul.f32 %v1958_v5, %v740_v40  ;;  %609 = vmatmul.bf16.gmra.mxu0 %v1302_v36  ;;  %689 = vmatmul.bf16.gmra.mxu2 %v1430_v38  ;;  %v1463_v36 = vld [vmem:[%s2579_s0 + $0x1d8] sm:$0xf0]  ;;  %v1330_v39 = vor.u32 %v1575_v32, %v1327_v33  ;;  %v1317_v40 = vld [vmem:[%s2579_s0 + $0xb0] sm:$0xf] }
  0xb2   :  { %v2014_v42 = vpop.f32.mrf.mxu3 }
  0xb3   :  { %v968_v43 = vadd.f32 %v1964_v10, %v900_v41  ;;  %v1574_v41 = vld [vmem:[%s2579_s0 + $0xb4] sm:$0xf0] }
  0xb4   :  { %v746_v44 = vpop.f32.mrf.mxu1  ;;  %v650_v46 = vpop.f32.mrf.mxu2  ;;  %v1318_v52 = vor.u32 %v1574_v41, %v1317_v40 }
  0xb5   :  { %v1032_v45 = vmax.f32 %v968_v43, 0.0  ;;  %v820_v47 = vadd.f32 %v1927_v55, %v650_v46  ;;  %v1455_v55 = vld [vmem:[%s2579_s0 + $0x1c8] sm:$0xf0]  ;;  %v1445_v46 = vld [vmem:[%s2579_s0 + $0x1b0] sm:$0xf] }
  0xb6   :  { %v572_v48 = vpop.f32.mrf.mxu0  ;;  %v1458_v3 = vor.u32 %v1607_v54, %v1455_v55 }
  0xb7   :  { %v1096_v49 = vpack.c.bf16 %v1032_v45, %v1032_v45  ;;  %v742_v50 = vadd.f32 %v741_v14, %v572_v48  ;;  %v932_v53 = vmul.f32 %v1958_v5, %v820_v47  ;;  %v1438_v14 = vor.u32 %v1604_v2, %v1437_v1  ;;  %v1606_v47 = vld [vmem:[%s2579_s0 + $0x1b4] sm:$0xf0] }
  0xb9   :  { %1161 = vst.msk [vmem:[%s2582_s6 + $0x8] sm:$0xf] %vm1158_vm3, %v1096_v49  ;;  %v901_v56 = vmul.f32 %v1958_v5, %v742_v50  ;;  %v1000_v57 = vadd.f32 %v1964_v10, %v932_v53 }
  0xba   :  { %v2043_v61 = vpop.f32.mrf.mxu3 }
  0xbb   :  { %v969_v62 = vadd.f32 %v1964_v10, %v901_v56  ;;  %v1064_v4 = vmax.f32 %v1000_v57, 0.0  ;;  %v1446_v56 = vor.u32 %v1606_v47, %v1445_v46 }
  0xbc   :  { %v749_v63 = vpop.f32.mrf.mxu1  ;;  %v652_v7 = vpop.f32.mrf.mxu2 }
  0xbd   :  { %v1033_v6 = vmax.f32 %v969_v62, 0.0  ;;  %v1128_v9 = vpack.c.bf16 %v1064_v4, %v1064_v4  ;;  %v822_v11 = vadd.f32 %v1947_v0, %v652_v7 }
  0xbe   :  { %v575_v13 = vpop.f32.mrf.mxu0 }
  0xbf   :  { %1530 = vmatmul.msk.bf16.gmra.mxu1 %vm452_vm2, %v1322_v58  ;;  %v1097_v15 = vpack.c.bf16 %v1033_v6, %v1033_v6  ;;  %v745_v17 = vadd.f32 %v744_v30, %v575_v13  ;;  %1547 = vmatmul.msk.bf16.gmra.mxu3 %vm452_vm2, %v1458_v3  ;;  %1193 = vst.msk [vmem:[%s2582_s6 + $0x88] sm:$0xf] %vm1158_vm3, %v1128_v9  ;;  %v1577_v13 = vld [vmem:[%s2579_s0 + $0xd4] sm:$0xf] }
  0xc0   :  { %v933_v18 = vmul.f32 %v1958_v5, %v822_v11 }
  0xc1   :  { %1162 = vst.msk [vmem:[%s2582_s6 + $0xc] sm:$0xf] %vm1158_vm3, %v1097_v15  ;;  %v902_v0 = vmul.f32 %v1958_v5, %v745_v17  ;;  %614 = vmatmul.bf16.gmra.mxu0 %v1310_v8  ;;  %694 = vmatmul.bf16.gmra.mxu2 %v1438_v14  ;;  %v1335_v14 = vld [vmem:[%s2579_s0 + $0xd8] sm:$0xf0]  ;;  %v1471_v17 = vld [vmem:[%s2579_s0 + $0x1e8] sm:$0xf0] }
  0xc2   :  { %v1001_v19 = vadd.f32 %v1964_v10, %v933_v18  ;;  %v2066_v20 = vpop.f32.mrf.mxu3 }
  0xc3   :  { %v970_v21 = vadd.f32 %v1964_v10, %v902_v0 }
  0xc4   :  { %v751_v22 = vpop.f32.mrf.mxu1  ;;  %v1065_v23 = vmax.f32 %v1001_v19, 0.0  ;;  %v655_v25 = vpop.f32.mrf.mxu2  ;;  %v1338_v19 = vor.u32 %v1577_v13, %v1335_v14 }
  0xc5   :  { %v1034_v24 = vmax.f32 %v970_v21, 0.0  ;;  %v825_v27 = vadd.f32 %v1968_v12, %v655_v25  ;;  %v1609_v12 = vld [vmem:[%s2579_s0 + $0x1d4] sm:$0xf]  ;;  %v1325_v21 = vld [vmem:[%s2579_s0 + $0xc0] sm:$0xf] }
  0xc6   :  { %v1129_v26 = vpack.c.bf16 %v1065_v23, %v1065_v23  ;;  %v577_v29 = vpop.f32.mrf.mxu0  ;;  %v1466_v48 = vor.u32 %v1609_v12, %v1463_v36 }
  0xc7   :  { %v1098_v30 = vpack.c.bf16 %v1034_v24, %v1034_v24  ;;  %v747_v31 = vadd.f32 %v746_v44, %v577_v29  ;;  %v934_v34 = vmul.f32 %v1958_v5, %v825_v27  ;;  %v1608_v27 = vld [vmem:[%s2579_s0 + $0x1c4] sm:$0xf0] }
  0xc8   :  { %1194 = vst.msk [vmem:[%s2582_s6 + $0x8c] sm:$0xf] %vm1158_vm3, %v1129_v26  ;;  %v1453_v26 = vld [vmem:[%s2579_s0 + $0x1c0] sm:$0xf] }
  0xc9   :  { %1163 = vst.msk [vmem:[%s2582_s6 + $0x10] sm:$0xf] %vm1158_vm3, %v1098_v30  ;;  %v903_v37 = vmul.f32 %v1958_v5, %v747_v31  ;;  %v1002_v38 = vadd.f32 %v1964_v10, %v934_v34 }
  0xca   :  { %v2099_v43 = vpop.f32.mrf.mxu3 }
  0xcb   :  { %v971_v44 = vadd.f32 %v1964_v10, %v903_v37  ;;  %v1066_v49 = vmax.f32 %v1002_v38, 0.0  ;;  %v1454_v37 = vor.u32 %v1608_v27, %v1453_v26 }
  0xcc   :  { %v754_v45 = vpop.f32.mrf.mxu1  ;;  %v657_v51 = vpop.f32.mrf.mxu2 }
  0xcd   :  { %v1035_v50 = vmax.f32 %v971_v44, 0.0  ;;  %v1130_v53 = vpack.c.bf16 %v1066_v49, %v1066_v49  ;;  %v827_v54 = vadd.f32 %v1996_v28, %v657_v51 }
  0xce   :  { %v580_v55 = vpop.f32.mrf.mxu0 }
  0xcf   :  { %1531 = vmatmul.msk.bf16.gmra.mxu1 %vm452_vm2, %v1330_v39  ;;  %v1099_v57 = vpack.c.bf16 %v1035_v50, %v1035_v50  ;;  %v750_v58 = vadd.f32 %v749_v63, %v580_v55  ;;  %1548 = vmatmul.msk.bf16.gmra.mxu3 %vm452_vm2, %v1466_v48  ;;  %1195 = vst.msk [vmem:[%s2582_s6 + $0x90] sm:$0xf] %vm1158_vm3, %v1130_v53  ;;  %v1579_v55 = vld [vmem:[%s2579_s0 + $0xe4] sm:$0xf] }
  0xd0   :  { %v935_v59 = vmul.f32 %v1958_v5, %v827_v54 }
  0xd1   :  { %1164 = vst.msk [vmem:[%s2582_s6 + $0x14] sm:$0xf] %vm1158_vm3, %v1099_v57  ;;  %v904_v28 = vmul.f32 %v1958_v5, %v750_v58  ;;  %619 = vmatmul.bf16.gmra.mxu0 %v1318_v52  ;;  %699 = vmatmul.bf16.gmra.mxu2 %v1446_v56  ;;  %v1343_v56 = vld [vmem:[%s2579_s0 + $0xe8] sm:$0xf0]  ;;  %v1479_v58 = vld [vmem:[%s2579_s0 + $0x1f8] sm:$0xf0] }
  0xd2   :  { %v1003_v60 = vadd.f32 %v1964_v10, %v935_v59  ;;  %v2122_v62 = vpop.f32.mrf.mxu3 }
  0xd3   :  { %v972_v63 = vadd.f32 %v1964_v10, %v904_v28 }
  0xd4   :  { %v756_v1 = vpop.f32.mrf.mxu1  ;;  %v1067_v2 = vmax.f32 %v1003_v60, 0.0  ;;  %v660_v4 = vpop.f32.mrf.mxu2  ;;  %v1346_v60 = vor.u32 %v1579_v55, %v1343_v56 }
  0xd5   :  { %v1036_v3 = vmax.f32 %v972_v63, 0.0  ;;  %v830_v7 = vadd.f32 %v2014_v42, %v660_v4  ;;  %v1611_v42 = vld [vmem:[%s2579_s0 + $0x1e4] sm:$0xf]  ;;  %v1333_v63 = vld [vmem:[%s2579_s0 + $0xd0] sm:$0xf] }
  0xd6   :  { %v1131_v6 = vpack.c.bf16 %v1067_v2, %v1067_v2  ;;  %v582_v8 = vpop.f32.mrf.mxu0  ;;  %v1474_v29 = vor.u32 %v1611_v42, %v1471_v17 }
  0xd7   :  { %v1100_v9 = vpack.c.bf16 %v1036_v3, %v1036_v3  ;;  %v752_v11 = vadd.f32 %v751_v22, %v582_v8  ;;  %v936_v15 = vmul.f32 %v1958_v5, %v830_v7  ;;  %v1576_v22 = vld [vmem:[%s2579_s0 + $0xc4] sm:$0xf0]  ;;  %v1610_v7 = vld [vmem:[%s2579_s0 + $0x1d4] sm:$0xf0] }
  0xd8   :  { %1196 = vst.msk [vmem:[%s2582_s6 + $0x94] sm:$0xf] %vm1158_vm3, %v1131_v6  ;;  %v1326_v33 = vor.u32 %v1576_v22, %v1325_v21  ;;  %v1461_v6 = vld [vmem:[%s2579_s0 + $0x1d0] sm:$0xf] }
  0xd9   :  { %1165 = vst.msk [vmem:[%s2582_s6 + $0x18] sm:$0xf] %vm1158_vm3, %v1100_v9  ;;  %v905_v18 = vmul.f32 %v1958_v5, %v752_v11  ;;  %v1004_v0 = vadd.f32 %v1964_v10, %v936_v15 }
  0xda   :  { %v2155_v23 = vpop.f32.mrf.mxu3 }
  0xdb   :  { %v973_v24 = vadd.f32 %v1964_v10, %v905_v18  ;;  %v1068_v30 = vmax.f32 %v1004_v0, 0.0  ;;  %v1462_v18 = vor.u32 %v1610_v7, %v1461_v6 }
  0xdc   :  { %v759_v25 = vpop.f32.mrf.mxu1  ;;  %v662_v32 = vpop.f32.mrf.mxu2 }
  0xdd   :  { %v1037_v31 = vmax.f32 %v973_v24, 0.0  ;;  %v1132_v34 = vpack.c.bf16 %v1068_v30, %v1068_v30  ;;  %v832_v12 = vadd.f32 %v2043_v61, %v662_v32 }
  0xde   :  { %v585_v36 = vpop.f32.mrf.mxu0 }
  0xdf   :  { %1532 = vmatmul.msk.bf16.gmra.mxu1 %vm452_vm2, %v1338_v19  ;;  %v1101_v38 = vpack.c.bf16 %v1037_v31, %v1037_v31  ;;  %v755_v39 = vadd.f32 %v754_v45, %v585_v36  ;;  %1549 = vmatmul.msk.bf16.gmra.mxu3 %vm452_vm2, %v1474_v29  ;;  %1197 = vst.msk [vmem:[%s2582_s6 + $0x98] sm:$0xf] %vm1158_vm3, %v1132_v34  ;;  %v1581_v36 = vld [vmem:[%s2579_s0 + $0xf4] sm:$0xf] }
  0xe0   :  { %v937_v40 = vmul.f32 %v1958_v5, %v832_v12 }
  0xe1   :  { %1166 = vst.msk [vmem:[%s2582_s6 + $0x1c] sm:$0xf] %vm1158_vm3, %v1101_v38  ;;  %v906_v61 = vmul.f32 %v1958_v5, %v755_v39  ;;  %624 = vmatmul.bf16.gmra.mxu0 %v1326_v33  ;;  %704 = vmatmul.bf16.gmra.mxu2 %v1454_v37  ;;  %v1351_v37 = vld [vmem:[%s2579_s0 + $0xf8] sm:$0xf0] }
  0xe2   :  { %v1005_v41 = vadd.f32 %v1964_v10, %v937_v40  ;;  %v2178_v44 = vpop.f32.mrf.mxu3  ;;  %v1354_v40 = vor.u32 %v1581_v36, %v1351_v37 }
  0xe3   :  { %v974_v45 = vadd.f32 %v1964_v10, %v906_v61  ;;  %v1341_v61 = vld [vmem:[%s2579_s0 + $0xe0] sm:$0xf] }
  0xe4   :  { %v761_v46 = vpop.f32.mrf.mxu1  ;;  %v1069_v47 = vmax.f32 %v1005_v41, 0.0  ;;  %v665_v49 = vpop.f32.mrf.mxu2  ;;  %v1580_v41 = vld [vmem:[%s2579_s0 + $0xe4] sm:$0xf0] }
  0xe5   :  { %v1038_v48 = vmax.f32 %v974_v45, 0.0  ;;  %v835_v51 = vadd.f32 %v2066_v20, %v665_v49  ;;  %v1613_v20 = vld [vmem:[%s2579_s0 + $0x1f4] sm:$0xf] }
  0xe6   :  { %v1133_v50 = vpack.c.bf16 %v1069_v47, %v1069_v47  ;;  %v587_v52 = vpop.f32.mrf.mxu0  ;;  %v1482_v8 = vor.u32 %v1613_v20, %v1479_v58  ;;  %v1469_v47 = vld [vmem:[%s2579_s0 + $0x1e0] sm:$0xf] }
  0xe7   :  { %v1102_v53 = vpack.c.bf16 %v1038_v48, %v1038_v48  ;;  %v757_v54 = vadd.f32 %v756_v1, %v587_v52  ;;  %v938_v57 = vmul.f32 %v1958_v5, %v835_v51  ;;  %v1578_v1 = vld [vmem:[%s2579_s0 + $0xd4] sm:$0xf0]  ;;  %v1612_v48 = vld [vmem:[%s2579_s0 + $0x1e4] sm:$0xf0]  ;;  %v1342_v52 = vor.u32 %v1580_v41, %v1341_v61 }
  0xe8   :  { %1198 = vst.msk [vmem:[%s2582_s6 + $0x9c] sm:$0xf] %vm1158_vm3, %v1133_v50  ;;  %v1334_v14 = vor.u32 %v1578_v1, %v1333_v63 }
  0xe9   :  { %1167 = vst.msk [vmem:[%s2582_s6 + $0x20] sm:$0xf] %vm1158_vm3, %v1102_v53  ;;  %v907_v59 = vmul.f32 %v1958_v5, %v757_v54  ;;  %v1006_v28 = vadd.f32 %v1964_v10, %v938_v57  ;;  %v1470_v57 = vor.u32 %v1612_v48, %v1469_v47 }
  0xea   :  { %v2211_v2 = vpop.f32.mrf.mxu3 }
  0xeb   :  { %v975_v3 = vadd.f32 %v1964_v10, %v907_v59  ;;  %v1070_v9 = vmax.f32 %v1006_v28, 0.0 }
  0xec   :  { %v764_v4 = vpop.f32.mrf.mxu1  ;;  %v667_v13 = vpop.f32.mrf.mxu2 }
  0xed   :  { %v1039_v11 = vmax.f32 %v975_v3, 0.0  ;;  %v1134_v15 = vpack.c.bf16 %v1070_v9, %v1070_v9  ;;  %v837_v42 = vadd.f32 %v2099_v43, %v667_v13  ;;  %v1583_v13 = vld [vmem:[%s2579_s0 + $0x104] sm:$0xf] }
  0xee   :  { %v590_v17 = vpop.f32.mrf.mxu0 }
  0xef   :  { %1533 = vmatmul.msk.bf16.gmra.mxu1 %vm452_vm2, %v1346_v60  ;;  %v1103_v0 = vpack.c.bf16 %v1039_v11, %v1039_v11  ;;  %v760_v19 = vadd.f32 %v759_v25, %v590_v17  ;;  %1550 = vmatmul.msk.bf16.gmra.mxu3 %vm452_vm2, %v1482_v8  ;;  %1199 = vst.msk [vmem:[%s2582_s6 + $0xa0] sm:$0xf] %vm1158_vm3, %v1134_v15 }
  0xf0   :  { %v939_v21 = vmul.f32 %v1958_v5, %v837_v42 }
  0xf1   :  { %1168 = vst.msk [vmem:[%s2582_s6 + $0x24] sm:$0xf] %vm1158_vm3, %v1103_v0  ;;  %v908_v43 = vmul.f32 %v1958_v5, %v760_v19  ;;  %629 = vmatmul.bf16.gmra.mxu0 %v1334_v14  ;;  %709 = vmatmul.bf16.gmra.mxu2 %v1462_v18  ;;  %v1359_v14 = vld [vmem:[%s2579_s0 + $0x108] sm:$0xf0]  ;;  %v1349_v0 = vld [vmem:[%s2579_s0 + $0xf0] sm:$0xf] }
  0xf2   :  { %v1007_v22 = vadd.f32 %v1964_v10, %v939_v21  ;;  %v2235_v26 = vpop.f32.mrf.mxu3  ;;  %v1362_v18 = vor.u32 %v1583_v13, %v1359_v14  ;;  %v1582_v19 = vld [vmem:[%s2579_s0 + $0xf4] sm:$0xf0] }
  0xf3   :  { %v976_v24 = vadd.f32 %v1964_v10, %v908_v43 }
  0xf4   :  { %v766_v25 = vpop.f32.mrf.mxu1  ;;  %v1071_v27 = vmax.f32 %v1007_v22, 0.0  ;;  %v670_v30 = vpop.f32.mrf.mxu2  ;;  %v1477_v22 = vld [vmem:[%s2579_s0 + $0x1f0] sm:$0xf] }
  0xf5   :  { %v1040_v29 = vmax.f32 %v976_v24, 0.0  ;;  %v840_v32 = vadd.f32 %v2122_v62, %v670_v30  ;;  %v1614_v24 = vld [vmem:[%s2579_s0 + $0x1f4] sm:$0xf0]  ;;  %v1350_v30 = vor.u32 %v1582_v19, %v1349_v0 }
  0xf6   :  { %v1135_v31 = vpack.c.bf16 %v1071_v27, %v1071_v27  ;;  %v592_v33 = vpop.f32.mrf.mxu0 }
  0xf7   :  { %v1104_v34 = vpack.c.bf16 %v1040_v29, %v1040_v29  ;;  %v762_v12 = vadd.f32 %v761_v46, %v592_v33  ;;  %v940_v38 = vmul.f32 %v1958_v5, %v840_v32 }
  0xf8   :  { %1200 = vst.msk [vmem:[%s2582_s6 + $0xa4] sm:$0xf] %vm1158_vm3, %v1135_v31 }
  0xf9   :  { %1169 = vst.msk [vmem:[%s2582_s6 + $0x28] sm:$0xf] %vm1158_vm3, %v1104_v34  ;;  %v909_v62 = vmul.f32 %v1958_v5, %v762_v12  ;;  %v1008_v39 = vadd.f32 %v1964_v10, %v940_v38  ;;  %v1478_v34 = vor.u32 %v1614_v24, %v1477_v22 }
  0xfa   :  { %v2268_v53 = vpop.f32.mrf.mxu3 }
  0xfb   :  { %v977_v45 = vadd.f32 %v1964_v10, %v909_v62  ;;  %v1072_v49 = vmax.f32 %v1008_v39, 0.0 }
  0xfc   :  { %v769_v46 = vpop.f32.mrf.mxu1  ;;  %v672_v51 = vpop.f32.mrf.mxu2 }
  0xfd   :  { %v1041_v50 = vmax.f32 %v977_v45, 0.0  ;;  %v1136_v54 = vpack.c.bf16 %v1072_v49, %v1072_v49  ;;  %v842_v55 = vadd.f32 %v2155_v23, %v672_v51 }
  0xfe   :  { %v595_v56 = vpop.f32.mrf.mxu0 }
  0xff   :  { %1534 = vmatmul.msk.bf16.gmra.mxu1 %vm452_vm2, %v1354_v40  ;;  %v1105_v20 = vpack.c.bf16 %v1041_v50, %v1041_v50  ;;  %v765_v58 = vadd.f32 %v764_v4, %v595_v56  ;;  %1201 = vst.msk [vmem:[%s2582_s6 + $0xa8] sm:$0xf] %vm1158_vm3, %v1136_v54  ;;  %v941_v59 = vmul.f32 %v1958_v5, %v842_v55 }
 0x101   :  { %1170 = vst.msk [vmem:[%s2582_s6 + $0x2c] sm:$0xf] %vm1158_vm3, %v1105_v20  ;;  %v910_v23 = vmul.f32 %v1958_v5, %v765_v58  ;;  %634 = vmatmul.bf16.gmra.mxu0 %v1342_v52  ;;  %v1009_v28 = vadd.f32 %v1964_v10, %v941_v59  ;;  %714 = vmatmul.bf16.gmra.mxu2 %v1470_v57 }
 0x102   :  { %v2291_v15 = vpop.f32.mrf.mxu3 }
 0x103   :  { %v978_v60 = vadd.f32 %v1964_v10, %v910_v23  ;;  %v1073_v1 = vmax.f32 %v1009_v28, 0.0 }
 0x104   :  { %v771_v63 = vpop.f32.mrf.mxu1  ;;  %v675_v4 = vpop.f32.mrf.mxu2 }
 0x105   :  { %v1042_v3 = vmax.f32 %v978_v60, 0.0  ;;  %v1137_v6 = vpack.c.bf16 %v1073_v1, %v1073_v1  ;;  %v845_v7 = vadd.f32 %v2178_v44, %v675_v4 }
 0x106   :  { %v597_v8 = vpop.f32.mrf.mxu0 }
 0x107   :  { %v1106_v9 = vpack.c.bf16 %v1042_v3, %v1042_v3  ;;  %v767_v11 = vadd.f32 %v766_v25, %v597_v8  ;;  %1202 = vst.msk [vmem:[%s2582_s6 + $0xac] sm:$0xf] %vm1158_vm3, %v1137_v6  ;;  %v942_v44 = vmul.f32 %v1958_v5, %v845_v7 }
 0x109   :  { %1171 = vst.msk [vmem:[%s2582_s6 + $0x30] sm:$0xf] %vm1158_vm3, %v1106_v9  ;;  %v911_v42 = vmul.f32 %v1958_v5, %v767_v11  ;;  %v1010_v17 = vadd.f32 %v1964_v10, %v942_v44 }
 0x10a   :  { %v856_v38 = vpop.f32.mrf.mxu3 }
 0x10b   :  { %v979_v21 = vadd.f32 %v1964_v10, %v911_v42  ;;  %v1074_v25 = vmax.f32 %v1010_v17, 0.0 }
 0x10c   :  { %v774_v43 = vpop.f32.mrf.mxu1  ;;  %v677_v29 = vpop.f32.mrf.mxu2 }
 0x10d   :  { %v1043_v27 = vmax.f32 %v979_v21, 0.0  ;;  %v1138_v31 = vpack.c.bf16 %v1074_v25, %v1074_v25  ;;  %v847_v32 = vadd.f32 %v2211_v2, %v677_v29 }
 0x10e   :  { %v600_v33 = vpop.f32.mrf.mxu0 }
 0x10f   :  { %1535 = vmatmul.msk.bf16.gmra.mxu1 %vm452_vm2, %v1362_v18  ;;  %v1107_v12 = vpack.c.bf16 %v1043_v27, %v1043_v27  ;;  %v770_v36 = vadd.f32 %v769_v46, %v600_v33  ;;  %1203 = vst.msk [vmem:[%s2582_s6 + $0xb0] sm:$0xf] %vm1158_vm3, %v1138_v31  ;;  %v943_v37 = vmul.f32 %v1958_v5, %v847_v32 }
 0x111   :  { %1172 = vst.msk [vmem:[%s2582_s6 + $0x34] sm:$0xf] %vm1158_vm3, %v1107_v12  ;;  %v912_v2 = vmul.f32 %v1958_v5, %v770_v36  ;;  %639 = vmatmul.bf16.gmra.mxu0 %v1350_v30  ;;  %v1011_v62 = vadd.f32 %v1964_v10, %v943_v37  ;;  %719 = vmatmul.bf16.gmra.mxu2 %v1478_v34 }
 0x112   :  { %v859_v56 = vpop.f32.mrf.mxu3 }
 0x113   :  { %v980_v39 = vadd.f32 %v1964_v10, %v912_v2  ;;  %v1075_v61 = vmax.f32 %v1011_v62, 0.0 }
 0x114   :  { %v776_v40 = vpop.f32.mrf.mxu1  ;;  %v680_v45 = vpop.f32.mrf.mxu2 }
 0x115   :  { %v1044_v41 = vmax.f32 %v980_v39, 0.0  ;;  %v1139_v46 = vpack.c.bf16 %v1075_v61, %v1075_v61  ;;  %v850_v47 = vadd.f32 %v2235_v26, %v680_v45 }
 0x116   :  { %v602_v48 = vpop.f32.mrf.mxu0 }
 0x117   :  { %v1108_v49 = vpack.c.bf16 %v1044_v41, %v1044_v41  ;;  %v772_v50 = vadd.f32 %v771_v63, %v602_v48  ;;  %1204 = vst.msk [vmem:[%s2582_s6 + $0xb4] sm:$0xf] %vm1158_vm3, %v1139_v46  ;;  %v944_v51 = vmul.f32 %v1958_v5, %v850_v47 }
 0x119   :  { %1173 = vst.msk [vmem:[%s2582_s6 + $0x38] sm:$0xf] %vm1158_vm3, %v1108_v49  ;;  %v913_v52 = vmul.f32 %v1958_v5, %v772_v50  ;;  %v1012_v54 = vadd.f32 %v1964_v10, %v944_v51 }
 0x11a   :  { %v861_v11 = vpop.f32.mrf.mxu3 }
 0x11b   :  { %v981_v26 = vadd.f32 %v1964_v10, %v913_v52  ;;  %v1076_v57 = vmax.f32 %v1012_v54, 0.0 }
 0x11c   :  { %v779_v55 = vpop.f32.mrf.mxu1  ;;  %v682_v58 = vpop.f32.mrf.mxu2 }
 0x11d   :  { %v1045_v20 = vmax.f32 %v981_v26, 0.0  ;;  %v1140_v59 = vpack.c.bf16 %v1076_v57, %v1076_v57  ;;  %v852_v23 = vadd.f32 %v2268_v53, %v682_v58 }
 0x11e   :  { %v605_v28 = vpop.f32.mrf.mxu0 }
 0x11f   :  { %v1109_v60 = vpack.c.bf16 %v1045_v20, %v1045_v20  ;;  %v775_v63 = vadd.f32 %v774_v43, %v605_v28  ;;  %1205 = vst.msk [vmem:[%s2582_s6 + $0xb8] sm:$0xf] %vm1158_vm3, %v1140_v59  ;;  %v945_v1 = vmul.f32 %v1958_v5, %v852_v23 }
 0x121   :  { %1174 = vst.msk [vmem:[%s2582_s6 + $0x3c] sm:$0xf] %vm1158_vm3, %v1109_v60  ;;  %v914_v3 = vmul.f32 %v1958_v5, %v775_v63  ;;  %v1013_v4 = vadd.f32 %v1964_v10, %v945_v1 }
 0x122   :  { %v864_v32 = vpop.f32.mrf.mxu3 }
 0x123   :  { %v982_v53 = vadd.f32 %v1964_v10, %v914_v3  ;;  %v1077_v7 = vmax.f32 %v1013_v4, 0.0 }
 0x124   :  { %v781_v6 = vpop.f32.mrf.mxu1  ;;  %v685_v9 = vpop.f32.mrf.mxu2 }
 0x125   :  { %v1046_v8 = vmax.f32 %v982_v53, 0.0  ;;  %v1141_v13 = vpack.c.bf16 %v1077_v7, %v1077_v7  ;;  %v855_v14 = vadd.f32 %v2291_v15, %v685_v9 }
 0x126   :  { %v607_v44 = vpop.f32.mrf.mxu0 }
 0x127   :  { %v1110_v42 = vpack.c.bf16 %v1046_v8, %v1046_v8  ;;  %v777_v17 = vadd.f32 %v776_v40, %v607_v44  ;;  %1206 = vst.msk [vmem:[%s2582_s6 + $0xbc] sm:$0xf] %vm1158_vm3, %v1141_v13  ;;  %v946_v18 = vmul.f32 %v1958_v5, %v855_v14 }
 0x129   :  { %1175 = vst.msk [vmem:[%s2582_s6 + $0x40] sm:$0xf] %vm1158_vm3, %v1110_v42  ;;  %v915_v0 = vmul.f32 %v1958_v5, %v777_v17  ;;  %v1014_v19 = vadd.f32 %v1964_v10, %v946_v18 }
 0x12a   :  { %v866_v48 = vpop.f32.mrf.mxu3 }
 0x12b   :  { %v983_v15 = vadd.f32 %v1964_v10, %v915_v0  ;;  %v1078_v43 = vmax.f32 %v1014_v19, 0.0 }
 0x12c   :  { %v784_v21 = vpop.f32.mrf.mxu1  ;;  %v687_v24 = vpop.f32.mrf.mxu2 }
 0x12d   :  { %v1047_v22 = vmax.f32 %v983_v15, 0.0  ;;  %v1142_v25 = vpack.c.bf16 %v1078_v43, %v1078_v43  ;;  %v857_v27 = vadd.f32 %v856_v38, %v687_v24 }
 0x12e   :  { %v610_v29 = vpop.f32.mrf.mxu0 }
 0x12f   :  { %v1111_v30 = vpack.c.bf16 %v1047_v22, %v1047_v22  ;;  %v780_v31 = vadd.f32 %v779_v55, %v610_v29  ;;  %1207 = vst.msk [vmem:[%s2582_s6 + $0xc0] sm:$0xf] %vm1158_vm3, %v1142_v25  ;;  %v947_v33 = vmul.f32 %v1958_v5, %v857_v27 }
 0x131   :  { %1176 = vst.msk [vmem:[%s2582_s6 + $0x44] sm:$0xf] %vm1158_vm3, %v1111_v30  ;;  %v916_v34 = vmul.f32 %v1958_v5, %v780_v31  ;;  %v1015_v12 = vadd.f32 %v1964_v10, %v947_v33 }
 0x132   :  { %v869_v1 = vpop.f32.mrf.mxu3 }
 0x133   :  { %v984_v36 = vadd.f32 %v1964_v10, %v916_v34  ;;  %v1079_v2 = vmax.f32 %v1015_v12, 0.0 }
 0x134   :  { %v786_v37 = vpop.f32.mrf.mxu1  ;;  %v690_v62 = vpop.f32.mrf.mxu2 }
 0x135   :  { %v1048_v38 = vmax.f32 %v984_v36, 0.0  ;;  %v1143_v39 = vpack.c.bf16 %v1079_v2, %v1079_v2  ;;  %v860_v40 = vadd.f32 %v859_v56, %v690_v62 }
 0x136   :  { %v612_v61 = vpop.f32.mrf.mxu0 }
 0x137   :  { %v1112_v41 = vpack.c.bf16 %v1048_v38, %v1048_v38  ;;  %v782_v45 = vadd.f32 %v781_v6, %v612_v61  ;;  %1208 = vst.msk [vmem:[%s2582_s6 + $0xc4] sm:$0xf] %vm1158_vm3, %v1143_v39  ;;  %v948_v46 = vmul.f32 %v1958_v5, %v860_v40 }
 0x139   :  { %1177 = vst.msk [vmem:[%s2582_s6 + $0x48] sm:$0xf] %vm1158_vm3, %v1112_v41  ;;  %v917_v47 = vmul.f32 %v1958_v5, %v782_v45  ;;  %v1016_v49 = vadd.f32 %v1964_v10, %v948_v46 }
 0x13a   :  { %v871_v15 = vpop.f32.mrf.mxu3 }
 0x13b   :  { %v985_v50 = vadd.f32 %v1964_v10, %v917_v47  ;;  %v1080_v52 = vmax.f32 %v1016_v49, 0.0 }
 0x13c   :  { %v789_v51 = vpop.f32.mrf.mxu1  ;;  %v692_v26 = vpop.f32.mrf.mxu2 }
 0x13d   :  { %v1049_v54 = vmax.f32 %v985_v50, 0.0  ;;  %v1144_v55 = vpack.c.bf16 %v1080_v52, %v1080_v52  ;;  %v862_v56 = vadd.f32 %v861_v11, %v692_v26 }
 0x13e   :  { %v615_v57 = vpop.f32.mrf.mxu0 }
 0x13f   :  { %v1113_v20 = vpack.c.bf16 %v1049_v54, %v1049_v54  ;;  %v785_v58 = vadd.f32 %v784_v21, %v615_v57  ;;  %1209 = vst.msk [vmem:[%s2582_s6 + $0xc8] sm:$0xf] %vm1158_vm3, %v1144_v55  ;;  %v949_v59 = vmul.f32 %v1958_v5, %v862_v56 }
 0x141   :  { %1178 = vst.msk [vmem:[%s2582_s6 + $0x4c] sm:$0xf] %vm1158_vm3, %v1113_v20  ;;  %v918_v23 = vmul.f32 %v1958_v5, %v785_v58  ;;  %v1017_v28 = vadd.f32 %v1964_v10, %v949_v59 }
 0x142   :  { %v874_v39 = vpop.f32.mrf.mxu3 }
 0x143   :  { %v986_v60 = vadd.f32 %v1964_v10, %v918_v23  ;;  %v1081_v3 = vmax.f32 %v1017_v28, 0.0 }
 0x144   :  { %v791_v63 = vpop.f32.mrf.mxu1  ;;  %v695_v53 = vpop.f32.mrf.mxu2 }
 0x145   :  { %v1050_v4 = vmax.f32 %v986_v60, 0.0  ;;  %v1145_v6 = vpack.c.bf16 %v1081_v3, %v1081_v3  ;;  %v865_v7 = vadd.f32 %v864_v32, %v695_v53 }
 0x146   :  { %v617_v8 = vpop.f32.mrf.mxu0 }
 0x147   :  { %v1114_v9 = vpack.c.bf16 %v1050_v4, %v1050_v4  ;;  %v787_v11 = vadd.f32 %v786_v37, %v617_v8  ;;  %1210 = vst.msk [vmem:[%s2582_s6 + $0xcc] sm:$0xf] %vm1158_vm3, %v1145_v6  ;;  %v950_v13 = vmul.f32 %v1958_v5, %v865_v7 }
 0x149   :  { %1179 = vst.msk [vmem:[%s2582_s6 + $0x50] sm:$0xf] %vm1158_vm3, %v1114_v9  ;;  %v919_v14 = vmul.f32 %v1958_v5, %v787_v11  ;;  %v1018_v44 = vadd.f32 %v1964_v10, %v950_v13 }
 0x14a   :  { %v876_v57 = vpop.f32.mrf.mxu3 }
 0x14b   :  { %v987_v42 = vadd.f32 %v1964_v10, %v919_v14  ;;  %v1082_v18 = vmax.f32 %v1018_v44, 0.0 }
 0x14c   :  { %v794_v17 = vpop.f32.mrf.mxu1  ;;  %v697_v19 = vpop.f32.mrf.mxu2 }
 0x14d   :  { %v1051_v0 = vmax.f32 %v987_v42, 0.0  ;;  %v1146_v21 = vpack.c.bf16 %v1082_v18, %v1082_v18  ;;  %v867_v43 = vadd.f32 %v866_v48, %v697_v19 }
 0x14e   :  { %v620_v22 = vpop.f32.mrf.mxu0 }
 0x14f   :  { %v1115_v24 = vpack.c.bf16 %v1051_v0, %v1051_v0  ;;  %v790_v25 = vadd.f32 %v789_v51, %v620_v22  ;;  %1211 = vst.msk [vmem:[%s2582_s6 + $0xd0] sm:$0xf] %vm1158_vm3, %v1146_v21  ;;  %v951_v27 = vmul.f32 %v1958_v5, %v867_v43  ;;  %v2478_v43 = vld [vmem:[%s2580_s4] ss:$0 sm:$0xff] }
 0x151   :  { %1180 = vst.msk [vmem:[%s2582_s6 + $0x54] sm:$0xf] %vm1158_vm3, %v1115_v24  ;;  %v920_v29 = vmul.f32 %v1958_v5, %v790_v25  ;;  %v1019_v30 = vadd.f32 %v1964_v10, %v951_v27 }
 0x152   :  { %v879_v13 = vpop.f32.mrf.mxu3 }
 0x153   :  { %v988_v31 = vadd.f32 %v1964_v10, %v920_v29  ;;  %v1083_v33 = vmax.f32 %v1019_v30, 0.0 }
 0x154   :  { %v796_v32 = vpop.f32.mrf.mxu1  ;;  %v700_v12 = vpop.f32.mrf.mxu2 }
 0x155   :  { %v1052_v34 = vmax.f32 %v988_v31, 0.0  ;;  %v1147_v36 = vpack.c.bf16 %v1083_v33, %v1083_v33  ;;  %v870_v37 = vadd.f32 %v869_v1, %v700_v12 }
 0x156   :  { %v622_v2 = vpop.f32.mrf.mxu0 }
 0x157   :  { %v1116_v38 = vpack.c.bf16 %v1052_v34, %v1052_v34  ;;  %v792_v62 = vadd.f32 %v791_v63, %v622_v2  ;;  %1212 = vst.msk [vmem:[%s2582_s6 + $0xd4] sm:$0xf] %vm1158_vm3, %v1147_v36  ;;  %v952_v40 = vmul.f32 %v1958_v5, %v870_v37  ;;  %v2496_v2 = vld [vmem:[%s2581_s5] ss:$0 sm:$0xff] }
 0x159   :  { %1181 = vst.msk [vmem:[%s2582_s6 + $0x58] sm:$0xf] %vm1158_vm3, %v1116_v38  ;;  %v921_v61 = vmul.f32 %v1958_v5, %v792_v62  ;;  %v1020_v41 = vadd.f32 %v1964_v10, %v952_v40 }
 0x15a   :  { %v881_v31 = vpop.f32.mrf.mxu3 }
 0x15b   :  { %v989_v45 = vadd.f32 %v1964_v10, %v921_v61  ;;  %v1084_v47 = vmax.f32 %v1020_v41, 0.0 }
 0x15c   :  { %v799_v46 = vpop.f32.mrf.mxu1  ;;  %v702_v49 = vpop.f32.mrf.mxu2 }
 0x15d   :  { %v1053_v48 = vmax.f32 %v989_v45, 0.0  ;;  %v1148_v50 = vpack.c.bf16 %v1084_v47, %v1084_v47  ;;  %v872_v51 = vadd.f32 %v871_v15, %v702_v49 }
 0x15e   :  { %v625_v52 = vpop.f32.mrf.mxu0 }
 0x15f   :  { %v1117_v54 = vpack.c.bf16 %v1053_v48, %v1053_v48  ;;  %v795_v26 = vadd.f32 %v794_v17, %v625_v52  ;;  %1213 = vst.msk [vmem:[%s2582_s6 + $0xd8] sm:$0xf] %vm1158_vm3, %v1148_v50  ;;  %v953_v55 = vmul.f32 %v1958_v5, %v872_v51 }
 0x161   :  { %1182 = vst.msk [vmem:[%s2582_s6 + $0x5c] sm:$0xf] %vm1158_vm3, %v1117_v54  ;;  %v922_v56 = vmul.f32 %v1958_v5, %v795_v26  ;;  %v1021_v20 = vadd.f32 %v1964_v10, %v953_v55 }
 0x162   :  { %v884_v49 = vpop.f32.mrf.mxu3 }
 0x163   :  { %v990_v58 = vadd.f32 %v1964_v10, %v922_v56  ;;  %v1085_v23 = vmax.f32 %v1021_v20, 0.0 }
 0x164   :  { %v801_v59 = vpop.f32.mrf.mxu1  ;;  %v705_v60 = vpop.f32.mrf.mxu2 }
 0x165   :  { %v1054_v28 = vmax.f32 %v990_v58, 0.0  ;;  %v1149_v63 = vpack.c.bf16 %v1085_v23, %v1085_v23  ;;  %v875_v1 = vadd.f32 %v874_v39, %v705_v60 }
 0x166   :  { %v627_v3 = vpop.f32.mrf.mxu0 }
 0x167   :  { %v1118_v4 = vpack.c.bf16 %v1054_v28, %v1054_v28  ;;  %v797_v53 = vadd.f32 %v796_v32, %v627_v3  ;;  %1214 = vst.msk [vmem:[%s2582_s6 + $0xdc] sm:$0xf] %vm1158_vm3, %v1149_v63  ;;  %v954_v6 = vmul.f32 %v1958_v5, %v875_v1 }
 0x169   :  { %1183 = vst.msk [vmem:[%s2582_s6 + $0x60] sm:$0xf] %vm1158_vm3, %v1118_v4  ;;  %v923_v7 = vmul.f32 %v1958_v5, %v797_v53  ;;  %v1022_v8 = vadd.f32 %v1964_v10, %v954_v6 }
 0x16a   :  { %v886_v1 = vpop.f32.mrf.mxu3 }
 0x16b   :  { %v991_v9 = vadd.f32 %v1964_v10, %v923_v7  ;;  %v1086_v14 = vmax.f32 %v1022_v8, 0.0 }
 0x16c   :  { %v804_v11 = vpop.f32.mrf.mxu1  ;;  %v707_v42 = vpop.f32.mrf.mxu2 }
 0x16d   :  { %v1055_v44 = vmax.f32 %v991_v9, 0.0  ;;  %v1150_v17 = vpack.c.bf16 %v1086_v14, %v1086_v14  ;;  %v877_v18 = vadd.f32 %v876_v57, %v707_v42 }
 0x16e   :  { %v630_v0 = vpop.f32.mrf.mxu0 }
 0x16f   :  { %v1119_v19 = vpack.c.bf16 %v1055_v44, %v1055_v44  ;;  %v800_v15 = vadd.f32 %v799_v46, %v630_v0  ;;  %1215 = vst.msk [vmem:[%s2582_s6 + $0xe0] sm:$0xf] %vm1158_vm3, %v1150_v17  ;;  %v955_v21 = vmul.f32 %v1958_v5, %v877_v18 }
 0x171   :  { %1184 = vst.msk [vmem:[%s2582_s6 + $0x64] sm:$0xf] %vm1158_vm3, %v1119_v19  ;;  %v924_v22 = vmul.f32 %v2478_v43, %v800_v15  ;;  %v1023_v24 = vadd.f32 %v1964_v10, %v955_v21 }
 0x173   :  { %v992_v25 = vadd.f32 %v1964_v10, %v924_v22  ;;  %v1087_v29 = vmax.f32 %v1023_v24, 0.0  ;;  %v889_v22 = vpop.f32.mrf.mxu3 }
 0x174   :  { %v806_v27 = vpop.f32.mrf.mxu1  ;;  %v710_v5 = vpop.f32.mrf.mxu2 }
 0x175   :  { %v1056_v30 = vmax.f32 %v992_v25, 0.0  ;;  %v1151_v32 = vpack.c.bf16 %v1087_v29, %v1087_v29  ;;  %v880_v33 = vadd.f32 %v879_v13, %v710_v5 }
 0x176   :  { %v632_v34 = vpop.f32.mrf.mxu0 }
 0x177   :  { %v1120_v12 = vpack.c.bf16 %v1056_v30, %v1056_v30  ;;  %v802_v36 = vadd.f32 %v801_v59, %v632_v34  ;;  %1216 = vst.msk [vmem:[%s2582_s6 + $0xe4] sm:$0xf] %vm1158_vm3, %v1151_v32  ;;  %v956_v37 = vmul.f32 %v2478_v43, %v880_v33 }
 0x179   :  { %1185 = vst.msk [vmem:[%s2582_s6 + $0x68] sm:$0xf] %vm1158_vm3, %v1120_v12  ;;  %v925_v10 = vmul.f32 %v2478_v43, %v802_v36  ;;  %v1024_v38 = vadd.f32 %v2496_v2, %v956_v37 }
 0x17b   :  { %v993_v62 = vadd.f32 %v2496_v2, %v925_v10  ;;  %v1088_v40 = vmax.f32 %v1024_v38, 0.0 }
 0x17c   :  { %v809_v39 = vpop.f32.mrf.mxu1  ;;  %v712_v41 = vpop.f32.mrf.mxu2 }
 0x17d   :  { %v1057_v61 = vmax.f32 %v993_v62, 0.0  ;;  %v1152_v45 = vpack.c.bf16 %v1088_v40, %v1088_v40  ;;  %v882_v46 = vadd.f32 %v881_v31, %v712_v41 }
 0x17e   :  { %v635_v47 = vpop.f32.mrf.mxu0 }
 0x17f   :  { %v1121_v48 = vpack.c.bf16 %v1057_v61, %v1057_v61  ;;  %v805_v50 = vadd.f32 %v804_v11, %v635_v47  ;;  %1217 = vst.msk [vmem:[%s2582_s6 + $0xe8] sm:$0xf] %vm1158_vm3, %v1152_v45  ;;  %v957_v51 = vmul.f32 %v2478_v43, %v882_v46  ;;  %v891_v45 = vpop.f32.mrf.mxu3 }
 0x181   :  { %1186 = vst.msk [vmem:[%s2582_s6 + $0x6c] sm:$0xf] %vm1158_vm3, %v1121_v48  ;;  %v926_v52 = vmul.f32 %v2478_v43, %v805_v50  ;;  %v1025_v54 = vadd.f32 %v2496_v2, %v957_v51 }
 0x183   :  { %v994_v26 = vadd.f32 %v2496_v2, %v926_v52  ;;  %v1089_v56 = vmax.f32 %v1025_v54, 0.0 }
 0x184   :  { %v811_v55 = vpop.f32.mrf.mxu1  ;;  %v715_v20 = vpop.f32.mrf.mxu2 }
 0x185   :  { %v1058_v57 = vmax.f32 %v994_v26, 0.0  ;;  %v1153_v58 = vpack.c.bf16 %v1089_v56, %v1089_v56  ;;  %v885_v59 = vadd.f32 %v884_v49, %v715_v20 }
 0x186   :  { %v637_v23 = vpop.f32.mrf.mxu0 }
 0x187   :  { %v1122_v28 = vpack.c.bf16 %v1058_v57, %v1058_v57  ;;  %v807_v60 = vadd.f32 %v806_v27, %v637_v23  ;;  %1218 = vst.msk [vmem:[%s2582_s6 + $0xec] sm:$0xf] %vm1158_vm3, %v1153_v58  ;;  %v958_v63 = vmul.f32 %v2478_v43, %v885_v59 }
 0x189   :  { %1187 = vst.msk [vmem:[%s2582_s6 + $0x70] sm:$0xf] %vm1158_vm3, %v1122_v28  ;;  %v927_v3 = vmul.f32 %v2478_v43, %v807_v60  ;;  %v1026_v4 = vadd.f32 %v2496_v2, %v958_v63 }
 0x18b   :  { %v995_v53 = vadd.f32 %v2496_v2, %v927_v3  ;;  %v1090_v7 = vmax.f32 %v1026_v4, 0.0 }
 0x18c   :  { %v814_v6 = vpop.f32.mrf.mxu1  ;;  %v717_v11 = vpop.f32.mrf.mxu2 }
 0x18d   :  { %v815_v8 = vadd.f32 %v814_v6, %v1971_v16  ;;  %v1059_v9 = vmax.f32 %v995_v53, 0.0  ;;  %v1154_v13 = vpack.c.bf16 %v1090_v7, %v1090_v7  ;;  %v887_v44 = vadd.f32 %v886_v1, %v717_v11 }
 0x18e   :  { %v640_v42 = vpop.f32.mrf.mxu0 }
 0x18f   :  { %v930_v14 = vmul.f32 %v2478_v43, %v815_v8  ;;  %v1123_v17 = vpack.c.bf16 %v1059_v9, %v1059_v9  ;;  %v810_v18 = vadd.f32 %v809_v39, %v640_v42  ;;  %1219 = vst.msk [vmem:[%s2582_s6 + $0xf0] sm:$0xf] %vm1158_vm3, %v1154_v13  ;;  %v959_v19 = vmul.f32 %v2478_v43, %v887_v44 }
 0x191   :  { %v998_v0 = vadd.f32 %v2496_v2, %v930_v14  ;;  %1188 = vst.msk [vmem:[%s2582_s6 + $0x74] sm:$0xf] %vm1158_vm3, %v1123_v17  ;;  %v928_v16 = vmul.f32 %v2478_v43, %v810_v18  ;;  %v1027_v21 = vadd.f32 %v2496_v2, %v959_v19 }
 0x193   :  { %v1062_v15 = vmax.f32 %v998_v0, 0.0  ;;  %v996_v24 = vadd.f32 %v2496_v2, %v928_v16  ;;  %v1091_v29 = vmax.f32 %v1027_v21, 0.0 }
 0x194   :  { %v816_v25 = vpop.f32.mrf.mxu1  ;;  %v720_v31 = vpop.f32.mrf.mxu2 }
 0x195   :  { %v1126_v27 = vpack.c.bf16 %v1062_v15, %v1062_v15  ;;  %v817_v30 = vadd.f32 %v816_v25, %v2005_v35  ;;  %v1060_v5 = vmax.f32 %v996_v24, 0.0  ;;  %v1155_v32 = vpack.c.bf16 %v1091_v29, %v1091_v29 }
 0x196   :  { %v890_v34 = vadd.f32 %v889_v22, %v720_v31  ;;  %v642_v12 = vpop.f32.mrf.mxu0 }
 0x197   :  { %1191 = vst.msk [vmem:[%s2582_s6 + $0x80] sm:$0xf] %vm1158_vm3, %v1126_v27  ;;  %v931_v33 = vmul.f32 %v2478_v43, %v817_v30  ;;  %v1124_v36 = vpack.c.bf16 %v1060_v5, %v1060_v5  ;;  %v812_v37 = vadd.f32 %v811_v55, %v642_v12 }
 0x198   :  { %1220 = vst.msk [vmem:[%s2582_s6 + $0xf4] sm:$0xf] %vm1158_vm3, %v1155_v32  ;;  %v960_v10 = vmul.f32 %v2478_v43, %v890_v34 }
 0x199   :  { %v999_v35 = vadd.f32 %v2496_v2, %v931_v33  ;;  %1189 = vst.msk [vmem:[%s2582_s6 + $0x78] sm:$0xf] %vm1158_vm3, %v1124_v36  ;;  %v929_v38 = vmul.f32 %v2478_v43, %v812_v37 }
 0x19a   :  { %v1028_v39 = vadd.f32 %v2496_v2, %v960_v10 }
 0x19b   :  { %v1063_v62 = vmax.f32 %v999_v35, 0.0  ;;  %v997_v40 = vadd.f32 %v2496_v2, %v929_v38 }
 0x19c   :  { %v1092_v41 = vmax.f32 %v1028_v39, 0.0  ;;  %v722_v47 = vpop.f32.mrf.mxu2 }
 0x19d   :  { %v1127_v61 = vpack.c.bf16 %v1063_v62, %v1063_v62  ;;  %v1061_v46 = vmax.f32 %v997_v40, 0.0  ;;  %v892_v49 = vadd.f32 %v891_v45, %v722_v47 }
 0x19e   :  { %v1156_v48 = vpack.c.bf16 %v1092_v41, %v1092_v41 }
 0x19f   :  { %1192 = vst.msk [vmem:[%s2582_s6 + $0x84] sm:$0xf] %vm1158_vm3, %v1127_v61  ;;  %v1125_v50 = vpack.c.bf16 %v1061_v46, %v1061_v46  ;;  %v961_v51 = vmul.f32 %v2478_v43, %v892_v49 }
 0x1a0   :  { %1221 = vst.msk [vmem:[%s2582_s6 + $0xf8] sm:$0xf] %vm1158_vm3, %v1156_v48 }
 0x1a1   :  { %1190 = vst.msk [vmem:[%s2582_s6 + $0x7c] sm:$0xf] %vm1158_vm3, %v1125_v50  ;;  %v1029_v52 = vadd.f32 %v2496_v2, %v961_v51 }
 0x1a3   :  { %v1093_v54 = vmax.f32 %v1029_v52, 0.0 }
 0x1a5   :  { %v1157_v26 = vpack.c.bf16 %v1093_v54, %v1093_v54 }
 0x1a7   :  { %1222 = vst.msk [vmem:[%s2582_s6 + $0xfc] sm:$0xf] %vm1158_vm3, %v1157_v26 }

// kernel: densenet_forward.16
= control target key start
LH: loop header
LB: loop body
LE: loop exit
PB: predicated region body
PF: predicated region fallthrough
CT: control target
= control target key end

     0   :  { %vm204_vm0 = vcmask 261120   ;;  %vm350_vm1 = vcmask 125952   ;;  %s677_s1 = inlined_call_operand.vmem [shape: bf16[32,16], index: 1, kind: input, shape index: {}]   ;;  %s678_s0 = inlined_call_operand.vmem [shape: bf16[128,32], index: 0, kind: input, shape index: {}]   ;;  %s679_s2 = inlined_call_operand.vmem [shape: bf16[1,32], index: 2, kind: input, shape index: {}]   ;;  %s680_s3 = inlined_call_operand.vmem [shape: bf16[1,32], index: 3, kind: input, shape index: {}]   ;;  %s681_s4 = inlined_call_operand.vmem [shape: f32[1,16], index: 4, kind: input, shape index: {}]   ;;  %s682_s5 = inlined_call_operand.vmem [shape: f32[1,16], index: 5, kind: input, shape index: {}]   ;;  %s683_s6 = inlined_call_operand.vmem [shape: bf16[128,16], index: 6, kind: output, shape index: {}]  }
   0x1   :  { %v388_v0 = vld [vmem:[%s677_s1 + $0x8] sm:$0xff]  ;;  %v387_v1 = vld [vmem:[%s677_s1] sm:$0xff]  ;;  %v422_v5 = vld [vmem:[%s678_s0 + $0x10] sm:$0xff]  }
   0x2   :  { %v390_v2 = vld [vmem:[%s678_s0] sm:$0xff]   ;;  %235 = vmatpush.bf16.msra.mxu0 %v388_v0  ;;  %428 = vmatpush.bf16.msra.mxu1 %v388_v0  ;;  %v426_v9 = vld [vmem:[%s678_s0 + $0x30] sm:$0xff]   ;;  %v498_v10 = vld [vmem:[%s678_s0 + $0x8] sm:$0xff]   ;;  %v399_v13 = vunpack.c.l.bf16 %v422_v5  ;;  %v400_v14 = vunpack.c.h.bf16 %v422_v5 }
   0x3   :  { %v40_v3 = vld [vmem:[%s679_s2] sm:$0x1]  ;;  %429 = vmatpush.bf16.msra.mxu2 %v388_v0  ;;  %430 = vmatpush.bf16.msra.mxu3 %v388_v0  ;;  %v391_v11 = vunpack.c.l.bf16 %v390_v2  ;;  %v392_v12 = vunpack.c.h.bf16 %v390_v2  ;;  %v503_v15 = vld [vmem:[%s678_s0 + $0x18] sm:$0xff]   ;;  %v508_v16 = vld [vmem:[%s678_s0 + $0x28] sm:$0xff]   ;;  %v415_v22 = vunpack.c.l.bf16 %v426_v9  ;;  %v416_v23 = vunpack.c.h.bf16 %v426_v9 }
   0x4   :  { %v94_v4 = vld [vmem:[%s680_s3] sm:$0x1]  ;;  %v42_v6 = vpack.i.b16 %v40_v3, %v40_v3  ;;  %v513_v17 = vld [vmem:[%s678_s0 + $0x38] sm:$0xff]   ;;  %v395_v24 = vunpack.c.l.bf16 %v498_v10  ;;  %v396_v25 = vunpack.c.h.bf16 %v498_v10  ;;  %v403_v27 = vunpack.c.l.bf16 %v503_v15 }
   0x5   :  { %v96_v7 = vpack.i.b16 %v94_v4, %v94_v4  ;;  %v424_v8 = vld [vmem:[%s678_s0 + $0x20] sm:$0xff]   ;;  %v404_v28 = vunpack.c.h.bf16 %v503_v15  ;;  %v411_v29 = vunpack.c.l.bf16 %v508_v16  ;;  %v412_v31 = vunpack.c.h.bf16 %v508_v16 }
   0x6   :  { %v44_v18 = vperm.slane %v42_v6, 0  ;;  %v407_v20 = vunpack.c.l.bf16 %v424_v8  ;;  %v408_v21 = vunpack.c.h.bf16 %v424_v8  ;;  %236 = vmatpush.bf16.msra.mxu0 %v387_v1  ;;  %431 = vmatpush.bf16.msra.mxu1 %v387_v1  ;;  %v419_v32 = vunpack.c.l.bf16 %v513_v17 }
   0x7   :  { %v98_v19 = vperm.slane %v96_v7, 0  ;;  %432 = vmatpush.bf16.msra.mxu2 %v387_v1  ;;  %433 = vmatpush.bf16.msra.mxu3 %v387_v1  ;;  %v420_v33 = vunpack.c.h.bf16 %v513_v17 }
   0x8   :  { %v517_v26 = vunpack.c.l.bf16 %v44_v18 }
   0x9   :  { %v522_v30 = vunpack.c.l.bf16 %v98_v19 }
   0xa   :  { %v62_v34 = vmul.f32 %v391_v11, %v517_v26  ;;  %v63_v35 = vmul.f32 %v392_v12, %v517_v26  ;;  %v66_v36 = vmul.f32 %v399_v13, %v517_v26  ;;  %v67_v37 = vmul.f32 %v400_v14, %v517_v26 }
   0xb   :  { %v70_v38 = vmul.f32 %v407_v20, %v517_v26  ;;  %v71_v39 = vmul.f32 %v408_v21, %v517_v26  ;;  %v74_v40 = vmul.f32 %v415_v22, %v517_v26  ;;  %v75_v41 = vmul.f32 %v416_v23, %v517_v26 }
   0xc   :  { %v78_v42 = vpack.c.bf16 %v62_v34, %v62_v34  ;;  %v79_v43 = vpack.c.bf16 %v63_v35, %v63_v35  ;;  %v82_v44 = vpack.c.bf16 %v66_v36, %v66_v36  ;;  %v83_v45 = vpack.c.bf16 %v67_v37, %v67_v37 }
   0xd   :  { %v86_v46 = vpack.c.bf16 %v70_v38, %v70_v38  ;;  %v87_v47 = vpack.c.bf16 %v71_v39, %v71_v39  ;;  %v90_v48 = vpack.c.bf16 %v74_v40, %v74_v40  ;;  %v91_v49 = vpack.c.bf16 %v75_v41, %v75_v41 }
   0xe   :  { %v99_v50 = vunpack.c.l.bf16 %v78_v42  ;;  %v100_v51 = vunpack.c.l.bf16 %v79_v43  ;;  %v103_v52 = vunpack.c.l.bf16 %v82_v44  ;;  %v104_v53 = vunpack.c.l.bf16 %v83_v45 }
   0xf   :  { %v107_v54 = vunpack.c.l.bf16 %v86_v46  ;;  %v108_v55 = vunpack.c.l.bf16 %v87_v47  ;;  %v111_v56 = vunpack.c.l.bf16 %v90_v48  ;;  %v112_v57 = vunpack.c.l.bf16 %v91_v49 }
  0x10   :  { %v116_v58 = vadd.f32 %v522_v30, %v99_v50  ;;  %v117_v59 = vadd.f32 %v522_v30, %v100_v51  ;;  %v120_v60 = vadd.f32 %v522_v30, %v103_v52  ;;  %v121_v61 = vadd.f32 %v522_v30, %v104_v53 }
  0x11   :  { %v124_v62 = vadd.f32 %v522_v30, %v107_v54  ;;  %v125_v63 = vadd.f32 %v522_v30, %v108_v55  ;;  %v128_v0 = vadd.f32 %v522_v30, %v111_v56  ;;  %v129_v1 = vadd.f32 %v522_v30, %v112_v57 }
  0x12   :  { %v164_v2 = vmax.f32 %v116_v58, 0.0  ;;  %v165_v3 = vmax.f32 %v117_v59, 0.0  ;;  %v168_v4 = vmax.f32 %v120_v60, 0.0  ;;  %v169_v5 = vmax.f32 %v121_v61, 0.0  ;;  %v574_v59 = vld [vmem:[%s681_s4] ss:$0 sm:$0xff] }
  0x13   :  { %v172_v6 = vmax.f32 %v124_v62, 0.0  ;;  %v173_v7 = vmax.f32 %v125_v63, 0.0  ;;  %v176_v8 = vmax.f32 %v128_v0, 0.0  ;;  %v177_v9 = vmax.f32 %v129_v1, 0.0 }
  0x14   :  { %v180_v10 = vpack.c.bf16 %v165_v3, %v164_v2  ;;  %v182_v11 = vpack.c.bf16 %v169_v5, %v168_v4  ;;  %v64_v12 = vmul.f32 %v395_v24, %v517_v26  ;;  %v65_v13 = vmul.f32 %v396_v25, %v517_v26 }
  0x15   :  { %v184_v14 = vpack.c.bf16 %v173_v7, %v172_v6  ;;  %v186_v15 = vpack.c.bf16 %v177_v9, %v176_v8  ;;  %v68_v16 = vmul.f32 %v403_v27, %v517_v26  ;;  %v69_v18 = vmul.f32 %v404_v28, %v517_v26 }
  0x16   :  { %379 = vmatmul.msk.bf16.vlgmr.msra.gmra.mxu0 %vm204_vm0, %v180_v10  ;;  %381 = vmatmul.msk.bf16.vlgmr.msra.gmra.mxu1 %vm204_vm0, %v182_v11  ;;  %v80_v19 = vpack.c.bf16 %v64_v12, %v64_v12  ;;  %v81_v20 = vpack.c.bf16 %v65_v13, %v65_v13  ;;  %v72_v21 = vmul.f32 %v411_v29, %v517_v26 }
  0x17   :  { %383 = vmatmul.msk.bf16.vlgmr.msra.gmra.mxu2 %vm204_vm0, %v184_v14  ;;  %385 = vmatmul.msk.bf16.vlgmr.msra.gmra.mxu3 %vm204_vm0, %v186_v15  ;;  %v84_v22 = vpack.c.bf16 %v68_v16, %v68_v16  ;;  %v85_v23 = vpack.c.bf16 %v69_v18, %v69_v18  ;;  %v73_v24 = vmul.f32 %v412_v31, %v517_v26 }
  0x18   :  { %v101_v25 = vunpack.c.l.bf16 %v80_v19  ;;  %v102_v27 = vunpack.c.l.bf16 %v81_v20  ;;  %v88_v34 = vpack.c.bf16 %v72_v21, %v72_v21  ;;  %v76_v28 = vmul.f32 %v419_v32, %v517_v26 }
  0x19   :  { %v105_v35 = vunpack.c.l.bf16 %v84_v22  ;;  %v106_v36 = vunpack.c.l.bf16 %v85_v23  ;;  %v89_v37 = vpack.c.bf16 %v73_v24, %v73_v24  ;;  %v77_v29 = vmul.f32 %v420_v33, %v517_v26 }
  0x1a   :  { %v118_v38 = vadd.f32 %v522_v30, %v101_v25  ;;  %v119_v39 = vadd.f32 %v522_v30, %v102_v27  ;;  %v109_v40 = vunpack.c.l.bf16 %v88_v34  ;;  %v92_v31 = vpack.c.bf16 %v76_v28, %v76_v28 }
  0x1b   :  { %v122_v41 = vadd.f32 %v522_v30, %v105_v35  ;;  %v123_v42 = vadd.f32 %v522_v30, %v106_v36  ;;  %v110_v43 = vunpack.c.l.bf16 %v89_v37  ;;  %v93_v44 = vpack.c.bf16 %v77_v29, %v77_v29 }
  0x1c   :  { %v126_v32 = vadd.f32 %v522_v30, %v109_v40  ;;  %v113_v45 = vunpack.c.l.bf16 %v92_v31  ;;  %v166_v46 = vmax.f32 %v118_v38, 0.0  ;;  %v167_v26 = vmax.f32 %v119_v39, 0.0 }
  0x1d   :  { %v127_v47 = vadd.f32 %v522_v30, %v110_v43  ;;  %v114_v17 = vunpack.c.l.bf16 %v93_v44  ;;  %v170_v33 = vmax.f32 %v122_v41, 0.0  ;;  %v171_v48 = vmax.f32 %v123_v42, 0.0 }
  0x1e   :  { %v130_v49 = vadd.f32 %v522_v30, %v113_v45  ;;  %v174_v50 = vmax.f32 %v126_v32, 0.0  ;;  %v181_v55 = vpack.c.bf16 %v167_v26, %v166_v46 }
  0x1f   :  { %v175_v51 = vmax.f32 %v127_v47, 0.0  ;;  %v131_v52 = vadd.f32 %v522_v30, %v114_v17  ;;  %v183_v56 = vpack.c.bf16 %v171_v48, %v170_v33  ;;  %v579_v30 = vld [vmem:[%s682_s5] ss:$0 sm:$0xff] }
  0x20   :  { %v178_v53 = vmax.f32 %v130_v49, 0.0 }
  0x21   :  { %v179_v54 = vmax.f32 %v131_v52, 0.0  ;;  %v185_v57 = vpack.c.bf16 %v175_v51, %v174_v50 }
  0x23   :  { %v187_v58 = vpack.c.bf16 %v179_v54, %v178_v53 }
  0x26   :  { %380 = vmatmul.msk.bf16.gmra.mxu0 %vm204_vm0, %v181_v55  ;;  %382 = vmatmul.msk.bf16.gmra.mxu1 %vm204_vm0, %v183_v56 }
  0x27   :  { %384 = vmatmul.msk.bf16.gmra.mxu2 %vm204_vm0, %v185_v57  ;;  %386 = vmatmul.msk.bf16.gmra.mxu3 %vm204_vm0, %v187_v58 }
  0x93   :  { %v238_v60 = vpop.f32.mrf.mxu0  ;;  %v248_v61 = vpop.f32.mrf.mxu1 }
  0x94   :  { %v282_v62 = vmul.f32 %v574_v59, %v238_v60  ;;  %v286_v63 = vmul.f32 %v574_v59, %v248_v61 }
  0x96   :  { %v302_v0 = vadd.f32 %v579_v30, %v282_v62  ;;  %v306_v1 = vadd.f32 %v579_v30, %v286_v63 }
  0x98   :  { %v318_v2 = vmax.f32 %v302_v0, 0.0  ;;  %v322_v3 = vmax.f32 %v306_v1, 0.0 }
  0x9a   :  { %v334_v4 = vpack.c.bf16 %v318_v2, %v318_v2  ;;  %v338_v5 = vpack.c.bf16 %v322_v3, %v322_v3  ;;  %v258_v6 = vpop.f32.mrf.mxu2  ;;  %v268_v7 = vpop.f32.mrf.mxu3 }
  0x9b   :  { %v290_v8 = vmul.f32 %v574_v59, %v258_v6  ;;  %v294_v9 = vmul.f32 %v574_v59, %v268_v7  ;;  %v240_v10 = vpop.f32.mrf.mxu0  ;;  %v250_v11 = vpop.f32.mrf.mxu1 }
  0x9c   :  { %351 = vst.msk [vmem:[%s683_s6] sm:$0xf] %vm350_vm1, %v334_v4  ;;  %v283_v12 = vmul.f32 %v574_v59, %v240_v10  ;;  %v287_v13 = vmul.f32 %v574_v59, %v250_v11 }
  0x9d   :  { %355 = vst.msk [vmem:[%s683_s6 + $0x10] sm:$0xf] %vm350_vm1, %v338_v5  ;;  %v310_v14 = vadd.f32 %v579_v30, %v290_v8  ;;  %v314_v15 = vadd.f32 %v579_v30, %v294_v9 }
  0x9e   :  { %v303_v16 = vadd.f32 %v579_v30, %v283_v12  ;;  %v307_v18 = vadd.f32 %v579_v30, %v287_v13 }
  0x9f   :  { %v326_v19 = vmax.f32 %v310_v14, 0.0  ;;  %v330_v20 = vmax.f32 %v314_v15, 0.0 }
  0xa0   :  { %v319_v21 = vmax.f32 %v303_v16, 0.0  ;;  %v323_v22 = vmax.f32 %v307_v18, 0.0 }
  0xa1   :  { %v342_v23 = vpack.c.bf16 %v326_v19, %v326_v19  ;;  %v346_v24 = vpack.c.bf16 %v330_v20, %v330_v20 }
  0xa2   :  { %v335_v25 = vpack.c.bf16 %v319_v21, %v319_v21  ;;  %v339_v27 = vpack.c.bf16 %v323_v22, %v323_v22  ;;  %v260_v34 = vpop.f32.mrf.mxu2  ;;  %v270_v28 = vpop.f32.mrf.mxu3 }
  0xa3   :  { %359 = vst.msk [vmem:[%s683_s6 + $0x20] sm:$0xf] %vm350_vm1, %v342_v23  ;;  %v291_v35 = vmul.f32 %v574_v59, %v260_v34  ;;  %v295_v36 = vmul.f32 %v574_v59, %v270_v28  ;;  %v243_v37 = vpop.f32.mrf.mxu0  ;;  %v253_v29 = vpop.f32.mrf.mxu1 }
  0xa4   :  { %363 = vst.msk [vmem:[%s683_s6 + $0x30] sm:$0xf] %vm350_vm1, %v346_v24  ;;  %v284_v38 = vmul.f32 %v574_v59, %v243_v37  ;;  %v288_v39 = vmul.f32 %v574_v59, %v253_v29 }
  0xa5   :  { %352 = vst.msk [vmem:[%s683_s6 + $0x4] sm:$0xf] %vm350_vm1, %v335_v25  ;;  %v311_v40 = vadd.f32 %v579_v30, %v291_v35  ;;  %v315_v31 = vadd.f32 %v579_v30, %v295_v36 }
  0xa6   :  { %356 = vst.msk [vmem:[%s683_s6 + $0x14] sm:$0xf] %vm350_vm1, %v339_v27  ;;  %v304_v41 = vadd.f32 %v579_v30, %v284_v38  ;;  %v308_v42 = vadd.f32 %v579_v30, %v288_v39 }
  0xa7   :  { %v327_v43 = vmax.f32 %v311_v40, 0.0  ;;  %v331_v44 = vmax.f32 %v315_v31, 0.0 }
  0xa8   :  { %v320_v32 = vmax.f32 %v304_v41, 0.0  ;;  %v324_v45 = vmax.f32 %v308_v42, 0.0 }
  0xa9   :  { %v343_v46 = vpack.c.bf16 %v327_v43, %v327_v43  ;;  %v347_v47 = vpack.c.bf16 %v331_v44, %v331_v44 }
  0xaa   :  { %v336_v17 = vpack.c.bf16 %v320_v32, %v320_v32  ;;  %v340_v26 = vpack.c.bf16 %v324_v45, %v324_v45  ;;  %v263_v33 = vpop.f32.mrf.mxu2  ;;  %v273_v48 = vpop.f32.mrf.mxu3 }
  0xab   :  { %360 = vst.msk [vmem:[%s683_s6 + $0x24] sm:$0xf] %vm350_vm1, %v343_v46  ;;  %v292_v49 = vmul.f32 %v574_v59, %v263_v33  ;;  %v296_v50 = vmul.f32 %v574_v59, %v273_v48  ;;  %v245_v51 = vpop.f32.mrf.mxu0  ;;  %v255_v52 = vpop.f32.mrf.mxu1 }
  0xac   :  { %364 = vst.msk [vmem:[%s683_s6 + $0x34] sm:$0xf] %vm350_vm1, %v347_v47  ;;  %v285_v53 = vmul.f32 %v574_v59, %v245_v51  ;;  %v289_v54 = vmul.f32 %v574_v59, %v255_v52 }
  0xad   :  { %353 = vst.msk [vmem:[%s683_s6 + $0x8] sm:$0xf] %vm350_vm1, %v336_v17  ;;  %v312_v55 = vadd.f32 %v579_v30, %v292_v49  ;;  %v316_v56 = vadd.f32 %v579_v30, %v296_v50 }
  0xae   :  { %357 = vst.msk [vmem:[%s683_s6 + $0x18] sm:$0xf] %vm350_vm1, %v340_v26  ;;  %v305_v57 = vadd.f32 %v579_v30, %v285_v53  ;;  %v309_v58 = vadd.f32 %v579_v30, %v289_v54 }
  0xaf   :  { %v328_v60 = vmax.f32 %v312_v55, 0.0  ;;  %v332_v61 = vmax.f32 %v316_v56, 0.0 }
  0xb0   :  { %v321_v62 = vmax.f32 %v305_v57, 0.0  ;;  %v325_v63 = vmax.f32 %v309_v58, 0.0 }
  0xb1   :  { %v344_v0 = vpack.c.bf16 %v328_v60, %v328_v60  ;;  %v348_v1 = vpack.c.bf16 %v332_v61, %v332_v61 }
  0xb2   :  { %v337_v2 = vpack.c.bf16 %v321_v62, %v321_v62  ;;  %v341_v3 = vpack.c.bf16 %v325_v63, %v325_v63  ;;  %v265_v4 = vpop.f32.mrf.mxu2  ;;  %v275_v5 = vpop.f32.mrf.mxu3 }
  0xb3   :  { %361 = vst.msk [vmem:[%s683_s6 + $0x28] sm:$0xf] %vm350_vm1, %v344_v0  ;;  %v293_v6 = vmul.f32 %v574_v59, %v265_v4  ;;  %v297_v7 = vmul.f32 %v574_v59, %v275_v5 }
  0xb4   :  { %365 = vst.msk [vmem:[%s683_s6 + $0x38] sm:$0xf] %vm350_vm1, %v348_v1 }
  0xb5   :  { %354 = vst.msk [vmem:[%s683_s6 + $0xc] sm:$0xf] %vm350_vm1, %v337_v2  ;;  %v313_v8 = vadd.f32 %v579_v30, %v293_v6  ;;  %v317_v9 = vadd.f32 %v579_v30, %v297_v7 }
  0xb6   :  { %358 = vst.msk [vmem:[%s683_s6 + $0x1c] sm:$0xf] %vm350_vm1, %v341_v3 }
  0xb7   :  { %v329_v59 = vmax.f32 %v313_v8, 0.0  ;;  %v333_v10 = vmax.f32 %v317_v9, 0.0 }
  0xb9   :  { %v345_v11 = vpack.c.bf16 %v329_v59, %v329_v59  ;;  %v349_v12 = vpack.c.bf16 %v333_v10, %v333_v10 }
  0xbb   :  { %362 = vst.msk [vmem:[%s683_s6 + $0x2c] sm:$0xf] %vm350_vm1, %v345_v11 }
  0xbc   :  { %366 = vst.msk [vmem:[%s683_s6 + $0x3c] sm:$0xf] %vm350_vm1, %v349_v12 }

// kernel: densenet_forward.17
= control target key start
LH: loop header
LB: loop body
LE: loop exit
PB: predicated region body
PF: predicated region fallthrough
CT: control target
= control target key end

     0   :  { %s1722_s9 = smov 0   ;;  %s2149_s0 = inlined_call_operand.vmem [shape: bf16[2,10,10,16], index: 0, kind: input, shape index: {}]   ;;  %s2150_s1 = inlined_call_operand.vmem [shape: bf16[9,16,8], index: 1, kind: input, shape index: {}]   ;;  %s2151_s2 = inlined_call_operand.vmem [shape: bf16[2,8,8,8], index: 2, kind: output, shape index: {}]  }
   0x1 LB: > { %s1431_s10 = sadd.s32 4294967295, %s1705_s9   ;;  %p1435_p0 = scmp.ge.s32.totalorder %s1705_s9, 1  ;;  %s1705_s9 = sphi %s1722_s9, %s12_s9  }
   0x2   : > { %p112_p1 = scmp.lt.s32.totalorder %s1705_s9, 3 }
   0x4   : > { %p113_p2 = pnand %p1435_p0, %p112_p1 }
   0x5   : > { %p134_p3 = scmp.lt.s32.totalorder (!%p113_p2), %s1431_s10, 1 }
   0x6   : > { %116 = sbr.rel (%p113_p2) target bundleno = 315 (0x13b), region = 28 }
   0xb   : > { %v1671_v0 = vld [vmem:[%s2150_s1 + $0x8] sm:$0xff]  ;;  %v1672_v1 = vld [vmem:[%s2150_s1 + $0x10] sm:$0xff]  ;;  %s2157_s10 = smov (!%p134_p3, %s1431_s10), 1  ;;  %v1677_v2 = vld [vmem:[%s2150_s1 + $0x18] sm:$0xff]  ;;  %vm163_vm0 = vsmask.f32 3328 }
   0xc   : > { %1687 = vmatpush.bf16.msra.mxu1 %v1671_v0  ;;  %1688 = vmatpush.bf16.msra.mxu2 %v1671_v0  ;;  %s1690_s15 = smul.u32 80, %s2157_s10  ;;  %v1670_v3 = vld [vmem:[%s2150_s1] sm:$0xff]  ;;  %vm164_vm1 = vsmask.f32 7440  ;;  %vm299_vm2 = vcmask 130048   ;;  %vm432_vm4 = vcmask 1042432  }
   0xd   : > { %1689 = vmatpush.bf16.msra.mxu3 %v1671_v0  ;;  %319 = vmatpush.bf16.msra.mxu0 %v1671_v0  ;;  %v1678_v4 = vld [vmem:[%s2150_s1 + $0x20] sm:$0xff]  ;;  %vm1775_vm3 = vmor %vm163_vm0, %vm164_vm1  ;;  %vm433_vm5 = vcmask 1046532   ;;  %s1665_s5 = sshll.u32 %s2157_s10, 5  ;;  %vm1367_vm7 = vcmask 60416  }
   0xe   : > { %s1751_s24 = scalar_lea.vmem %s2149_s0, %s1690_s15  ;;  %vm1815_vm6 = vmor %vm432_vm4, %vm433_vm5  ;;  %s2108_s8 = scalar_lea.vmem %s2151_s2, %s1665_s5 }
   0xf   : > { %v147_v5 = vld [vmem:[%s1751_s24 + $0x10] sm:$0xf]  ;;  %v148_v6 = vld [vmem:[%s1751_s24 + $0x18] sm:$0xf]  ;;  %v1756_v7 = vld [vmem:[%s1751_s24 + $0x14] sm:$0x1] }
  0x10   : > { %507 = vmatpush.bf16.msrb.mxu2 %v1672_v1  ;;  %386 = vmatpush.bf16.msrb.mxu1 %v1670_v3  ;;  %v1759_v8 = vld [vmem:[%s1751_s24 + $0x1c] sm:$0x1]  ;;  %v195_v9 = vshrl.u32 %v147_v5, 16  ;;  %v198_v10 = vshll.u32 %v147_v5, 16  ;;  %v204_v11 = vshll.u32 %v1756_v7, 16  ;;  %v209_v12 = vshrl.u32 %v148_v6, 16 }
  0x11   : > { %594 = vmatpush.bf16.msrb.mxu3 %v1677_v2  ;;  %792 = vmatpush.bf16.msrb.mxu0 %v1678_v4  ;;  %v212_v13 = vshll.u32 %v148_v6, 16  ;;  %v218_v14 = vshll.u32 %v1759_v8, 16  ;;  %v149_v15 = vld [vmem:[%s1751_s24 + $0x20] sm:$0xf]  ;;  %v150_v16 = vld [vmem:[%s1751_s24 + $0x28] sm:$0xf] }
  0x12   : > { %v197_v17 = vrot.slane %v195_v9, 4  ;;  %v200_v18 = vrot.slane %v198_v10, 5  ;;  %v206_v19 = vrot.slane %v204_v11, 5  ;;  %v211_v20 = vrot.slane %v209_v12, 4  ;;  %v1766_v21 = vld [vmem:[%s1751_s24 + $0x24] sm:$0x1] }
  0x13   : > { %v214_v22 = vrot.slane %v212_v13, 5  ;;  %v220_v23 = vrot.slane %v218_v14, 5  ;;  %v1769_v24 = vld [vmem:[%s1751_s24 + $0x2c] sm:$0x1]  ;;  %v223_v25 = vshrl.u32 %v149_v15, 16  ;;  %v226_v26 = vshll.u32 %v149_v15, 16 }
  0x14   : > { %v201_v27 = vor.u32 %v200_v18, %v197_v17  ;;  %v232_v28 = vshll.u32 %v1766_v21, 16  ;;  %v237_v29 = vshrl.u32 %v150_v16, 16  ;;  %v240_v30 = vshll.u32 %v150_v16, 16  ;;  %v151_v31 = vld [vmem:[%s1751_s24 + $0x30] sm:$0xf] }
  0x15   : > { %v215_v33 = vor.u32 %v214_v22, %v211_v20  ;;  %v225_v34 = vrot.slane %v223_v25, 4  ;;  %v228_v35 = vrot.slane %v226_v26, 5  ;;  %v246_v36 = vshll.u32 %v1769_v24, 16  ;;  %v1781_v41 = vld [vmem:[%s1751_s24 + $0x34] sm:$0x1] }
  0x16   : > { %v202_v37 = vrot.slane %v201_v27, 4  ;;  %v234_v38 = vrot.slane %v232_v28, 5  ;;  %v239_v39 = vrot.slane %v237_v29, 4  ;;  %v242_v40 = vrot.slane %v240_v30, 5  ;;  %v152_v48 = vld [vmem:[%s1751_s24 + $0x38] sm:$0xf] }
  0x17   : > { %v216_v42 = vrot.slane %v215_v33, 4  ;;  %v229_v43 = vor.u32 %v228_v35, %v225_v34  ;;  %v248_v44 = vrot.slane %v246_v36, 5  ;;  %v251_v45 = vshrl.u32 %v151_v31, 16  ;;  %v1787_v49 = vld [vmem:[%s1751_s24 + $0x3c] sm:$0x1]  ;;  %v1684_v17 = vld [vmem:[%s2150_s1 + $0x30] sm:$0xff] }
  0x18   : > { %v207_v46 = vsel %vm1775_vm3, %v202_v37, %v206_v19  ;;  %v243_v47 = vor.u32 %v242_v40, %v239_v39  ;;  %v254_v50 = vshll.u32 %v151_v31, 16  ;;  %v260_v51 = vshll.u32 %v1781_v41, 16  ;;  %v145_v60 = vld [vmem:[%s1751_s24] sm:$0xf]  ;;  %v155_v1 = vld [vmem:[%s1751_s24 + $0x4] sm:$0x1] }
  0x19   : > { %v221_v52 = vsel %vm1775_vm3, %v216_v42, %v220_v23  ;;  %v283_v53 = vunpack.c.l.b16 %v207_v46  ;;  %v230_v54 = vrot.slane %v229_v43, 4  ;;  %v253_v55 = vrot.slane %v251_v45, 4  ;;  %v146_v6 = vld [vmem:[%s1751_s24 + $0x8] sm:$0xf]  ;;  %v156_v20 = vld [vmem:[%s1751_s24 + $0xc] sm:$0x1] }
  0x1a   : > { %v284_v56 = vunpack.c.l.b16 %v221_v52  ;;  %v244_v57 = vrot.slane %v243_v47, 4  ;;  %v256_v58 = vrot.slane %v254_v50, 5  ;;  %v262_v59 = vrot.slane %v260_v51, 5  ;;  %v408_v29 = vld [vmem:[%s1751_s24] sm:$0xe]  ;;  %v1679_v30 = vld [vmem:[%s2150_s1 + $0x28] sm:$0xff] }
  0x1b   : > { %v235_v61 = vsel %vm1775_vm3, %v230_v54, %v234_v38  ;;  %v265_v62 = vshrl.u32 %v152_v48, 16  ;;  %v268_v63 = vshll.u32 %v152_v48, 16  ;;  %v274_v0 = vshll.u32 %v1787_v49, 16  ;;  %v409_v36 = vld [vmem:[%s1751_s24 + $0x8] sm:$0xe] }
  0x1c   : > { %v290_v2 = vpack.c.b16 %v284_v56, %v283_v53  ;;  %v249_v3 = vsel %vm1775_vm3, %v244_v57, %v248_v44  ;;  %v285_v4 = vunpack.c.l.b16 %v235_v61  ;;  %v257_v5 = vor.u32 %v256_v58, %v253_v55  ;;  %v1525_v43 = vld [vmem:[%s1751_s24 + $0x8] sm:$0xf]  ;;  %v1527_v54 = vld [vmem:[%s1751_s24 + $0x10] sm:$0xf]  ;;  %v1685_v56 = vld [vmem:[%s2150_s1 + $0x38] sm:$0xff] }
  0x1d   : > { %v286_v9 = vunpack.c.l.b16 %v249_v3  ;;  %v267_v10 = vrot.slane %v265_v62, 4  ;;  %v270_v11 = vrot.slane %v268_v63, 5  ;;  %v276_v12 = vrot.slane %v274_v0, 5  ;;  %v1836_v61 = vld [vmem:[%s1751_s24 + $0x14] sm:$0x1] }
  0x1e   : > { %1446 = vmatmul.msk.bf16.vlgmr.msra.gmra.mxu1 %vm299_vm2, %v290_v2  ;;  %v258_v13 = vrot.slane %v257_v5, 4  ;;  %v167_v14 = vshrl.u32 %v145_v60, 16  ;;  %v170_v15 = vshll.u32 %v145_v60, 16  ;;  %v176_v16 = vshll.u32 %v155_v1, 16  ;;  %v1833_v60 = vld [vmem:[%s1751_s24 + $0xc] sm:$0x1] }
  0x1f   : > { %v291_v18 = vpack.c.b16 %v286_v9, %v285_v4  ;;  %v271_v19 = vor.u32 %v270_v11, %v267_v10  ;;  %v181_v22 = vshrl.u32 %v146_v6, 16  ;;  %v184_v23 = vshll.u32 %v146_v6, 16  ;;  %918 = vmatpush.bf16.msra.mxu1 %v1679_v30  ;;  %v1451_v0 = vld [vmem:[%s1751_s24] sm:$0xf] }
  0x20   : > { %v263_v25 = vsel %vm1775_vm3, %v258_v13, %v262_v59  ;;  %v169_v26 = vrot.slane %v167_v14, 4  ;;  %v172_v27 = vrot.slane %v170_v15, 5  ;;  %v178_v28 = vrot.slane %v176_v16, 5  ;;  %v1686_v13 = vld [vmem:[%s2150_s1 + $0x40] sm:$0xff] }
  0x21   : > { %1447 = vmatmul.msk.bf16.vlgmr.msra.gmra.mxu2 %vm299_vm2, %v291_v18  ;;  %v272_v31 = vrot.slane %v271_v19, 4  ;;  %v287_v33 = vunpack.c.l.b16 %v263_v25  ;;  %v183_v34 = vrot.slane %v181_v22, 4  ;;  %v186_v35 = vrot.slane %v184_v23, 5 }
  0x22   : > { %v173_v37 = vor.u32 %v172_v27, %v169_v26  ;;  %v190_v38 = vshll.u32 %v156_v20, 16  ;;  %v437_v39 = vrot.slane %v155_v1, 5  ;;  %v441_v40 = vrot.slane %v156_v20, 5  ;;  %1005 = vmatpush.bf16.msra.mxu2 %v1684_v17  ;;  %v1666_v1 = vld [vmem:[%s1751_s24 + $0x4] sm:$0xf0] }
  0x23   : > { %v277_v44 = vsel %vm1775_vm3, %v272_v31, %v276_v12  ;;  %v187_v45 = vor.u32 %v186_v35, %v183_v34  ;;  %v1473_v46 = vrot.slane %v408_v29, 9  ;;  %v1474_v51 = vrot.slane %v409_v36, 9  ;;  %v410_v26 = vld [vmem:[%s1751_s24 + $0x10] sm:$0xe]  ;;  %v1529_v27 = vld [vmem:[%s1751_s24 + $0x18] sm:$0xf] }
  0x24   : > { %v288_v47 = vunpack.c.l.b16 %v277_v44  ;;  %v174_v48 = vrot.slane %v173_v37, 4  ;;  %v192_v50 = vrot.slane %v190_v38, 5  ;;  %v641_v55 = vshrl.u32 %v1525_v43, 16  ;;  %v1531_v29 = vld [vmem:[%s1751_s24 + $0x20] sm:$0xf] }
  0x25   : > { %v188_v52 = vrot.slane %v187_v45, 4  ;;  %v438_v53 = vsel %vm1815_vm6, %v1473_v46, %v437_v39  ;;  %v442_v59 = vsel %vm1815_vm6, %v1474_v51, %v441_v40  ;;  %v644_v5 = vshll.u32 %v1525_v43, 16  ;;  %v411_v31 = vld [vmem:[%s1751_s24 + $0x18] sm:$0xe]  ;;  %v1503_v37 = vld [vmem:[%s1751_s24 + $0x8] sm:$0xf] }
  0x26   : > { %v292_v57 = vpack.c.b16 %v288_v47, %v287_v33  ;;  %v179_v58 = vsel %vm1775_vm3, %v174_v48, %v178_v28  ;;  %v470_v2 = vunpack.c.l.b16 %v438_v53  ;;  %v643_v4 = vrot.slane %v641_v55, 4  ;;  %v1673_v38 = vld [vmem:[%s1751_s24 + $0xc] sm:$0xf0]  ;;  %v1866_v51 = vld [vmem:[%s1751_s24 + $0x1c] sm:$0x1] }
  0x27   : > { %v193_v62 = vsel %vm1775_vm3, %v188_v52, %v192_v50  ;;  %v281_v63 = vunpack.c.l.b16 %v179_v58  ;;  %v655_v6 = vshrl.u32 %v1527_v54, 16  ;;  %v471_v9 = vunpack.c.l.b16 %v442_v59  ;;  %v1455_v58 = vld [vmem:[%s1751_s24 + $0x10] sm:$0xf] }
  0x28   : > { %1448 = vmatmul.msk.bf16.vlgmr.msra.gmra.mxu3 %vm299_vm2, %v292_v57  ;;  %v282_v3 = vunpack.c.l.b16 %v193_v62  ;;  %v650_v10 = vshll.u32 %v1833_v60, 16  ;;  %v658_v11 = vshll.u32 %v1527_v54, 16  ;;  %v664_v12 = vshll.u32 %v1836_v61, 16  ;;  %v1871_v57 = vld [vmem:[%s1751_s24 + $0x24] sm:$0x1] }
  0x29   : > { %1203 = vmatpush.bf16.msra.mxu3 %v1685_v56  ;;  %v1452_v15 = vor.u32 %v1666_v1, %v1451_v0  ;;  %v646_v16 = vrot.slane %v644_v5, 5  ;;  %v657_v17 = vrot.slane %v655_v6, 4  ;;  %v478_v20 = vpack.c.b16 %v471_v9, %v470_v2  ;;  %v1533_v6 = vld [vmem:[%s1751_s24 + $0x28] sm:$0xf] }
  0x2a   : > { %v289_v14 = vpack.c.b16 %v282_v3, %v281_v63  ;;  %v660_v18 = vrot.slane %v658_v11, 5  ;;  %v652_v22 = vrot.slane %v650_v10, 5  ;;  %v666_v25 = vrot.slane %v664_v12, 5 }
  0x2b   : > { %v647_v19 = vor.u32 %v646_v16, %v643_v4  ;;  %v1475_v33 = vrot.slane %v410_v26, 9  ;;  %v445_v34 = vrot.slane %v1756_v7, 5  ;;  %v669_v35 = vshrl.u32 %v1529_v27, 16 }
  0x2c   : > { %1445 = vmatmul.msk.bf16.vlgmr.msra.gmra.mxu0 %vm299_vm2, %v289_v14  ;;  %v661_v23 = vor.u32 %v660_v18, %v657_v17  ;;  %v672_v36 = vshll.u32 %v1529_v27, 16  ;;  %v683_v43 = vshrl.u32 %v1531_v29, 16  ;;  %v686_v44 = vshll.u32 %v1531_v29, 16  ;;  %v412_v14 = vld [vmem:[%s1751_s24 + $0x20] sm:$0xe] }
  0x2d   : > { %1329 = vmatpush.bf16.msra.mxu0 %v1686_v13  ;;  %v648_v28 = vrot.slane %v647_v19, 4  ;;  %v1476_v45 = vrot.slane %v411_v31, 9  ;;  %v449_v7 = vrot.slane %v1759_v8, 5  ;;  %v1504_v46 = vor.u32 %v1673_v38, %v1503_v37  ;;  %v1667_v8 = vld [vmem:[%s1751_s24 + $0x14] sm:$0xf0] }
  0x2e   : > { %1469 = vmatmul.msk.bf16.vlgmr.msrb.gmra.mxu1 %vm299_vm2, %v1452_v15  ;;  %v662_v30 = vrot.slane %v661_v23, 4  ;;  %v446_v50 = vsel %vm1815_vm6, %v1475_v33, %v445_v34  ;;  %v671_v52 = vrot.slane %v669_v35, 4  ;;  %v674_v53 = vrot.slane %v672_v36, 5  ;;  %v1535_v13 = vld [vmem:[%s1751_s24 + $0x30] sm:$0xf] }
  0x2f   : > { %v653_v39 = vsel %vm1775_vm3, %v648_v28, %v652_v22  ;;  %v685_v54 = vrot.slane %v683_v43, 4  ;;  %v688_v55 = vrot.slane %v686_v44, 5  ;;  %v450_v56 = vsel %vm1815_vm6, %v1476_v45, %v449_v7  ;;  %v413_v15 = vld [vmem:[%s1751_s24 + $0x28] sm:$0xe]  ;;  %v1507_v18 = vld [vmem:[%s1751_s24 + $0x18] sm:$0xf] }
  0x30   : > { %v667_v40 = vsel %vm1775_vm3, %v662_v30, %v666_v25  ;;  %v755_v47 = vunpack.c.l.b16 %v653_v39  ;;  %v472_v62 = vunpack.c.l.b16 %v446_v50  ;;  %v678_v63 = vshll.u32 %v1866_v51, 16  ;;  %v1674_v19 = vld [vmem:[%s1751_s24 + $0x1c] sm:$0xf0]  ;;  %v1894_v36 = vld [vmem:[%s1751_s24 + $0x2c] sm:$0x1] }
  0x31   : > { %1487 = vmatmul.msk.bf16.vlgmr.msrb.gmra.mxu2 %vm299_vm2, %v478_v20  ;;  %v756_v48 = vunpack.c.l.b16 %v667_v40  ;;  %v473_v0 = vunpack.c.l.b16 %v450_v56  ;;  %v675_v1 = vor.u32 %v674_v53, %v671_v52  ;;  %v689_v2 = vor.u32 %v688_v55, %v685_v54  ;;  %v1459_v43 = vld [vmem:[%s1751_s24 + $0x20] sm:$0xf]  ;;  %v414_v55 = vld [vmem:[%s1751_s24 + $0x30] sm:$0xe] }
  0x32   : > { %v692_v3 = vshll.u32 %v1871_v57, 16  ;;  %v1456_v4 = vor.u32 %v1667_v8, %v1455_v58  ;;  %v680_v5 = vrot.slane %v678_v63, 5  ;;  %v697_v16 = vshrl.u32 %v1533_v6, 16  ;;  %v1539_v63 = vld [vmem:[%s1751_s24 + $0x40] sm:$0xf] }
  0x33   : > { %v763_v59 = vpack.c.b16 %v756_v48, %v755_v47  ;;  %v479_v9 = vpack.c.b16 %v473_v0, %v472_v62  ;;  %v676_v10 = vrot.slane %v675_v1, 4  ;;  %v690_v11 = vrot.slane %v689_v2, 4  ;;  %v1537_v62 = vld [vmem:[%s1751_s24 + $0x38] sm:$0xf]  ;;  %v1511_v0 = vld [vmem:[%s1751_s24 + $0x28] sm:$0xf] }
  0x34   : > { %v694_v12 = vrot.slane %v692_v3, 5  ;;  %v700_v17 = vshll.u32 %v1533_v6, 16  ;;  %v711_v23 = vshrl.u32 %v1535_v13, 16  ;;  %v714_v25 = vshll.u32 %v1535_v13, 16  ;;  %v1675_v3 = vld [vmem:[%s1751_s24 + $0x2c] sm:$0xf0] }
  0x35   : > { %v681_v20 = vsel %vm1775_vm3, %v676_v10, %v680_v5  ;;  %v1477_v26 = vrot.slane %v412_v14, 9  ;;  %v453_v27 = vrot.slane %v1766_v21, 5  ;;  %v1478_v28 = vrot.slane %v413_v15, 9  ;;  %v1901_v21 = vld [vmem:[%s1751_s24 + $0x34] sm:$0x1] }
  0x36   : > { %v695_v22 = vsel %vm1775_vm3, %v690_v11, %v694_v12  ;;  %v457_v29 = vrot.slane %v1769_v24, 5  ;;  %v699_v30 = vrot.slane %v697_v16, 4  ;;  %v702_v31 = vrot.slane %v700_v17, 5  ;;  %v1668_v24 = vld [vmem:[%s1751_s24 + $0x24] sm:$0xf0] }
  0x37   : > { %v1508_v33 = vor.u32 %v1674_v19, %v1507_v18  ;;  %v757_v34 = vunpack.c.l.b16 %v681_v20  ;;  %v758_v35 = vunpack.c.l.b16 %v695_v22  ;;  %v713_v37 = vrot.slane %v711_v23, 4  ;;  %v1928_v17 = vld [vmem:[%s1751_s24 + $0x3c] sm:$0x1]  ;;  %v1931_v18 = vld [vmem:[%s1751_s24 + $0x44] sm:$0x1] }
  0x38   : > { %1521 = vmatmul.msk.bf16.vlgmr.msrb.gmra.mxu3 %vm299_vm2, %v1504_v46  ;;  %v716_v38 = vrot.slane %v714_v25, 5  ;;  %v454_v39 = vsel %vm1815_vm6, %v1477_v26, %v453_v27  ;;  %v458_v40 = vsel %vm1815_vm6, %v1478_v28, %v457_v29  ;;  %v703_v44 = vor.u32 %v702_v31, %v699_v30  ;;  %v1463_v25 = vld [vmem:[%s1751_s24 + $0x30] sm:$0xf]  ;;  %v1669_v26 = vld [vmem:[%s1751_s24 + $0x34] sm:$0xf0] }
  0x39   : > { %v706_v45 = vshll.u32 %v1894_v36, 16  ;;  %v764_v7 = vpack.c.b16 %v758_v35, %v757_v34  ;;  %v474_v46 = vunpack.c.l.b16 %v454_v39  ;;  %v475_v47 = vunpack.c.l.b16 %v458_v40 }
  0x3a   : > { %v717_v48 = vor.u32 %v716_v38, %v713_v37  ;;  %v720_v50 = vshll.u32 %v1901_v21, 16  ;;  %v1460_v52 = vor.u32 %v1668_v24, %v1459_v43  ;;  %v704_v53 = vrot.slane %v703_v44, 4  ;;  %v1613_v38 = vld [vmem:[%s1751_s24 + $0x18] sm:$0xf] }
  0x3b   : > { %v708_v54 = vrot.slane %v706_v45, 5  ;;  %v480_v56 = vpack.c.b16 %v475_v47, %v474_v46  ;;  %v461_v2 = vrot.slane %v1781_v41, 5  ;;  %v465_v6 = vrot.slane %v1787_v49, 5  ;;  %v1551_v45 = vld [vmem:[%s1751_s24 + $0x8] sm:$0xe] }
  0x3c   : > { %1547 = vmatmul.msk.bf16.vlgmr.msrb.gmra.mxu0 %vm299_vm2, %v763_v59  ;;  %v718_v58 = vrot.slane %v717_v48, 4  ;;  %v722_v8 = vrot.slane %v720_v50, 5  ;;  %v415_v59 = vld [vmem:[%s1751_s24 + $0x38] sm:$0xe]  ;;  %v728_v11 = vshll.u32 %v1537_v62, 16  ;;  %v739_v12 = vshrl.u32 %v1539_v63, 16 }
  0x3d   : > { %v709_v1 = vsel %vm1775_vm3, %v704_v53, %v708_v54  ;;  %v1480_v5 = vrot.slane %v415_v59, 9  ;;  %v742_v13 = vshll.u32 %v1539_v63, 16  ;;  %v1512_v14 = vor.u32 %v1675_v3, %v1511_v0  ;;  %v1515_v59 = vld [vmem:[%s1751_s24 + $0x38] sm:$0xf] }
  0x3e   : > { %1470 = vmatmul.msk.bf16.gmra.mxu1 %vm299_vm2, %v1456_v4  ;;  %v1479_v4 = vrot.slane %v414_v55, 9  ;;  %v723_v10 = vsel %vm1775_vm3, %v718_v58, %v722_v8  ;;  %v759_v41 = vunpack.c.l.b16 %v709_v1  ;;  %v730_v20 = vrot.slane %v728_v11, 5  ;;  %v1612_v8 = vld [vmem:[%s1751_s24 + $0x14] sm:$0x1] }
  0x3f   : > { %v760_v15 = vunpack.c.l.b16 %v723_v10  ;;  %v466_v49 = vsel %vm1815_vm6, %v1480_v5, %v465_v6  ;;  %v741_v22 = vrot.slane %v739_v12, 4  ;;  %v744_v23 = vrot.slane %v742_v13, 5 }
  0x40   : > { %v462_v16 = vsel %vm1815_vm6, %v1479_v4, %v461_v2  ;;  %v477_v29 = vunpack.c.l.b16 %v466_v49  ;;  %v734_v30 = vshll.u32 %v1928_v17, 16  ;;  %v748_v31 = vshll.u32 %v1931_v18, 16  ;;  %v1589_v49 = vld [vmem:[%s1751_s24 + $0x10] sm:$0xf] }
  0x41   : > { %1488 = vmatmul.msk.bf16.gmra.mxu2 %vm299_vm2, %v479_v9  ;;  %v725_v9 = vshrl.u32 %v1537_v62, 16  ;;  %v476_v27 = vunpack.c.l.b16 %v462_v16  ;;  %v765_v28 = vpack.c.b16 %v760_v15, %v759_v41  ;;  %v745_v35 = vor.u32 %v744_v23, %v741_v22  ;;  %v1676_v62 = vld [vmem:[%s1751_s24 + $0x3c] sm:$0xf0]  ;;  %v1680_v22 = vld [vmem:[%s1751_s24 + $0x14] sm:$0xf0] }
  0x42   : > { %v1464_v37 = vor.u32 %v1669_v26, %v1463_v25  ;;  %v736_v24 = vrot.slane %v734_v30, 5  ;;  %v750_v44 = vrot.slane %v748_v31, 5  ;;  %v1066_v48 = vshrl.u32 %v1613_v38, 16  ;;  %v1615_v26 = vld [vmem:[%s1751_s24 + $0x20] sm:$0xf] }
  0x43   : > { %v727_v19 = vrot.slane %v725_v9, 4  ;;  %v481_v43 = vpack.c.b16 %v477_v29, %v476_v27  ;;  %v746_v47 = vrot.slane %v745_v35, 4  ;;  %v1069_v50 = vshll.u32 %v1613_v38, 16  ;;  %v1553_v35 = vld [vmem:[%s1751_s24 + $0x18] sm:$0xe] }
  0x44   : > { %v852_v53 = vrot.slane %v1836_v61, 5  ;;  %v1559_v54 = vrot.slane %v1551_v45, 9  ;;  %v1614_v61 = vld [vmem:[%s1751_s24 + $0x1c] sm:$0x1]  ;;  %v1061_v5 = vshll.u32 %v1612_v8, 16  ;;  %v1516_v6 = vor.u32 %v1676_v62, %v1515_v59 }
  0x45   : > { %v731_v34 = vor.u32 %v730_v20, %v727_v19  ;;  %v751_v0 = vsel %vm1775_vm3, %v746_v47, %v750_v44  ;;  %v1071_v1 = vrot.slane %v1069_v50, 5  ;;  %v1075_v12 = vshll.u32 %v1614_v61, 16  ;;  %v1637_v19 = vld [vmem:[%s1751_s24 + $0x10] sm:$0xe]  ;;  %v1638_v20 = vld [vmem:[%s1751_s24 + $0x18] sm:$0xe] }
  0x46   : > { %v762_v10 = vunpack.c.l.b16 %v751_v0  ;;  %v1063_v15 = vrot.slane %v1061_v5, 5  ;;  %v1645_v30 = vrot.slane %v1637_v19, 9  ;;  %v1259_v31 = vrot.slane %v1612_v8, 5  ;;  %v1618_v59 = vld [vmem:[%s1751_s24 + $0x2c] sm:$0x1] }
  0x47   : > { %v732_v46 = vrot.slane %v731_v34, 4  ;;  %v1077_v25 = vrot.slane %v1075_v12, 5  ;;  %v1590_v34 = vor.u32 %v1680_v22, %v1589_v49  ;;  %v1080_v38 = vshrl.u32 %v1615_v26, 16  ;;  %v1593_v5 = vld [vmem:[%s1751_s24 + $0x20] sm:$0xf] }
  0x48   : > { %1522 = vmatmul.msk.bf16.gmra.mxu3 %vm299_vm2, %v1508_v33  ;;  %v1611_v33 = vld [vmem:[%s1751_s24 + $0x10] sm:$0xf]  ;;  %v1621_v49 = vld [vmem:[%s1751_s24 + $0x38] sm:$0xf] }
  0x49   : > { %v1052_v39 = vshrl.u32 %v1611_v33, 16  ;;  %v1055_v40 = vshll.u32 %v1611_v33, 16  ;;  %v737_v63 = vsel %vm1775_vm3, %v732_v46, %v736_v24  ;;  %v1646_v33 = vrot.slane %v1638_v20, 9  ;;  %v1619_v12 = vld [vmem:[%s1751_s24 + $0x30] sm:$0xf] }
  0x4a   : > { %v761_v9 = vunpack.c.l.b16 %v737_v63  ;;  %v856_v46 = vrot.slane %v1866_v51, 5  ;;  %v1108_v20 = vshrl.u32 %v1619_v12, 16  ;;  %v1111_v22 = vshll.u32 %v1619_v12, 16 }
  0x4b   : > { %v1057_v58 = vrot.slane %v1055_v40, 5 }
  0x4c   : > { %1548 = vmatmul.msk.bf16.gmra.mxu0 %vm299_vm2, %v764_v7  ;;  %v1552_v7 = vld [vmem:[%s1751_s24 + $0x10] sm:$0xe]  ;;  %v766_v16 = vpack.c.b16 %v762_v10, %v761_v9 }
  0x4d   : > { %v1560_v55 = vrot.slane %v1552_v7, 9  ;;  %v1561_v7 = vrot.slane %v1553_v35, 9  ;;  %v864_v35 = vrot.slane %v1894_v36, 5  ;;  %v1622_v36 = vld [vmem:[%s1751_s24 + $0x3c] sm:$0x1] }
  0x4e   : > { %1471 = vmatmul.msk.bf16.gmra.mxu1 %vm299_vm2, %v1460_v52  ;;  %v848_v52 = vrot.slane %v1833_v60, 5  ;;  %v1068_v60 = vrot.slane %v1066_v48, 4  ;;  %v860_v48 = vrot.slane %v1871_v57, 5 }
  0x4f   : > { %v853_v3 = vsel %vm1815_vm6, %v1560_v55, %v852_v53  ;;  %v1082_v53 = vrot.slane %v1080_v38, 4  ;;  %v857_v57 = vsel %vm1815_vm6, %v1561_v7, %v856_v46 }
  0x50   : > { %v849_v2 = vsel %vm1815_vm6, %v1559_v54, %v848_v52  ;;  %v1072_v11 = vor.u32 %v1071_v1, %v1068_v60  ;;  %v1260_v52 = vsel %vm1815_vm6, %v1645_v30, %v1259_v31  ;;  %v1271_v31 = vrot.slane %v1618_v59, 5 }
  0x51   : > { %1489 = vmatmul.msk.bf16.gmra.mxu2 %vm299_vm2, %v480_v56  ;;  %v1054_v56 = vrot.slane %v1052_v39, 4  ;;  %v881_v13 = vunpack.c.l.b16 %v849_v2  ;;  %v1083_v39 = vshll.u32 %v1615_v26, 16  ;;  %v1292_v51 = vunpack.c.l.b16 %v1260_v52 }
  0x52   : > { %v1073_v23 = vrot.slane %v1072_v11, 4  ;;  %v1103_v2 = vshll.u32 %v1618_v59, 16  ;;  %v1639_v11 = vld [vmem:[%s1751_s24 + $0x20] sm:$0xe] }
  0x53   : > { %v1058_v4 = vor.u32 %v1057_v58, %v1054_v56  ;;  %v1085_v54 = vrot.slane %v1083_v39, 5  ;;  %v1616_v56 = vld [vmem:[%s1751_s24 + $0x24] sm:$0x1]  ;;  %v1647_v19 = vrot.slane %v1639_v11, 9 }
  0x54   : > { %v1078_v40 = vsel %vm1775_vm3, %v1073_v23, %v1077_v25  ;;  %v1089_v1 = vshll.u32 %v1616_v56, 16  ;;  %v1267_v26 = vrot.slane %v1616_v56, 5 }
  0x55   : > { %v1059_v41 = vrot.slane %v1058_v4, 4  ;;  %v1167_v50 = vunpack.c.l.b16 %v1078_v40  ;;  %v1086_v60 = vor.u32 %v1085_v54, %v1082_v53  ;;  %v1110_v40 = vrot.slane %v1108_v20, 4 }
  0x56   : > { %v1091_v10 = vrot.slane %v1089_v1, 5  ;;  %v1268_v7 = vsel %vm1815_vm6, %v1647_v19, %v1267_v26  ;;  %v1642_v1 = vld [vmem:[%s1751_s24 + $0x38] sm:$0xe]  ;;  %v1279_v19 = vrot.slane %v1622_v36, 5  ;;  %v872_v26 = vrot.slane %v1928_v17, 5 }
  0x57   : > { %v1064_v29 = vsel %vm1775_vm3, %v1059_v41, %v1063_v15  ;;  %v1087_v9 = vrot.slane %v1086_v60, 4  ;;  %v1105_v41 = vrot.slane %v1103_v2, 5  ;;  %v1640_v15 = vld [vmem:[%s1751_s24 + $0x28] sm:$0xe]  ;;  %v1641_v60 = vld [vmem:[%s1751_s24 + $0x30] sm:$0xe] }
  0x58   : > { %1523 = vmatmul.msk.bf16.gmra.mxu3 %vm299_vm2, %v1512_v14  ;;  %v882_v14 = vunpack.c.l.b16 %v853_v3  ;;  %v1166_v45 = vunpack.c.l.b16 %v1064_v29  ;;  %v883_v3 = vunpack.c.l.b16 %v857_v57  ;;  %v1556_v29 = vld [vmem:[%s1751_s24 + $0x30] sm:$0xe]  ;;  %v1650_v12 = vrot.slane %v1642_v1, 9 }
  0x59   : > { %v1092_v25 = vsel %vm1775_vm3, %v1087_v9, %v1091_v10  ;;  %v1564_v39 = vrot.slane %v1556_v29, 9  ;;  %v1649_v10 = vrot.slane %v1641_v60, 9 }
  0x5a   : > { %v889_v27 = vpack.c.b16 %v882_v14, %v881_v13  ;;  %v1174_v63 = vpack.c.b16 %v1167_v50, %v1166_v45  ;;  %v1681_v13 = vld [vmem:[%s1751_s24 + $0x24] sm:$0xf0]  ;;  %v1620_v45 = vld [vmem:[%s1751_s24 + $0x34] sm:$0x1] }
  0x5b   : > { %v1594_v23 = vor.u32 %v1681_v13, %v1593_v5  ;;  %v1117_v53 = vshll.u32 %v1620_v45, 16  ;;  %v1275_v11 = vrot.slane %v1620_v45, 5 }
  0x5c   : > { %1549 = vmatmul.msk.bf16.gmra.mxu0 %vm299_vm2, %v765_v28  ;;  %v1617_v28 = vld [vmem:[%s1751_s24 + $0x28] sm:$0xf] }
  0x5d   : > { %v1094_v24 = vshrl.u32 %v1617_v28, 16  ;;  %v1097_v44 = vshll.u32 %v1617_v28, 16  ;;  %v1555_v28 = vld [vmem:[%s1751_s24 + $0x28] sm:$0xe] }
  0x5e   : > { %1472 = vmatmul.msk.bf16.gmra.mxu1 %vm299_vm2, %v1464_v37  ;;  %v1554_v37 = vld [vmem:[%s1751_s24 + $0x20] sm:$0xe]  ;;  %v1563_v38 = vrot.slane %v1555_v28, 9  ;;  %v876_v28 = vrot.slane %v1931_v18, 5 }
  0x5f   : > { %v1562_v47 = vrot.slane %v1554_v37, 9  ;;  %v1096_v58 = vrot.slane %v1094_v24, 4  ;;  %v1099_v8 = vrot.slane %v1097_v44, 5  ;;  %v868_v37 = vrot.slane %v1901_v21, 5 }
  0x60   : > { %v1168_v24 = vunpack.c.l.b16 %v1092_v25  ;;  %v865_v21 = vsel %vm1815_vm6, %v1563_v38, %v864_v35  ;;  %v1624_v35 = vld [vmem:[%s1751_s24 + $0x44] sm:$0x1] }
  0x61   : > { %1490 = vmatmul.msk.bf16.gmra.mxu2 %vm299_vm2, %v481_v43  ;;  %v1263_v43 = vrot.slane %v1614_v61, 5  ;;  %v861_v62 = vsel %vm1815_vm6, %v1562_v47, %v860_v48  ;;  %v1100_v61 = vor.u32 %v1099_v8, %v1096_v58  ;;  %v869_v50 = vsel %vm1815_vm6, %v1564_v39, %v868_v37  ;;  %v1626_v39 = vld [vmem:[%s1751_s24 + $0x4c] sm:$0x1] }
  0x62   : > { %v884_v4 = vunpack.c.l.b16 %v861_v62  ;;  %v1131_v8 = vshll.u32 %v1622_v36, 16  ;;  %v885_v59 = vunpack.c.l.b16 %v865_v21  ;;  %v1119_v62 = vrot.slane %v1117_v53, 5 }
  0x63   : > { %v1264_v55 = vsel %vm1815_vm6, %v1646_v33, %v1263_v43  ;;  %v1101_v14 = vrot.slane %v1100_v61, 4  ;;  %v1122_v33 = vshrl.u32 %v1621_v49, 16  ;;  %v1113_v43 = vrot.slane %v1111_v22, 5  ;;  %v1682_v61 = vld [vmem:[%s1751_s24 + $0x34] sm:$0xf0] }
  0x64   : > { %v1293_v0 = vunpack.c.l.b16 %v1264_v55  ;;  %v1294_v55 = vunpack.c.l.b16 %v1268_v7  ;;  %v1145_v45 = vshll.u32 %v1624_v35, 16  ;;  %v1287_v1 = vrot.slane %v1626_v39, 5 }
  0x65   : > { %v1106_v30 = vsel %vm1775_vm3, %v1101_v14, %v1105_v41  ;;  %v1124_v47 = vrot.slane %v1122_v33, 4  ;;  %v1114_v52 = vor.u32 %v1113_v43, %v1110_v40  ;;  %v1557_v14 = vld [vmem:[%s1751_s24 + $0x38] sm:$0xe]  ;;  %v1558_v41 = vld [vmem:[%s1751_s24 + $0x40] sm:$0xe] }
  0x66   : > { %v1169_v44 = vunpack.c.l.b16 %v1106_v30  ;;  %v1565_v25 = vrot.slane %v1557_v14, 9  ;;  %v1276_v30 = vsel %vm1815_vm6, %v1649_v10, %v1275_v11 }
  0x67   : > { %v1115_v57 = vrot.slane %v1114_v52, 4  ;;  %v1296_v40 = vunpack.c.l.b16 %v1276_v30 }
  0x68   : > { %1524 = vmatmul.msk.bf16.gmra.mxu3 %vm299_vm2, %v1516_v6  ;;  %v1300_v6 = vpack.c.b16 %v1293_v0, %v1292_v51  ;;  %v1175_v54 = vpack.c.b16 %v1169_v44, %v1168_v24  ;;  %v886_v51 = vunpack.c.l.b16 %v869_v50  ;;  %v1597_v0 = vld [vmem:[%s1751_s24 + $0x30] sm:$0xf]  ;;  %v873_v17 = vsel %vm1815_vm6, %v1565_v25, %v872_v26 }
  0x69   : > { %v1120_v9 = vsel %vm1775_vm3, %v1115_v57, %v1119_v62  ;;  %v1598_v13 = vor.u32 %v1682_v61, %v1597_v0  ;;  %v1147_v50 = vrot.slane %v1145_v45, 5  ;;  %v1283_v62 = vrot.slane %v1624_v35, 5 }
  0x6a   : > { %v891_v5 = vpack.c.b16 %v886_v51, %v885_v59 }
  0x6c   : > { %1550 = vmatmul.msk.bf16.gmra.mxu0 %vm299_vm2, %v766_v16  ;;  %v890_v16 = vpack.c.b16 %v884_v4, %v883_v3  ;;  %v1133_v3 = vrot.slane %v1131_v8, 5  ;;  %v1623_v4 = vld [vmem:[%s1751_s24 + $0x40] sm:$0xf]  ;;  %v1644_v8 = vld [vmem:[%s1751_s24 + $0x48] sm:$0xe] }
  0x6d   : > { %v1652_v60 = vrot.slane %v1644_v8, 9 }
  0x6e   : > { %1573 = vmatmul.msk.bf16.vlgmr.msra.gmra.mxu1 %vm299_vm2, %v889_v27  ;;  %v1648_v27 = vrot.slane %v1640_v15, 9  ;;  %v1136_v15 = vshrl.u32 %v1623_v4, 16 }
  0x70   : > { %v1272_v46 = vsel %vm1815_vm6, %v1648_v27, %v1271_v31  ;;  %v1566_v27 = vrot.slane %v1558_v41, 9  ;;  %v1138_v31 = vrot.slane %v1136_v15, 4 }
  0x71   : > { %1607 = vmatmul.msk.bf16.vlgmr.msra.gmra.mxu2 %vm299_vm2, %v1590_v34  ;;  %v1125_v34 = vshll.u32 %v1621_v49, 16  ;;  %v1295_v56 = vunpack.c.l.b16 %v1272_v46  ;;  %v1159_v46 = vshll.u32 %v1626_v39, 16 }
  0x72   : > { %v877_v18 = vsel %vm1815_vm6, %v1566_v27, %v876_v28 }
  0x73   : > { %v1127_v48 = vrot.slane %v1125_v34, 5  ;;  %v1280_v34 = vsel %vm1815_vm6, %v1650_v12, %v1279_v19  ;;  %v1161_v53 = vrot.slane %v1159_v46, 5 }
  0x74   : > { %v1297_v24 = vunpack.c.l.b16 %v1280_v34 }
  0x75   : > { %v1128_v58 = vor.u32 %v1127_v48, %v1124_v47  ;;  %v887_v47 = vunpack.c.l.b16 %v873_v17  ;;  %v888_v48 = vunpack.c.l.b16 %v877_v18 }
  0x76   : > { %v1302_v36 = vpack.c.b16 %v1297_v24, %v1296_v40 }
  0x77   : > { %v1129_v2 = vrot.slane %v1128_v58, 4  ;;  %v1683_v58 = vld [vmem:[%s1751_s24 + $0x44] sm:$0xf0] }
  0x78   : > { %1633 = vmatmul.msk.bf16.vlgmr.msra.gmra.mxu3 %vm299_vm2, %v1174_v63  ;;  %v1301_v63 = vpack.c.b16 %v1295_v56, %v1294_v55  ;;  %v892_v55 = vpack.c.b16 %v888_v48, %v887_v47  ;;  %v1601_v56 = vld [vmem:[%s1751_s24 + $0x40] sm:$0xf] }
  0x79   : > { %v1134_v49 = vsel %vm1775_vm3, %v1129_v2, %v1133_v3 }
  0x7a   : > { %v1171_v29 = vunpack.c.l.b16 %v1134_v49 }
  0x7c   : > { %1659 = vmatmul.msk.bf16.vlgmr.msra.gmra.mxu0 %vm299_vm2, %v1300_v6  ;;  %v1625_v6 = vld [vmem:[%s1751_s24 + $0x48] sm:$0xf] }
  0x7d   : > { %v1150_v20 = vshrl.u32 %v1625_v6, 16  ;;  %v1153_v22 = vshll.u32 %v1625_v6, 16 }
  0x7e   : > { %1574 = vmatmul.msk.bf16.gmra.mxu1 %vm299_vm2, %v890_v16  ;;  %v1139_v16 = vshll.u32 %v1623_v4, 16  ;;  %v1288_v4 = vsel %vm1815_vm6, %v1652_v60, %v1287_v1 }
  0x7f   : > { %v1152_v37 = vrot.slane %v1150_v20, 4  ;;  %v1155_v38 = vrot.slane %v1153_v22, 5  ;;  %v1299_v32 = vunpack.c.l.b16 %v1288_v4 }
  0x80   : > { %v1141_v33 = vrot.slane %v1139_v16, 5 }
  0x81   : > { %1608 = vmatmul.msk.bf16.gmra.mxu2 %vm299_vm2, %v1594_v23  ;;  %v1170_v23 = vunpack.c.l.b16 %v1120_v9  ;;  %v1156_v7 = vor.u32 %v1155_v38, %v1152_v37 }
  0x82   : > { %v1142_v44 = vor.u32 %v1141_v33, %v1138_v31 }
  0x83   : > { %v1176_v43 = vpack.c.b16 %v1171_v29, %v1170_v23  ;;  %v1157_v52 = vrot.slane %v1156_v7, 4 }
  0x84   : > { %v1143_v21 = vrot.slane %v1142_v44, 4 }
  0x85   : > { %v1162_v0 = vsel %vm1775_vm3, %v1157_v52, %v1161_v53 }
  0x86   : > { %v1148_v51 = vsel %vm1775_vm3, %v1143_v21, %v1147_v50  ;;  %v1173_v2 = vunpack.c.l.b16 %v1162_v0 }
  0x87   : > { %v1172_v61 = vunpack.c.l.b16 %v1148_v51 }
  0x88   : > { %1634 = vmatmul.msk.bf16.gmra.mxu3 %vm299_vm2, %v1175_v54  ;;  %v1643_v54 = vld [vmem:[%s1751_s24 + $0x40] sm:$0xe] }
  0x89   : > { %v1651_v57 = vrot.slane %v1643_v54, 9  ;;  %v1177_v6 = vpack.c.b16 %v1173_v2, %v1172_v61 }
  0x8b   : > { %v1284_v3 = vsel %vm1815_vm6, %v1651_v57, %v1283_v62 }
  0x8c   : > { %1660 = vmatmul.msk.bf16.gmra.mxu0 %vm299_vm2, %v1301_v63  ;;  %v1602_v63 = vor.u32 %v1683_v58, %v1601_v56  ;;  %v1298_v9 = vunpack.c.l.b16 %v1284_v3 }
  0x8e   : > { %1575 = vmatmul.msk.bf16.gmra.mxu1 %vm299_vm2, %v891_v5  ;;  %v1303_v11 = vpack.c.b16 %v1299_v32, %v1298_v9 }
  0x91   : > { %1609 = vmatmul.msk.bf16.gmra.mxu2 %vm299_vm2, %v1598_v13 }
  0x98   : > { %1635 = vmatmul.msk.bf16.gmra.mxu3 %vm299_vm2, %v1176_v43 }
  0x9b   : > { %v2048_v59 = vpop.f32.mrf.mxu1 }
  0x9c   : > { %1661 = vmatmul.msk.bf16.gmra.mxu0 %vm299_vm2, %v1302_v36 }
  0x9e   : > { %1576 = vmatmul.msk.bf16.gmra.mxu1 %vm299_vm2, %v892_v55 }
  0xa1   : > { %1610 = vmatmul.msk.bf16.gmra.mxu2 %vm299_vm2, %v1602_v63 }
  0xa3   : > { %v2061_v5 = vpop.f32.mrf.mxu1 }
  0xa4   : > { %v2063_v10 = vpop.f32.mrf.mxu2 }
  0xa8   : > { %1636 = vmatmul.msk.bf16.gmra.mxu3 %vm299_vm2, %v1177_v6 }
  0xa9   : > { %v321_v12 = vpop.f32.mrf.mxu0 }
  0xab   : > { %v2066_v13 = vpop.f32.mrf.mxu3  ;;  %v388_v14 = vpop.f32.mrf.mxu1 }
  0xac   : > { %1662 = vmatmul.msk.bf16.gmra.mxu0 %vm299_vm2, %v1303_v11  ;;  %v2069_v41 = vpop.f32.mrf.mxu2  ;;  %v389_v46 = vadd.f32 %v388_v14, %v321_v12 }
  0xb1   : > { %v323_v42 = vpop.f32.mrf.mxu0 }
  0xb3   : > { %v2071_v15 = vpop.f32.mrf.mxu3  ;;  %v390_v16 = vpop.f32.mrf.mxu1 }
  0xb4   : > { %v509_v49 = vpop.f32.mrf.mxu2  ;;  %v391_v53 = vadd.f32 %v390_v16, %v323_v42 }
  0xb5   : > { %v529_v36 = vadd.f32 %v509_v49, %v389_v46 }
  0xb9   : > { %v794_v19 = vpop.f32.mrf.mxu0 }
  0xbb   : > { %v596_v20 = vpop.f32.mrf.mxu3  ;;  %v393_v22 = vpop.f32.mrf.mxu1 }
  0xbc   : > { %v511_v23 = vpop.f32.mrf.mxu2  ;;  %v616_v50 = vadd.f32 %v596_v20, %v529_v36  ;;  %v394_v0 = vadd.f32 %v393_v22, %v2048_v59 }
  0xbd   : > { %v530_v56 = vadd.f32 %v511_v23, %v391_v53 }
  0xbe   : > { %v814_v58 = vadd.f32 %v794_v19, %v616_v50 }
  0xc1   : > { %v796_v25 = vpop.f32.mrf.mxu0 }
  0xc3   : > { %v598_v26 = vpop.f32.mrf.mxu3  ;;  %v395_v27 = vpop.f32.mrf.mxu1 }
  0xc4   : > { %v514_v28 = vpop.f32.mrf.mxu2  ;;  %v617_v57 = vadd.f32 %v598_v26, %v530_v56  ;;  %v396_v14 = vadd.f32 %v395_v27, %v2061_v5 }
  0xc5   : > { %v531_v61 = vadd.f32 %v514_v28, %v394_v0 }
  0xc6   : > { %v815_v3 = vadd.f32 %v796_v25, %v617_v57 }
  0xc9   : > { %v799_v29 = vpop.f32.mrf.mxu0 }
  0xcb   : > { %v601_v30 = vpop.f32.mrf.mxu3  ;;  %v398_v31 = vpop.f32.mrf.mxu1 }
  0xcc   : > { %v516_v33 = vpop.f32.mrf.mxu2  ;;  %v618_v32 = vadd.f32 %v601_v30, %v531_v61 }
  0xcd   : > { %v532_v49 = vadd.f32 %v516_v33, %v396_v14 }
  0xce   : > { %v816_v20 = vadd.f32 %v799_v29, %v618_v32 }
  0xd1   : > { %v2073_v34 = vpop.f32.mrf.mxu0 }
  0xd3   : > { %v603_v35 = vpop.f32.mrf.mxu3  ;;  %v2075_v37 = vpop.f32.mrf.mxu1 }
  0xd4   : > { %v519_v38 = vpop.f32.mrf.mxu2  ;;  %v619_v26 = vadd.f32 %v603_v35, %v532_v49 }
  0xd6   : > { %v817_v50 = vadd.f32 %v2073_v34, %v619_v26 }
  0xd9   : > { %v2077_v39 = vpop.f32.mrf.mxu0 }
  0xdb   : > { %v2079_v40 = vpop.f32.mrf.mxu3  ;;  %v2081_v17 = vpop.f32.mrf.mxu1 }
  0xdc   : > { %v2083_v18 = vpop.f32.mrf.mxu2 }
  0xe1   : > { %v2085_v43 = vpop.f32.mrf.mxu0 }
  0xe3   : > { %v2087_v24 = vpop.f32.mrf.mxu3  ;;  %v2089_v44 = vpop.f32.mrf.mxu1 }
  0xe4   : > { %v2091_v45 = vpop.f32.mrf.mxu2 }
  0xe9   : > { %v2093_v7 = vpop.f32.mrf.mxu0 }
  0xeb   : > { %v2095_v47 = vpop.f32.mrf.mxu3  ;;  %v920_v48 = vpop.f32.mrf.mxu1 }
  0xec   : > { %v2097_v21 = vpop.f32.mrf.mxu2  ;;  %v940_v51 = vadd.f32 %v920_v48, %v814_v58  ;;  %v399_v48 = vadd.f32 %v398_v31, %v2063_v10  ;;  %v401_v10 = vadd.f32 %v2075_v37, %v2069_v41  ;;  %v404_v41 = vadd.f32 %v2081_v17, %v2066_v13 }
  0xed   : > { %v406_v13 = vadd.f32 %v2089_v44, %v2071_v15 }
  0xee   : > { %v533_v27 = vadd.f32 %v519_v38, %v399_v48  ;;  %v534_v38 = vadd.f32 %v2083_v18, %v401_v10  ;;  %v535_v18 = vadd.f32 %v2091_v45, %v404_v41 }
  0xef   : > { %v536_v45 = vadd.f32 %v2097_v21, %v406_v13 }
  0xf0   : > { %v620_v56 = vadd.f32 %v2079_v40, %v533_v27  ;;  %v621_v40 = vadd.f32 %v2087_v24, %v534_v38  ;;  %v622_v24 = vadd.f32 %v2095_v47, %v535_v18 }
  0xf1   : > { %v2099_v52 = vpop.f32.mrf.mxu0 }
  0xf2   : > { %v818_v34 = vadd.f32 %v2077_v39, %v620_v56  ;;  %v819_v39 = vadd.f32 %v2085_v43, %v621_v40  ;;  %v820_v43 = vadd.f32 %v2093_v7, %v622_v24 }
  0xf3   : > { %v2101_v54 = vpop.f32.mrf.mxu3  ;;  %v922_v55 = vpop.f32.mrf.mxu1 }
  0xf4   : > { %v1007_v8 = vpop.f32.mrf.mxu2  ;;  %v941_v9 = vadd.f32 %v922_v55, %v815_v3 }
  0xf5   : > { %v1027_v62 = vadd.f32 %v1007_v8, %v940_v51 }
  0xf9   : > { %v1331_v63 = vpop.f32.mrf.mxu0 }
  0xfb   : > { %v1205_v60 = vpop.f32.mrf.mxu3  ;;  %v925_v1 = vpop.f32.mrf.mxu1 }
  0xfc   : > { %v1225_v2 = vadd.f32 %v1205_v60, %v1027_v62  ;;  %v1009_v4 = vpop.f32.mrf.mxu2  ;;  %v942_v25 = vadd.f32 %v925_v1, %v816_v20 }
  0xfd   : > { %v1028_v12 = vadd.f32 %v1009_v4, %v941_v9 }
  0xfe   : > { %v1351_v6 = vadd.f32 %v1331_v63, %v1225_v2 }
 0x100   : > { %v1359_v11 = vpack.c.bf16 %v1351_v6, %v1351_v6 }
 0x101   : > { %v1333_v59 = vpop.f32.mrf.mxu0 }
 0x102   : > { %1368 = vst.msk [vmem:[%s2108_s8] sm:$0xf] %vm1367_vm7, %v1359_v11 }
 0x103   : > { %v1207_v42 = vpop.f32.mrf.mxu3  ;;  %v927_v16 = vpop.f32.mrf.mxu1 }
 0x104   : > { %v1226_v19 = vadd.f32 %v1207_v42, %v1028_v12  ;;  %v1012_v22 = vpop.f32.mrf.mxu2  ;;  %v943_v55 = vadd.f32 %v927_v16, %v817_v50  ;;  %v623_v16 = vadd.f32 %v2101_v54, %v536_v45 }
 0x105   : > { %v1029_v46 = vadd.f32 %v1012_v22, %v942_v25 }
 0x106   : > { %v1352_v23 = vadd.f32 %v1333_v59, %v1226_v19  ;;  %v821_v21 = vadd.f32 %v2099_v52, %v623_v16 }
 0x108   : > { %v1360_v28 = vpack.c.bf16 %v1352_v23, %v1352_v23 }
 0x109   : > { %v1336_v30 = vpop.f32.mrf.mxu0 }
 0x10a   : > { %1369 = vst.msk [vmem:[%s2108_s8 + $0x4] sm:$0xf] %vm1367_vm7, %v1360_v28 }
 0x10b   : > { %v1210_v5 = vpop.f32.mrf.mxu3  ;;  %v930_v53 = vpop.f32.mrf.mxu1 }
 0x10c   : > { %v1227_v36 = vadd.f32 %v1210_v5, %v1029_v46  ;;  %v1014_v33 = vpop.f32.mrf.mxu2  ;;  %v944_v63 = vadd.f32 %v930_v53, %v818_v34 }
 0x10d   : > { %v1030_v58 = vadd.f32 %v1014_v33, %v943_v55 }
 0x10e   : > { %v1353_v29 = vadd.f32 %v1336_v30, %v1227_v36 }
 0x110   : > { %v1361_v35 = vpack.c.bf16 %v1353_v29, %v1353_v29 }
 0x111   : > { %v1338_v8 = vpop.f32.mrf.mxu0 }
 0x112   : > { %1370 = vst.msk [vmem:[%s2108_s8 + $0x8] sm:$0xf] %vm1367_vm7, %v1361_v35 }
 0x113   : > { %v1212_v31 = vpop.f32.mrf.mxu3  ;;  %v932_v0 = vpop.f32.mrf.mxu1 }
 0x114   : > { %v1228_v51 = vadd.f32 %v1212_v31, %v1030_v58  ;;  %v1017_v57 = vpop.f32.mrf.mxu2  ;;  %v945_v6 = vadd.f32 %v932_v0, %v819_v39 }
 0x115   : > { %v1031_v1 = vadd.f32 %v1017_v57, %v944_v63 }
 0x116   : > { %v1354_v62 = vadd.f32 %v1338_v8, %v1228_v51 }
 0x118   : > { %v1362_v60 = vpack.c.bf16 %v1354_v62, %v1354_v62 }
 0x119   : > { %v1341_v61 = vpop.f32.mrf.mxu0 }
 0x11a   : > { %1371 = vst.msk [vmem:[%s2108_s8 + $0xc] sm:$0xf] %vm1367_vm7, %v1362_v60 }
 0x11b   : > { %v1215_v37 = vpop.f32.mrf.mxu3  ;;  %v935_v11 = vpop.f32.mrf.mxu1 }
 0x11c   : > { %v1229_v2 = vadd.f32 %v1215_v37, %v1031_v1  ;;  %v1019_v3 = vpop.f32.mrf.mxu2  ;;  %v946_v47 = vadd.f32 %v935_v11, %v820_v43 }
 0x11d   : > { %v1032_v32 = vadd.f32 %v1019_v3, %v945_v6 }
 0x11e   : > { %v1355_v4 = vadd.f32 %v1341_v61, %v1229_v2 }
 0x120   : > { %v1363_v9 = vpack.c.bf16 %v1355_v4, %v1355_v4 }
 0x121   : > { %v1343_v12 = vpop.f32.mrf.mxu0 }
 0x122   : > { %1372 = vst.msk [vmem:[%s2108_s8 + $0x10] sm:$0xf] %vm1367_vm7, %v1363_v9 }
 0x123   : > { %v1217_v17 = vpop.f32.mrf.mxu3  ;;  %v937_v20 = vpop.f32.mrf.mxu1 }
 0x124   : > { %v1230_v59 = vadd.f32 %v1217_v17, %v1032_v32  ;;  %v1022_v14 = vpop.f32.mrf.mxu2  ;;  %v947_v7 = vadd.f32 %v937_v20, %v821_v21 }
 0x125   : > { %v1033_v19 = vadd.f32 %v1022_v14, %v946_v47 }
 0x126   : > { %v1356_v42 = vadd.f32 %v1343_v12, %v1230_v59 }
 0x128   : > { %v1364_v49 = vpack.c.bf16 %v1356_v42, %v1356_v42 }
 0x129   : > { %v1346_v15 = vpop.f32.mrf.mxu0 }
 0x12a   : > { %1373 = vst.msk [vmem:[%s2108_s8 + $0x14] sm:$0xf] %vm1367_vm7, %v1364_v49 }
 0x12b   : > { %v1220_v44 = vpop.f32.mrf.mxu3 }
 0x12c   : > { %v1231_v22 = vadd.f32 %v1220_v44, %v1033_v19  ;;  %v1024_v23 = vpop.f32.mrf.mxu2 }
 0x12d   : > { %v1034_v28 = vadd.f32 %v1024_v23, %v947_v7 }
 0x12e   : > { %v1357_v25 = vadd.f32 %v1346_v15, %v1231_v22 }
 0x130   : > { %v1365_v26 = vpack.c.bf16 %v1357_v25, %v1357_v25 }
 0x131   : > { %v1348_v30 = vpop.f32.mrf.mxu0 }
 0x132   : > { %1374 = vst.msk [vmem:[%s2108_s8 + $0x18] sm:$0xf] %vm1367_vm7, %v1365_v26 }
 0x133   : > { %v1222_v46 = vpop.f32.mrf.mxu3 }
 0x134   : > { %v1232_v54 = vadd.f32 %v1222_v46, %v1034_v28 }
 0x136   : > { %v1358_v48 = vadd.f32 %v1348_v30, %v1232_v54 }
 0x138   : > { %v1366_v5 = vpack.c.bf16 %v1358_v48, %v1358_v48 }
 0x13a   : > { %1375 = vst.msk [vmem:[%s2108_s8 + $0x1c] sm:$0xf] %vm1367_vm7, %v1366_v5 }
 0x13b PF: > { %s12_s9 = sadd.s32 1, %s1705_s9  }
 0x13c   : > { %p9_p4 = scmp.ge.s32.totalorder %s12_s9, 4  }
 0x13e   :  { %11 = sbr.rel (!%p9_p4) target bundleno = 1 (0x1), region = 68 }

// kernel: densenet_forward.20
= control target key start
LH: loop header
LB: loop body
LE: loop exit
PB: predicated region body
PF: predicated region fallthrough
CT: control target
= control target key end

     0   :  { %s369_s12 = smov 0   ;;  %s396_s0 = inlined_call_operand.vmem [shape: bf16[2,4,2,4,64], index: 0, kind: input, shape index: {}]   ;;  %s397_s1 = inlined_call_operand.vmem [shape: f32[1,1,64], index: 1, kind: input, shape index: {}]   ;;  %s398_s2 = inlined_call_operand.vmem [shape: f32[1,1,64], index: 2, kind: input, shape index: {}]   ;;  %s399_s3 = inlined_call_operand.vmem [shape: bf16[2,4,4,32], index: 3, kind: output, shape index: {}]  }
   0x1 LB: > { %s312_s13 = sadd.s32 4294967295, %s346_s12   ;;  %p316_p0 = scmp.ge.s32.totalorder %s346_s12, 1  ;;  %s346_s12 = sphi %s369_s12, %s13_s12  }
   0x2   : > { %p137_p1 = scmp.lt.s32.totalorder %s346_s12, 3 }
   0x4   : > { %p138_p2 = pnand %p316_p0, %p137_p1 }
   0x5   : > { %p161_p3 = scmp.lt.s32.totalorder (!%p138_p2), %s312_s13, 1  ;;  %s348_s22 = smov (!%p138_p2), 96  }
   0x6   : > { %141 = sbr.rel (%p138_p2) target bundleno = 156 (0x9c), region = 32 }
   0xb   : > { %s401_s13 = smov (!%p161_p3, %s312_s13), 1  ;;  %v338_v0 = vld [vmem:[%s397_s1] ss:$0 sm:$0xff]  ;;  %vm252_vm0 = vcmask 254976  }
   0xc   : > { %s327_s14 = sshll.u32 %s401_s13, 4  ;;  %v339_v1 = vld [vmem:[%s398_s2] ss:$0 sm:$0xff]  ;;  %s328_s23 = sshll.u32 %s401_s13, 3 }
   0xd   : > { %s165_s17 = scalar_lea.vmem %s396_s0, %s327_s14  ;;  %s170_s26 = scalar_lea.vmem %s399_s3, %s328_s23 }
   0xe   : > { %v175_v2 = vld [vmem:[%s165_s17 + $0x8] sm:$0x3]  ;;  %v323_v3 = vld [vmem:[%s165_s17 + $0xa] sm:$0x3]  ;;  %v173_v4 = vld [vmem:[%s165_s17] sm:$0x3] }
   0xf   : > { %v179_v5 = vunpack.c.l.bf16 %v175_v2  ;;  %v206_v6 = vunpack.c.l.bf16 %v323_v3  ;;  %v177_v7 = vunpack.c.l.bf16 %v173_v4  ;;  %v321_v8 = vld [vmem:[%s165_s17 + $0x2] sm:$0x3]  ;;  %v176_v9 = vld [vmem:[%s165_s17 + $0xc] sm:$0x3]  ;;  %v324_v10 = vld [vmem:[%s165_s17 + $0xe] sm:$0x3] }
  0x10   : > { %v204_v11 = vunpack.c.l.bf16 %v321_v8  ;;  %v180_v12 = vunpack.c.l.bf16 %v176_v9  ;;  %v207_v13 = vunpack.c.l.bf16 %v324_v10  ;;  %v174_v14 = vld [vmem:[%s165_s17 + $0x4] sm:$0x3]  ;;  %v322_v15 = vld [vmem:[%s165_s17 + $0x6] sm:$0x3] }
  0x11   : > { %v186_v16 = vmul.f32 %v338_v0, %v179_v5  ;;  %v210_v17 = vmul.f32 %v338_v0, %v206_v6  ;;  %v184_v18 = vmul.f32 %v338_v0, %v177_v7  ;;  %v178_v19 = vunpack.c.l.bf16 %v174_v14 }
  0x12   : > { %v208_v20 = vmul.f32 %v338_v0, %v204_v11  ;;  %v187_v21 = vmul.f32 %v338_v0, %v180_v12  ;;  %v211_v22 = vmul.f32 %v338_v0, %v207_v13  ;;  %v205_v23 = vunpack.c.l.bf16 %v322_v15 }
  0x13   : > { %v193_v24 = vadd.f32 %v339_v1, %v186_v16  ;;  %v214_v25 = vadd.f32 %v339_v1, %v210_v17  ;;  %v191_v26 = vadd.f32 %v339_v1, %v184_v18  ;;  %v185_v27 = vmul.f32 %v338_v0, %v178_v19 }
  0x14   : > { %v212_v28 = vadd.f32 %v339_v1, %v208_v20  ;;  %v194_v29 = vadd.f32 %v339_v1, %v187_v21  ;;  %v209_v30 = vmul.f32 %v338_v0, %v205_v23  ;;  %v215_v34 = vadd.f32 %v339_v1, %v211_v22 }
  0x15   : > { %v197_v31 = vmax.f32 %v193_v24, 0.0  ;;  %v218_v32 = vmax.f32 %v214_v25, 0.0  ;;  %v195_v33 = vmax.f32 %v191_v26, 0.0  ;;  %v192_v36 = vadd.f32 %v339_v1, %v185_v27 }
  0x16   : > { %v216_v35 = vmax.f32 %v212_v28, 0.0  ;;  %v213_v37 = vadd.f32 %v339_v1, %v209_v30  ;;  %v198_v40 = vmax.f32 %v194_v29, 0.0  ;;  %v219_v41 = vmax.f32 %v215_v34, 0.0 }
  0x17   : > { %v222_v38 = vadd.f32 %v218_v32, %v197_v31  ;;  %v196_v42 = vmax.f32 %v192_v36, 0.0 }
  0x18   : > { %v220_v39 = vadd.f32 %v216_v35, %v195_v33  ;;  %v217_v43 = vmax.f32 %v213_v37, 0.0  ;;  %v223_v44 = vadd.f32 %v219_v41, %v198_v40 }
  0x19   : > { %232 = vrot.lane.b32.xlu1 %v222_v38, %s348_s22 }
  0x1a   : > { %228 = vrot.lane.b32.xlu0 %v220_v39, %s348_s22  ;;  %v221_v45 = vadd.f32 %v217_v43, %v196_v42 }
  0x21   : > { %234 = vrot.lane.b32.xlu1 %v223_v44, %s348_s22 }
  0x22   : > { %230 = vrot.lane.b32.xlu0 %v221_v45, %s348_s22 }
  0x8b   : > { %v233_v46 = vpop.permute.xlu1 %232 }
  0x8c   : > { %v242_v47 = vadd.f32 %v233_v46, %v222_v38  ;;  %v229_v48 = vpop.permute.xlu0 %228 }
  0x8d   : > { %v240_v49 = vadd.f32 %v229_v48, %v220_v39 }
  0x8e   : > { %v246_v50 = vmul.f32 0.25, %v242_v47 }
  0x8f   : > { %v244_v51 = vmul.f32 0.25, %v240_v49 }
  0x90   : > { %v250_v52 = vpack.c.bf16 %v246_v50, %v246_v50 }
  0x91   : > { %v248_v53 = vpack.c.bf16 %v244_v51, %v244_v51 }
  0x92   : > { %255 = vst.msk [vmem:[%s170_s26 + $0x4] sm:$0x3] %vm252_vm0, %v250_v52 }
  0x93   : > { %253 = vst.msk [vmem:[%s170_s26] sm:$0x3] %vm252_vm0, %v248_v53  ;;  %v235_v54 = vpop.permute.xlu1 %234 }
  0x94   : > { %v243_v55 = vadd.f32 %v235_v54, %v223_v44  ;;  %v231_v56 = vpop.permute.xlu0 %230 }
  0x95   : > { %v241_v57 = vadd.f32 %v231_v56, %v221_v45 }
  0x96   : > { %v247_v58 = vmul.f32 0.25, %v243_v55 }
  0x97   : > { %v245_v59 = vmul.f32 0.25, %v241_v57 }
  0x98   : > { %v251_v60 = vpack.c.bf16 %v247_v58, %v247_v58 }
  0x99   : > { %v249_v61 = vpack.c.bf16 %v245_v59, %v245_v59 }
  0x9a   : > { %256 = vst.msk [vmem:[%s170_s26 + $0x6] sm:$0x3] %vm252_vm0, %v251_v60 }
  0x9b   : > { %254 = vst.msk [vmem:[%s170_s26 + $0x2] sm:$0x3] %vm252_vm0, %v249_v61 }
  0x9c PF: > { %s13_s12 = sadd.s32 1, %s346_s12  }
  0x9d   : > { %p10_p4 = scmp.ge.s32.totalorder %s13_s12, 4  }
  0x9f   :  { %12 = sbr.rel (!%p10_p4) target bundleno = 1 (0x1), region = 63 }

// kernel: densenet_forward.21
= control target key start
LH: loop header
LB: loop body
LE: loop exit
PB: predicated region body
PF: predicated region fallthrough
CT: control target
= control target key end

     0   :  { %vm54_vm0 = vcmask 261120   ;;  %vm84_vm1 = vcmask 125952   ;;  %s176_s1 = inlined_call_operand.vmem [shape: bf16[32,16], index: 1, kind: input, shape index: {}]   ;;  %s177_s2 = inlined_call_operand.vmem [shape: bf16[1,32], index: 2, kind: input, shape index: {}]   ;;  %s178_s3 = inlined_call_operand.vmem [shape: bf16[1,32], index: 3, kind: input, shape index: {}]   ;;  %s179_s4 = inlined_call_operand.vmem [shape: f32[1,16], index: 4, kind: input, shape index: {}]   ;;  %s180_s5 = inlined_call_operand.vmem [shape: f32[1,16], index: 5, kind: input, shape index: {}]   ;;  %s181_s0 = inlined_call_operand.vmem [shape: bf16[32,32], index: 0, kind: input, shape index: {}]   ;;  %s182_s6 = inlined_call_operand.vmem [shape: bf16[32,16], index: 6, kind: output, shape index: {}]  }
   0x1   :  { %v114_v0 = vld [vmem:[%s176_s1 + $0x8] sm:$0xff]  ;;  %v113_v1 = vld [vmem:[%s176_s1] sm:$0xff] }
   0x2   :  { %67 = vmatpush.bf16.msra.mxu0 %v114_v0  ;;  %115 = vmatpush.bf16.msra.mxu1 %v114_v0  ;;  %v111_v2 = vld [vmem:[%s181_s0] sm:$0xff]  ;;  %v112_v3 = vld [vmem:[%s181_s0 + $0x8] sm:$0xff] }
   0x6   :  { %68 = vmatpush.bf16.msra.mxu0 %v113_v1  ;;  %116 = vmatpush.bf16.msra.mxu1 %v113_v1 }
   0x9   :  { %109 = vmatmul.msk.bf16.vlgmr.msra.gmra.mxu0 %vm54_vm0, %v111_v2  ;;  %110 = vmatmul.msk.bf16.vlgmr.msra.gmra.mxu1 %vm54_vm0, %v112_v3 }
  0x86   :  { %v70_v4 = vpop.f32.mrf.mxu0  ;;  %v75_v5 = vpop.f32.mrf.mxu1 }
  0x87   :  { %v80_v6 = vpack.c.bf16 %v70_v4, %v70_v4  ;;  %v82_v7 = vpack.c.bf16 %v75_v5, %v75_v5 }
  0x89   :  { %85 = vst.msk [vmem:[%s182_s6] sm:$0xf] %vm84_vm1, %v80_v6 }
  0x8a   :  { %87 = vst.msk [vmem:[%s182_s6 + $0x8] sm:$0xf] %vm84_vm1, %v82_v7 }
  0x8e   :  { %v72_v8 = vpop.f32.mrf.mxu0  ;;  %v77_v9 = vpop.f32.mrf.mxu1 }
  0x8f   :  { %v81_v10 = vpack.c.bf16 %v72_v8, %v72_v8  ;;  %v83_v11 = vpack.c.bf16 %v77_v9, %v77_v9 }
  0x91   :  { %86 = vst.msk [vmem:[%s182_s6 + $0x4] sm:$0xf] %vm84_vm1, %v81_v10 }
  0x92   :  { %88 = vst.msk [vmem:[%s182_s6 + $0xc] sm:$0xf] %vm84_vm1, %v83_v11 }

// kernel: densenet_forward.22
= control target key start
LH: loop header
LB: loop body
LE: loop exit
PB: predicated region body
PF: predicated region fallthrough
CT: control target
= control target key end

     0   :  { %vm90_vm0 = vcmask 261120   ;;  %vm140_vm1 = vcmask 125952   ;;  %s249_s1 = inlined_call_operand.vmem [shape: bf16[32,16], index: 1, kind: input, shape index: {}]   ;;  %s250_s0 = inlined_call_operand.vmem [shape: bf16[32,32], index: 0, kind: input, shape index: {}]   ;;  %s251_s2 = inlined_call_operand.vmem [shape: bf16[1,32], index: 2, kind: input, shape index: {}]   ;;  %s252_s3 = inlined_call_operand.vmem [shape: bf16[1,32], index: 3, kind: input, shape index: {}]   ;;  %s253_s4 = inlined_call_operand.vmem [shape: f32[1,16], index: 4, kind: input, shape index: {}]   ;;  %s254_s5 = inlined_call_operand.vmem [shape: f32[1,16], index: 5, kind: input, shape index: {}]   ;;  %s255_s6 = inlined_call_operand.vmem [shape: bf16[32,16], index: 6, kind: output, shape index: {}]  }
   0x1   :  { %v160_v0 = vld [vmem:[%s249_s1 + $0x8] sm:$0xff]  ;;  %v162_v1 = vld [vmem:[%s250_s0] sm:$0xff]  }
   0x2   :  { %v28_v2 = vld [vmem:[%s251_s2] sm:$0x1]  ;;  %v169_v4 = vld [vmem:[%s250_s0 + $0x8] sm:$0xff]   ;;  %103 = vmatpush.bf16.msra.mxu0 %v160_v0  ;;  %170 = vmatpush.bf16.msra.mxu1 %v160_v0  ;;  %v163_v8 = vunpack.c.l.bf16 %v162_v1  ;;  %v164_v9 = vunpack.c.h.bf16 %v162_v1 }
   0x3   :  { %v46_v3 = vld [vmem:[%s252_s3] sm:$0x1]  ;;  %v30_v6 = vpack.i.b16 %v28_v2, %v28_v2  ;;  %v167_v11 = vunpack.c.l.bf16 %v169_v4  ;;  %v168_v12 = vunpack.c.h.bf16 %v169_v4 }
   0x4   :  { %v159_v5 = vld [vmem:[%s249_s1] sm:$0xff]  ;;  %v48_v7 = vpack.i.b16 %v46_v3, %v46_v3 }
   0x5   :  { %v32_v10 = vperm.slane %v30_v6, 0  ;;  %v172_v38 = vld [vmem:[%s253_s4] ss:$0 sm:$0xff] }
   0x6   :  { %v50_v13 = vperm.slane %v48_v7, 0  ;;  %104 = vmatpush.bf16.msra.mxu0 %v159_v5  ;;  %171 = vmatpush.bf16.msra.mxu1 %v159_v5  ;;  %v173_v39 = vld [vmem:[%s254_s5] ss:$0 sm:$0xff] }
   0x7   :  { %v37_v14 = vunpack.c.l.bf16 %v32_v10 }
   0x8   :  { %v55_v19 = vunpack.c.l.bf16 %v50_v13 }
   0x9   :  { %v38_v15 = vmul.f32 %v163_v8, %v37_v14  ;;  %v39_v16 = vmul.f32 %v164_v9, %v37_v14  ;;  %v40_v17 = vmul.f32 %v167_v11, %v37_v14  ;;  %v41_v18 = vmul.f32 %v168_v12, %v37_v14 }
   0xb   :  { %v42_v20 = vpack.c.bf16 %v38_v15, %v38_v15  ;;  %v43_v21 = vpack.c.bf16 %v39_v16, %v39_v16  ;;  %v44_v22 = vpack.c.bf16 %v40_v17, %v40_v17  ;;  %v45_v23 = vpack.c.bf16 %v41_v18, %v41_v18 }
   0xd   :  { %v51_v24 = vunpack.c.l.bf16 %v42_v20  ;;  %v52_v25 = vunpack.c.l.bf16 %v43_v21  ;;  %v53_v26 = vunpack.c.l.bf16 %v44_v22  ;;  %v54_v27 = vunpack.c.l.bf16 %v45_v23 }
   0xf   :  { %v56_v28 = vadd.f32 %v55_v19, %v51_v24  ;;  %v57_v29 = vadd.f32 %v55_v19, %v52_v25  ;;  %v58_v30 = vadd.f32 %v55_v19, %v53_v26  ;;  %v59_v31 = vadd.f32 %v55_v19, %v54_v27 }
  0x11   :  { %v68_v32 = vmax.f32 %v56_v28, 0.0  ;;  %v69_v33 = vmax.f32 %v57_v29, 0.0  ;;  %v70_v34 = vmax.f32 %v58_v30, 0.0  ;;  %v71_v35 = vmax.f32 %v59_v31, 0.0 }
  0x13   :  { %v72_v36 = vpack.c.bf16 %v69_v33, %v68_v32  ;;  %v73_v37 = vpack.c.bf16 %v71_v35, %v70_v34 }
  0x15   :  { %157 = vmatmul.msk.bf16.vlgmr.msra.gmra.mxu0 %vm90_vm0, %v72_v36  ;;  %158 = vmatmul.msk.bf16.vlgmr.msra.gmra.mxu1 %vm90_vm0, %v73_v37 }
  0x92   :  { %v106_v40 = vpop.f32.mrf.mxu0  ;;  %v111_v41 = vpop.f32.mrf.mxu1 }
  0x93   :  { %v120_v42 = vmul.f32 %v172_v38, %v106_v40  ;;  %v122_v43 = vmul.f32 %v172_v38, %v111_v41 }
  0x95   :  { %v128_v44 = vadd.f32 %v173_v39, %v120_v42  ;;  %v130_v45 = vadd.f32 %v173_v39, %v122_v43 }
  0x97   :  { %v132_v46 = vmax.f32 %v128_v44, 0.0  ;;  %v134_v47 = vmax.f32 %v130_v45, 0.0 }
  0x99   :  { %v136_v48 = vpack.c.bf16 %v132_v46, %v132_v46  ;;  %v138_v49 = vpack.c.bf16 %v134_v47, %v134_v47 }
  0x9a   :  { %v108_v50 = vpop.f32.mrf.mxu0  ;;  %v113_v51 = vpop.f32.mrf.mxu1 }
  0x9b   :  { %141 = vst.msk [vmem:[%s255_s6] sm:$0xf] %vm140_vm1, %v136_v48  ;;  %v121_v52 = vmul.f32 %v172_v38, %v108_v50  ;;  %v123_v53 = vmul.f32 %v172_v38, %v113_v51 }
  0x9c   :  { %143 = vst.msk [vmem:[%s255_s6 + $0x8] sm:$0xf] %vm140_vm1, %v138_v49 }
  0x9d   :  { %v129_v54 = vadd.f32 %v173_v39, %v121_v52  ;;  %v131_v55 = vadd.f32 %v173_v39, %v123_v53 }
  0x9f   :  { %v133_v56 = vmax.f32 %v129_v54, 0.0  ;;  %v135_v57 = vmax.f32 %v131_v55, 0.0 }
  0xa1   :  { %v137_v58 = vpack.c.bf16 %v133_v56, %v133_v56  ;;  %v139_v59 = vpack.c.bf16 %v135_v57, %v135_v57 }
  0xa3   :  { %142 = vst.msk [vmem:[%s255_s6 + $0x4] sm:$0xf] %vm140_vm1, %v137_v58 }
  0xa4   :  { %144 = vst.msk [vmem:[%s255_s6 + $0xc] sm:$0xf] %vm140_vm1, %v139_v59 }

// kernel: densenet_forward.23
= control target key start
LH: loop header
LB: loop body
LE: loop exit
PB: predicated region body
PF: predicated region fallthrough
CT: control target
= control target key end

     0   :  { %s1185_s9 = smov 0   ;;  %s1386_s0 = inlined_call_operand.vmem [shape: bf16[2,6,6,16], index: 0, kind: input, shape index: {}]   ;;  %s1387_s1 = inlined_call_operand.vmem [shape: bf16[9,16,8], index: 1, kind: input, shape index: {}]   ;;  %s1388_s2 = inlined_call_operand.vmem [shape: bf16[2,4,4,8], index: 2, kind: output, shape index: {}]  }
   0x1 LB: > { %s1024_s10 = sadd.s32 4294967295, %s1168_s9   ;;  %p1028_p0 = scmp.ge.s32.totalorder %s1168_s9, 1  ;;  %s1168_s9 = sphi %s1185_s9, %s12_s9  }
   0x2   : > { %p112_p1 = scmp.lt.s32.totalorder %s1168_s9, 3 }
   0x4   : > { %p113_p2 = pnand %p1028_p0, %p112_p1 }
   0x5   : > { %p134_p3 = scmp.lt.s32.totalorder (!%p113_p2), %s1024_s10, 1 }
   0x6   : > { %116 = sbr.rel (%p113_p2) target bundleno = 271 (0x10f), region = 28 }
   0xb   : > { %v1145_v0 = vld [vmem:[%s1387_s1 + $0x8] sm:$0xff]  ;;  %s1394_s10 = smov (!%p134_p3, %s1024_s10), 1  ;;  %v1146_v1 = vld [vmem:[%s1387_s1 + $0x10] sm:$0xff]  ;;  %vm163_vm0 = vcmask 1041408   ;;  %vm167_vm1 = vcmask 1043458   ;;  %v1144_v58 = vld [vmem:[%s1387_s1] sm:$0xff] }
   0xc   : > { %279 = vmatpush.bf16.msra.mxu0 %v1145_v0  ;;  %s1153_s15 = smul.u32 24, %s1394_s10  ;;  %413 = vmatpush.bf16.msra.mxu2 %v1146_v1  ;;  %vm189_vm2 = vsmask.f32 1280  ;;  %vm190_vm3 = vsmask.f32 3336  ;;  %v1147_v59 = vld [vmem:[%s1387_s1 + $0x18] sm:$0xff] }
   0xd   : > { %vm192_vm4 = vsmask.f32 5392  ;;  %vm191_vm5 = vmor %vm189_vm2, %vm190_vm3  ;;  %vm194_vm7 = vsmask.f32 7448  ;;  %313 = vmatpush.bf16.msra.mxu1 %v1144_v58  ;;  %457 = vmatpush.bf16.msra.mxu3 %v1147_v59  ;;  %vm360_vm9 = vcmask 1040384   ;;  %vm361_vm10 = vcmask 1042434  }
   0xe   : > { %s1205_s18 = scalar_lea.vmem %s1386_s0, %s1153_s15  ;;  %vm193_vm6 = vmor %vm191_vm5, %vm192_vm4  ;;  %vm269_vm11 = vcmask 130048   ;;  %vm363_vm13 = vcmask 1044484   ;;  %vm365_vm15 = vcmask 1046534   ;;  %s1143_s5 = sshll.u32 %s1394_s10, 3 }
   0xf   : > { %v151_v2 = vld [vmem:[%s1205_s18] sm:$0x7]  ;;  %v152_v3 = vld [vmem:[%s1205_s18 + $0x4] sm:$0x7]  ;;  %v153_v4 = vld [vmem:[%s1205_s18 + $0x8] sm:$0x7]  ;;  %s143_s8 = scalar_lea.vmem %s1388_s2, %s1143_s5 }
  0x10   : > { %v154_v5 = vld [vmem:[%s1205_s18 + $0xc] sm:$0x7]  ;;  %v159_v6 = vrot.slane %v151_v2, 2  ;;  %v160_v7 = vrot.slane %v152_v3, 2  ;;  %v161_v8 = vrot.slane %v153_v4, 2  ;;  %vm1221_vm8 = vmor %vm193_vm6, %vm194_vm7 }
  0x11   : > { %v162_v9 = vrot.slane %v154_v5, 2  ;;  %v320_v61 = vld [vmem:[%s1205_s18] sm:$0x6]  ;;  %v321_v62 = vld [vmem:[%s1205_s18 + $0x4] sm:$0x6]  ;;  %vm362_vm12 = vmor %vm360_vm9, %vm361_vm10 }
  0x12   : > { %v166_v10 = vsel %vm163_vm0, %v151_v2, %v159_v6  ;;  %v168_v11 = vsel %vm167_vm1, %v151_v2, %v159_v6  ;;  %v173_v12 = vsel %vm163_vm0, %v152_v3, %v160_v7  ;;  %v174_v13 = vsel %vm167_vm1, %v152_v3, %v160_v7  ;;  %v322_v63 = vld [vmem:[%s1205_s18 + $0x8] sm:$0x6]  ;;  %v145_v0 = vld [vmem:[%s1205_s18] sm:$0x3]  ;;  %v323_v1 = vld [vmem:[%s1205_s18 + $0xc] sm:$0x6] }
  0x13   : > { %v170_v14 = vrot.slane %v168_v11, 2  ;;  %v176_v15 = vrot.slane %v174_v13, 2  ;;  %v179_v16 = vsel %vm163_vm0, %v153_v4, %v161_v8  ;;  %v180_v17 = vsel %vm167_vm1, %v153_v4, %v161_v8  ;;  %v146_v3 = vld [vmem:[%s1205_s18 + $0x4] sm:$0x3]  ;;  %v147_v4 = vld [vmem:[%s1205_s18 + $0x8] sm:$0x3]  ;;  %vm364_vm14 = vmor %vm362_vm12, %vm363_vm13 }
  0x14   : > { %v182_v18 = vrot.slane %v180_v17, 2  ;;  %v185_v19 = vsel %vm163_vm0, %v154_v5, %v162_v9  ;;  %v186_v20 = vsel %vm167_vm1, %v154_v5, %v162_v9  ;;  %v196_v21 = vshrl.u32 %v166_v10, 16  ;;  %v148_v8 = vld [vmem:[%s1205_s18 + $0xc] sm:$0x3]  ;;  %vm1260_vm2 = vmor %vm364_vm14, %vm365_vm15  ;;  %v1059_v59 = vld [vmem:[%s1205_s18 + $0x4] sm:$0x3] }
  0x15   : > { %v188_v22 = vrot.slane %v186_v20, 2  ;;  %v199_v23 = vshll.u32 %v166_v10, 16  ;;  %v205_v24 = vshll.u32 %v170_v14, 16  ;;  %v209_v25 = vshrl.u32 %v173_v12, 16 }
  0x16   : > { %v198_v26 = vrot.slane %v196_v21, 6  ;;  %v212_v27 = vshll.u32 %v173_v12, 16  ;;  %v218_v28 = vshll.u32 %v176_v15, 16  ;;  %v222_v29 = vshrl.u32 %v179_v16, 16  ;;  %v1148_v12 = vld [vmem:[%s1387_s1 + $0x20] sm:$0xff] }
  0x17   : > { %v201_v30 = vrot.slane %v199_v23, 7  ;;  %v211_v31 = vrot.slane %v209_v25, 6  ;;  %v225_v32 = vshll.u32 %v179_v16, 16  ;;  %v207_v33 = vrot.slane %v205_v24, 7  ;;  %584 = vmatpush.bf16.msrb.mxu0 %v1148_v12  ;;  %v1070_v21 = vld [vmem:[%s1205_s18 + $0x4] sm:$0x7] }
  0x18   : > { %v214_v34 = vrot.slane %v212_v27, 7  ;;  %v224_v35 = vrot.slane %v222_v29, 6  ;;  %v231_v36 = vshll.u32 %v182_v18, 16  ;;  %v235_v39 = vshrl.u32 %v185_v19, 16  ;;  %v1071_v25 = vld [vmem:[%s1205_s18 + $0x8] sm:$0x7] }
  0x19   : > { %v202_v37 = vor.u32 %v201_v30, %v198_v26  ;;  %v227_v38 = vrot.slane %v225_v32, 7  ;;  %v238_v40 = vshll.u32 %v185_v19, 16  ;;  %v220_v43 = vrot.slane %v218_v28, 7  ;;  %v1072_v28 = vld [vmem:[%s1205_s18 + $0xc] sm:$0x7] }
  0x1a   : > { %v215_v42 = vor.u32 %v214_v34, %v211_v31  ;;  %v233_v44 = vrot.slane %v231_v36, 7  ;;  %v244_v45 = vshll.u32 %v188_v22, 16  ;;  %v237_v48 = vrot.slane %v235_v39, 6  ;;  %v1073_v31 = vld [vmem:[%s1205_s18 + $0x10] sm:$0x7] }
  0x1b   : > { %v203_v46 = vrot.slane %v202_v37, 2  ;;  %v228_v47 = vor.u32 %v227_v38, %v224_v35  ;;  %v240_v49 = vrot.slane %v238_v40, 7  ;;  %v328_v2 = vrot.slane %v320_v61, 2  ;;  %v1062_v12 = vld [vmem:[%s1205_s18 + $0x10] sm:$0x3] }
  0x1c   : > { %v216_v50 = vrot.slane %v215_v42, 2  ;;  %v246_v54 = vrot.slane %v244_v45, 7  ;;  %v329_v5 = vrot.slane %v321_v62, 2  ;;  %v330_v7 = vrot.slane %v322_v63, 2  ;;  %v1150_v45 = vld [vmem:[%s1387_s1 + $0x30] sm:$0xff] }
  0x1d   : > { %v208_v51 = vsel %vm1221_vm8, %v203_v46, %v207_v33  ;;  %v229_v52 = vrot.slane %v228_v47, 2  ;;  %v241_v53 = vor.u32 %v240_v49, %v237_v48  ;;  %v331_v9 = vrot.slane %v323_v1, 2  ;;  %723 = vmatpush.bf16.msrb.mxu2 %v1150_v45 }
  0x1e   : > { %v221_v55 = vsel %vm1221_vm8, %v216_v50, %v220_v43  ;;  %252 = vst [vmem:[#allocation1] ss:$4 sm:$0xff] %v208_v51  ;;  %v334_v10 = vsel %vm163_vm0, %v320_v61, %v328_v2  ;;  %v336_v11 = vsel %vm167_vm1, %v320_v61, %v328_v2  ;;  %v341_v13 = vsel %vm163_vm0, %v321_v62, %v329_v5 }
  0x1f   : > { %v234_v56 = vsel %vm1221_vm8, %v229_v52, %v233_v44  ;;  %v242_v57 = vrot.slane %v241_v53, 2  ;;  %255 = vst [vmem:[#allocation1 + $0x1] ss:$4 sm:$0xff] %v221_v55  ;;  %v343_v14 = vsel %vm167_vm1, %v321_v62, %v329_v5  ;;  %v348_v15 = vsel %vm163_vm0, %v322_v63, %v330_v7  ;;  %v1149_v44 = vld [vmem:[%s1387_s1 + $0x28] sm:$0xff] }
  0x20   : > { %258 = vst [vmem:[#allocation1 + $0x2] ss:$4 sm:$0xff] %v234_v56  ;;  %v350_v16 = vsel %vm167_vm1, %v322_v63, %v330_v7  ;;  %v355_v17 = vsel %vm163_vm0, %v323_v1, %v331_v9  ;;  %v357_v18 = vsel %vm167_vm1, %v323_v1, %v331_v9  ;;  %v1044_v19 = vrot.slane %v334_v10, 9  ;;  %679 = vmatpush.bf16.msrb.mxu1 %v1149_v44 }
  0x21   : > { %v247_v60 = vsel %vm1221_vm8, %v242_v57, %v246_v54  ;;  %v1045_v20 = vrot.slane %v336_v11, 9  ;;  %v1046_v23 = vrot.slane %v341_v13, 9  ;;  %v1047_v24 = vrot.slane %v343_v14, 9 }
  0x22   : > { %261 = vst [vmem:[#allocation1 + $0x3] ss:$4 sm:$0xff] %v247_v60  ;;  %v1048_v26 = vrot.slane %v348_v15, 9  ;;  %v1049_v27 = vrot.slane %v350_v16, 9  ;;  %v1050_v29 = vrot.slane %v355_v17, 9  ;;  %v1051_v30 = vrot.slane %v357_v18, 9 }
  0x23   : > { %v474_v32 = vrot.slane %v1070_v21, 2  ;;  %v370_v33 = vsel %vm1260_vm2, %v1044_v19, %v1045_v20  ;;  %v475_v34 = vrot.slane %v1071_v25, 2  ;;  %v374_v35 = vsel %vm1260_vm2, %v1046_v23, %v1047_v24  ;;  %v1151_v17 = vld [vmem:[%s1387_s1 + $0x38] sm:$0xff] }
  0x24   : > { %v476_v36 = vrot.slane %v1072_v28, 2  ;;  %v378_v38 = vsel %vm1260_vm2, %v1048_v26, %v1049_v27  ;;  %v477_v39 = vrot.slane %v1073_v31, 2  ;;  %v382_v40 = vsel %vm1260_vm2, %v1050_v29, %v1051_v30  ;;  %850 = vmatpush.bf16.msrb.mxu3 %v1151_v17  ;;  %v1081_v27 = vld [vmem:[%s1205_s18 + $0x4] sm:$0x6]  ;;  %v1082_v30 = vld [vmem:[%s1205_s18 + $0x8] sm:$0x6] }
  0x25   : > { %v480_v42 = vsel %vm163_vm0, %v1070_v21, %v474_v32  ;;  %v486_v43 = vsel %vm163_vm0, %v1071_v25, %v475_v34  ;;  %v481_v50 = vsel %vm167_vm1, %v1070_v21, %v474_v32  ;;  %v487_v53 = vsel %vm167_vm1, %v1071_v25, %v475_v34 }
  0x26   : > { %v492_v46 = vsel %vm163_vm0, %v1072_v28, %v476_v36  ;;  %v498_v47 = vsel %vm163_vm0, %v1073_v31, %v477_v39  ;;  %v502_v48 = vshrl.u32 %v480_v42, 16  ;;  %v505_v49 = vshll.u32 %v480_v42, 16 }
  0x27   : > { %v515_v51 = vshrl.u32 %v486_v43, 16  ;;  %v518_v52 = vshll.u32 %v486_v43, 16  ;;  %v528_v54 = vshrl.u32 %v492_v46, 16  ;;  %v531_v55 = vshll.u32 %v492_v46, 16 }
  0x28   : > { %v493_v56 = vsel %vm167_vm1, %v1072_v28, %v476_v36  ;;  %v541_v57 = vshrl.u32 %v498_v47, 16  ;;  %v544_v58 = vshll.u32 %v498_v47, 16  ;;  %v483_v60 = vrot.slane %v481_v50, 2  ;;  %v1152_v47 = vld [vmem:[%s1387_s1 + $0x40] sm:$0xff] }
  0x29   : > { %v262_v6 = vld.sshfl [vmem:[#allocation1] sm:$0xff pattern:$0x73625140]  ;;  %v499_v61 = vsel %vm167_vm1, %v1073_v31, %v477_v39  ;;  %v504_v62 = vrot.slane %v502_v48, 6  ;;  %v507_v63 = vrot.slane %v505_v49, 7  ;;  %v489_v1 = vrot.slane %v487_v53, 2 }
  0x2a   : > { %1038 = vmatmul.msk.bf16.vlgmr.msra.gmra.mxu0 %vm269_vm11, %v262_v6  ;;  %287 = vst [vmem:[#allocation1] ss:$4 sm:$0xff] %v145_v0  ;;  %v1060_v0 = vld [vmem:[%s1205_s18 + $0x8] sm:$0x3]  ;;  %v517_v2 = vrot.slane %v515_v51, 6  ;;  %v495_v5 = vrot.slane %v493_v56, 2 }
  0x2b   : > { %290 = vst [vmem:[#allocation1 + $0x1] ss:$4 sm:$0xff] %v146_v3  ;;  %v520_v3 = vrot.slane %v518_v52, 7  ;;  %v530_v6 = vrot.slane %v528_v54, 6  ;;  %v533_v7 = vrot.slane %v531_v55, 7  ;;  %v501_v9 = vrot.slane %v499_v61, 2  ;;  %945 = vmatpush.bf16.msra.mxu0 %v1152_v47 }
  0x2c   : > { %293 = vst [vmem:[#allocation1 + $0x2] ss:$4 sm:$0xff] %v147_v4  ;;  %v1061_v4 = vld [vmem:[%s1205_s18 + $0xc] sm:$0x3]  ;;  %v543_v10 = vrot.slane %v541_v57, 6  ;;  %v546_v11 = vrot.slane %v544_v58, 7  ;;  %v508_v13 = vor.u32 %v507_v63, %v504_v62 }
  0x2d   : > { %296 = vst [vmem:[#allocation1 + $0x3] ss:$4 sm:$0xff] %v148_v8  ;;  %v511_v14 = vshll.u32 %v483_v60, 16  ;;  %v521_v15 = vor.u32 %v520_v3, %v517_v2  ;;  %v524_v16 = vshll.u32 %v489_v1, 16  ;;  %v534_v18 = vor.u32 %v533_v7, %v530_v6  ;;  %v1111_v56 = vld [vmem:[%s1205_s18 + $0x8] sm:$0x7] }
  0x2e   : > { %v537_v19 = vshll.u32 %v495_v5, 16  ;;  %v547_v20 = vor.u32 %v546_v11, %v543_v10  ;;  %v550_v21 = vshll.u32 %v501_v9, 16  ;;  %v509_v23 = vrot.slane %v508_v13, 2  ;;  %v1113_v62 = vld [vmem:[%s1205_s18 + $0x10] sm:$0x7] }
  0x2f   : > { %v513_v24 = vrot.slane %v511_v14, 7  ;;  %v522_v25 = vrot.slane %v521_v15, 2  ;;  %v526_v26 = vrot.slane %v524_v16, 7  ;;  %v535_v28 = vrot.slane %v534_v18, 2  ;;  %v1114_v1 = vld [vmem:[%s1205_s18 + $0x14] sm:$0x7] }
  0x30   : > { %v539_v29 = vrot.slane %v537_v19, 7  ;;  %v548_v31 = vrot.slane %v547_v20, 2  ;;  %v552_v32 = vrot.slane %v550_v21, 7  ;;  %v601_v36 = vrot.slane %v1081_v27, 2 }
  0x31   : > { %v514_v34 = vsel %vm1221_vm8, %v509_v23, %v513_v24  ;;  %v740_v2 = vrot.slane %v1111_v56, 2  ;;  %v742_v6 = vrot.slane %v1113_v62, 2  ;;  %v743_v9 = vrot.slane %v1114_v1, 2 }
  0x32   : > { %v553_v43 = vsel %vm1221_vm8, %v548_v31, %v552_v32  ;;  %v607_v45 = vsel %vm163_vm0, %v1081_v27, %v601_v36  ;;  %v609_v46 = vsel %vm167_vm1, %v1081_v27, %v601_v36  ;;  %v1100_v27 = vld [vmem:[%s1205_s18 + $0x8] sm:$0x3]  ;;  %v1101_v32 = vld [vmem:[%s1205_s18 + $0xc] sm:$0x3]  ;;  %v1102_v36 = vld [vmem:[%s1205_s18 + $0x10] sm:$0x3] }
  0x33   : > { %v1085_v54 = vrot.slane %v607_v45, 9  ;;  %v1086_v55 = vrot.slane %v609_v46, 9  ;;  %v746_v11 = vsel %vm163_vm0, %v1111_v56, %v740_v2  ;;  %v758_v13 = vsel %vm163_vm0, %v1113_v62, %v742_v6  ;;  %v1103_v45 = vld [vmem:[%s1205_s18 + $0x14] sm:$0x3] }
  0x34   : > { %v297_v37 = vld.sshfl [vmem:[#allocation1] sm:$0xff pattern:$0x73625140]  ;;  %v764_v14 = vsel %vm163_vm0, %v1114_v1, %v743_v9  ;;  %v768_v15 = vshrl.u32 %v746_v11, 16  ;;  %v771_v16 = vshll.u32 %v746_v11, 16  ;;  %v747_v17 = vsel %vm167_vm1, %v1111_v56, %v740_v2 }
  0x35   : > { %387 = vst [vmem:[#allocation1] ss:$4 sm:$0xff] %v370_v33  ;;  %1043 = vmatmul.msk.bf16.vlgmr.msra.gmra.mxu1 %vm269_vm11, %v297_v37  ;;  %v1083_v33 = vld [vmem:[%s1205_s18 + $0xc] sm:$0x6]  ;;  %v527_v37 = vsel %vm1221_vm8, %v522_v25, %v526_v26  ;;  %v636_v3 = vsel %vm1260_vm2, %v1085_v54, %v1086_v55  ;;  %v794_v21 = vshrl.u32 %v758_v13, 16  ;;  %v797_v23 = vshll.u32 %v758_v13, 16 }
  0x36   : > { %390 = vst [vmem:[#allocation1 + $0x1] ss:$4 sm:$0xff] %v374_v35  ;;  %v1084_v35 = vld [vmem:[%s1205_s18 + $0x10] sm:$0x6]  ;;  %v603_v42 = vrot.slane %v1083_v33, 2  ;;  %v759_v24 = vsel %vm167_vm1, %v1113_v62, %v742_v6  ;;  %v807_v25 = vshrl.u32 %v764_v14, 16 }
  0x37   : > { %393 = vst [vmem:[#allocation1 + $0x2] ss:$4 sm:$0xff] %v378_v38  ;;  %v602_v38 = vrot.slane %v1082_v30, 2  ;;  %v604_v44 = vrot.slane %v1084_v35, 2  ;;  %v810_v26 = vshll.u32 %v764_v14, 16  ;;  %v773_v31 = vrot.slane %v771_v16, 7 }
  0x38   : > { %396 = vst [vmem:[#allocation1 + $0x3] ss:$4 sm:$0xff] %v382_v40  ;;  %v540_v40 = vsel %vm1221_vm8, %v535_v28, %v539_v29  ;;  %v621_v50 = vsel %vm163_vm0, %v1083_v33, %v603_v42  ;;  %v623_v51 = vsel %vm167_vm1, %v1083_v33, %v603_v42  ;;  %v749_v28 = vrot.slane %v747_v17, 2  ;;  %v1125_v2 = vld [vmem:[%s1205_s18 + $0x14] sm:$0x6] }
  0x39   : > { %v614_v48 = vsel %vm163_vm0, %v1082_v30, %v602_v38  ;;  %v616_v49 = vsel %vm167_vm1, %v1082_v30, %v602_v38  ;;  %v628_v52 = vsel %vm163_vm0, %v1084_v35, %v604_v44  ;;  %v630_v53 = vsel %vm167_vm1, %v1084_v35, %v604_v44 }
  0x3a   : > { %v1087_v57 = vrot.slane %v614_v48, 9  ;;  %v1088_v58 = vrot.slane %v616_v49, 9  ;;  %v1089_v60 = vrot.slane %v621_v50, 9  ;;  %v1090_v61 = vrot.slane %v623_v51, 9 }
  0x3b   : > { %v1091_v63 = vrot.slane %v628_v52, 9  ;;  %v765_v29 = vsel %vm167_vm1, %v1114_v1, %v743_v9  ;;  %v770_v30 = vrot.slane %v768_v15, 6  ;;  %v796_v38 = vrot.slane %v794_v21, 6 }
  0x3c   : > { %v640_v5 = vsel %vm1260_vm2, %v1087_v57, %v1088_v58  ;;  %v767_v42 = vrot.slane %v765_v29, 2  ;;  %v812_v44 = vrot.slane %v810_v26, 7  ;;  %v777_v47 = vshll.u32 %v749_v28, 16  ;;  %v1122_v58 = vld [vmem:[%s1205_s18 + $0x8] sm:$0x6] }
  0x3d   : > { %v774_v46 = vor.u32 %v773_v31, %v770_v30 }
  0x3e   : > { %v779_v55 = vrot.slane %v777_v47, 7 }
  0x3f   : > { %v397_v8 = vld.sshfl [vmem:[#allocation1] sm:$0xff pattern:$0x73625140]  ;;  %v775_v54 = vrot.slane %v774_v46, 2 }
  0x40   : > { %1058 = vmatmul.msk.bf16.vlgmr.msra.gmra.mxu2 %vm269_vm11, %v397_v8  ;;  %431 = vst [vmem:[#allocation1] ss:$4 sm:$0xff] %v1059_v59  ;;  %v1112_v59 = vld [vmem:[%s1205_s18 + $0xc] sm:$0x7]  ;;  %v644_v8 = vsel %vm1260_vm2, %v1089_v60, %v1090_v61 }
  0x41   : > { %434 = vst [vmem:[#allocation1 + $0x1] ss:$4 sm:$0xff] %v1060_v0  ;;  %v1092_v0 = vrot.slane %v630_v53, 9  ;;  %v816_v53 = vshll.u32 %v767_v42, 16  ;;  %v1123_v61 = vld [vmem:[%s1205_s18 + $0xc] sm:$0x6]  ;;  %v780_v1 = vsel %vm1221_vm8, %v775_v54, %v779_v55 }
  0x42   : > { %437 = vst [vmem:[#allocation1 + $0x2] ss:$4 sm:$0xff] %v1061_v4  ;;  %v741_v4 = vrot.slane %v1112_v59, 2 }
  0x43   : > { %440 = vst [vmem:[#allocation1 + $0x3] ss:$4 sm:$0xff] %v1062_v12  ;;  %v648_v10 = vsel %vm1260_vm2, %v1091_v63, %v1092_v0  ;;  %v818_v63 = vrot.slane %v816_v53, 7  ;;  %v1124_v0 = vld [vmem:[%s1205_s18 + $0x10] sm:$0x6] }
  0x44   : > { %v752_v12 = vsel %vm163_vm0, %v1112_v59, %v741_v4  ;;  %v753_v20 = vsel %vm167_vm1, %v1112_v59, %v741_v4 }
  0x45   : > { %v781_v18 = vshrl.u32 %v752_v12, 16  ;;  %v784_v19 = vshll.u32 %v752_v12, 16  ;;  %v755_v33 = vrot.slane %v753_v20, 2 }
  0x47   : > { %v786_v35 = vrot.slane %v784_v19, 7  ;;  %v790_v49 = vshll.u32 %v755_v33, 16 }
  0x49   : > { %v792_v57 = vrot.slane %v790_v49, 7 }
  0x4a   : > { %v441_v39 = vld.sshfl [vmem:[#allocation1] sm:$0xff pattern:$0x73625140] }
  0x4b   : > { %1069 = vmatmul.msk.bf16.vlgmr.msra.gmra.mxu3 %vm269_vm11, %v441_v39  ;;  %558 = vst [vmem:[#allocation1] ss:$4 sm:$0xff] %v514_v34  ;;  %v783_v34 = vrot.slane %v781_v18, 6  ;;  %v799_v39 = vrot.slane %v797_v23, 7 }
  0x4c   : > { %561 = vst [vmem:[#allocation1 + $0x1] ss:$4 sm:$0xff] %v527_v37  ;;  %v761_v37 = vrot.slane %v759_v24, 2 }
  0x4d   : > { %564 = vst [vmem:[#allocation1 + $0x2] ss:$4 sm:$0xff] %v540_v40  ;;  %v787_v48 = vor.u32 %v786_v35, %v783_v34  ;;  %v800_v50 = vor.u32 %v799_v39, %v796_v38 }
  0x4e   : > { %567 = vst [vmem:[#allocation1 + $0x3] ss:$4 sm:$0xff] %v553_v43  ;;  %v809_v43 = vrot.slane %v807_v25, 6  ;;  %v803_v51 = vshll.u32 %v761_v37, 16 }
  0x4f   : > { %v788_v56 = vrot.slane %v787_v48, 2  ;;  %v801_v59 = vrot.slane %v800_v50, 2 }
  0x50   : > { %v813_v52 = vor.u32 %v812_v44, %v809_v43  ;;  %v805_v60 = vrot.slane %v803_v51, 7 }
  0x51   : > { %v793_v4 = vsel %vm1221_vm8, %v788_v56, %v792_v57 }
  0x52   : > { %v814_v62 = vrot.slane %v813_v52, 2 }
  0x54   : > { %v819_v9 = vsel %vm1221_vm8, %v814_v62, %v818_v63 }
  0x55   : > { %v568_v7 = vld.sshfl [vmem:[#allocation1] sm:$0xff pattern:$0x73625140] }
  0x56   : > { %1080 = vmatmul.msk.bf16.vlgmr.msrb.gmra.mxu0 %vm269_vm11, %v568_v7  ;;  %653 = vst [vmem:[#allocation1] ss:$4 sm:$0xff] %v636_v3  ;;  %v867_v3 = vrot.slane %v1122_v58, 2  ;;  %v806_v7 = vsel %vm1221_vm8, %v801_v59, %v805_v60 }
  0x57   : > { %656 = vst [vmem:[#allocation1 + $0x1] ss:$4 sm:$0xff] %v640_v5  ;;  %v868_v5 = vrot.slane %v1123_v61, 2 }
  0x58   : > { %659 = vst [vmem:[#allocation1 + $0x2] ss:$4 sm:$0xff] %v644_v8  ;;  %v869_v8 = vrot.slane %v1124_v0, 2  ;;  %v873_v11 = vsel %vm163_vm0, %v1122_v58, %v867_v3  ;;  %v875_v12 = vsel %vm167_vm1, %v1122_v58, %v867_v3 }
  0x59   : > { %662 = vst [vmem:[#allocation1 + $0x3] ss:$4 sm:$0xff] %v648_v10  ;;  %v870_v10 = vrot.slane %v1125_v2, 2  ;;  %v880_v13 = vsel %vm163_vm0, %v1123_v61, %v868_v5  ;;  %v882_v14 = vsel %vm167_vm1, %v1123_v61, %v868_v5  ;;  %v1126_v18 = vrot.slane %v873_v11, 9 }
  0x5a   : > { %v887_v15 = vsel %vm163_vm0, %v1124_v0, %v869_v8  ;;  %v889_v16 = vsel %vm167_vm1, %v1124_v0, %v869_v8  ;;  %v1127_v19 = vrot.slane %v875_v12, 9  ;;  %v1128_v20 = vrot.slane %v880_v13, 9 }
  0x5b   : > { %v894_v41 = vsel %vm163_vm0, %v1125_v2, %v870_v10  ;;  %v896_v17 = vsel %vm167_vm1, %v1125_v2, %v870_v10  ;;  %v1129_v21 = vrot.slane %v882_v14, 9  ;;  %v1130_v23 = vrot.slane %v887_v15, 9 }
  0x5c   : > { %v1131_v24 = vrot.slane %v889_v16, 9  ;;  %v1132_v25 = vrot.slane %v894_v41, 9  ;;  %v1133_v26 = vrot.slane %v896_v17, 9  ;;  %vm964_vm0 = vcmask 58368  }
  0x5d   : > { %v906_v28 = vsel %vm1260_vm2, %v1128_v20, %v1129_v21 }
  0x5e   : > { %v910_v30 = vsel %vm1260_vm2, %v1130_v23, %v1131_v24  ;;  %v914_v31 = vsel %vm1260_vm2, %v1132_v25, %v1133_v26 }
  0x60   : > { %v663_v40 = vld.sshfl [vmem:[#allocation1] sm:$0xff pattern:$0x73625140] }
  0x61   : > { %1099 = vmatmul.msk.bf16.vlgmr.msrb.gmra.mxu1 %vm269_vm11, %v663_v40  ;;  %697 = vst [vmem:[#allocation1] ss:$4 sm:$0xff] %v1100_v27  ;;  %v902_v27 = vsel %vm1260_vm2, %v1126_v18, %v1127_v19 }
  0x62   : > { %700 = vst [vmem:[#allocation1 + $0x1] ss:$4 sm:$0xff] %v1101_v32 }
  0x63   : > { %703 = vst [vmem:[#allocation1 + $0x2] ss:$4 sm:$0xff] %v1102_v36 }
  0x64   : > { %706 = vst [vmem:[#allocation1 + $0x3] ss:$4 sm:$0xff] %v1103_v45 }
  0x6b   : > { %v707_v6 = vld.sshfl [vmem:[#allocation1] sm:$0xff pattern:$0x73625140] }
  0x6c   : > { %1110 = vmatmul.msk.bf16.vlgmr.msrb.gmra.mxu2 %vm269_vm11, %v707_v6  ;;  %824 = vst [vmem:[#allocation1] ss:$4 sm:$0xff] %v780_v1 }
  0x6d   : > { %827 = vst [vmem:[#allocation1 + $0x1] ss:$4 sm:$0xff] %v793_v4 }
  0x6e   : > { %830 = vst [vmem:[#allocation1 + $0x2] ss:$4 sm:$0xff] %v806_v7 }
  0x6f   : > { %833 = vst [vmem:[#allocation1 + $0x3] ss:$4 sm:$0xff] %v819_v9 }
  0x76   : > { %v834_v29 = vld.sshfl [vmem:[#allocation1] sm:$0xff pattern:$0x73625140] }
  0x77   : > { %1121 = vmatmul.msk.bf16.vlgmr.msrb.gmra.mxu3 %vm269_vm11, %v834_v29  ;;  %919 = vst [vmem:[#allocation1] ss:$4 sm:$0xff] %v902_v27 }
  0x78   : > { %922 = vst [vmem:[#allocation1 + $0x1] ss:$4 sm:$0xff] %v906_v28 }
  0x79   : > { %925 = vst [vmem:[#allocation1 + $0x2] ss:$4 sm:$0xff] %v910_v30 }
  0x7a   : > { %928 = vst [vmem:[#allocation1 + $0x3] ss:$4 sm:$0xff] %v914_v31 }
  0x81   : > { %v929_v32 = vld.sshfl [vmem:[#allocation1] sm:$0xff pattern:$0x73625140] }
  0x82   : > { %1140 = vmatmul.msk.bf16.vlgmr.msra.gmra.mxu0 %vm269_vm11, %v929_v32 }
  0xa7   : > { %v281_v33 = vpop.f32.mrf.mxu0 }
  0xaf   : > { %v283_v35 = vpop.f32.mrf.mxu0 }
  0xb2   : > { %v315_v34 = vpop.f32.mrf.mxu1 }
  0xb3   : > { %v316_v37 = vadd.f32 %v315_v34, %v281_v33 }
  0xba   : > { %v317_v39 = vpop.f32.mrf.mxu1 }
  0xbb   : > { %v318_v46 = vadd.f32 %v317_v39, %v283_v35 }
  0xc3   : > { %v415_v36 = vpop.f32.mrf.mxu2 }
  0xc4   : > { %v420_v40 = vadd.f32 %v415_v36, %v316_v37 }
  0xcb   : > { %v417_v43 = vpop.f32.mrf.mxu2 }
  0xcc   : > { %v421_v50 = vadd.f32 %v417_v43, %v318_v46 }
  0xce   : > { %v459_v38 = vpop.f32.mrf.mxu3 }
  0xcf   : > { %v464_v22 = vadd.f32 %v459_v38, %v420_v40 }
  0xd3   : > { %v586_v42 = vpop.f32.mrf.mxu0 }
  0xd4   : > { %v591_v47 = vadd.f32 %v586_v42, %v464_v22 }
  0xd6   : > { %v461_v44 = vpop.f32.mrf.mxu3 }
  0xd7   : > { %v465_v52 = vadd.f32 %v461_v44, %v421_v50 }
  0xdb   : > { %v588_v49 = vpop.f32.mrf.mxu0 }
  0xdc   : > { %v592_v57 = vadd.f32 %v588_v49, %v465_v52 }
  0xde   : > { %v681_v45 = vpop.f32.mrf.mxu1 }
  0xdf   : > { %v686_v51 = vadd.f32 %v681_v45, %v591_v47 }
  0xe6   : > { %v683_v56 = vpop.f32.mrf.mxu1 }
  0xe7   : > { %v687_v60 = vadd.f32 %v683_v56, %v592_v57 }
  0xef   : > { %v725_v48 = vpop.f32.mrf.mxu2 }
  0xf0   : > { %v730_v53 = vadd.f32 %v725_v48, %v686_v51 }
  0xf7   : > { %v727_v58 = vpop.f32.mrf.mxu2 }
  0xf8   : > { %v731_v62 = vadd.f32 %v727_v58, %v687_v60 }
  0xfa   : > { %v852_v54 = vpop.f32.mrf.mxu3 }
  0xfb   : > { %v857_v55 = vadd.f32 %v852_v54, %v730_v53 }
  0xff   : > { %v947_v59 = vpop.f32.mrf.mxu0 }
 0x100   : > { %v952_v61 = vadd.f32 %v947_v59, %v857_v55 }
 0x102   : > { %v956_v63 = vrot.slane %v952_v61, 4  ;;  %v960_v0 = vpack.c.bf16 %v952_v61, %v952_v61  ;;  %v854_v1 = vpop.f32.mrf.mxu3 }
 0x103   : > { %v858_v3 = vadd.f32 %v854_v1, %v731_v62 }
 0x104   : > { %v961_v2 = vpack.c.bf16 %v956_v63, %v956_v63  ;;  %965 = vst.msk [vmem:[%s143_s8] sm:$0x3] %vm964_vm0, %v960_v0 }
 0x106   : > { %966 = vst.msk [vmem:[%s143_s8 + $0x2] sm:$0x3] %vm964_vm0, %v961_v2 }
 0x107   : > { %v949_v4 = vpop.f32.mrf.mxu0 }
 0x108   : > { %v953_v5 = vadd.f32 %v949_v4, %v858_v3 }
 0x10a   : > { %v957_v6 = vrot.slane %v953_v5, 4  ;;  %v962_v7 = vpack.c.bf16 %v953_v5, %v953_v5 }
 0x10c   : > { %v963_v8 = vpack.c.bf16 %v957_v6, %v957_v6  ;;  %967 = vst.msk [vmem:[%s143_s8 + $0x4] sm:$0x3] %vm964_vm0, %v962_v7 }
 0x10e   : > { %968 = vst.msk [vmem:[%s143_s8 + $0x6] sm:$0x3] %vm964_vm0, %v963_v8 }
 0x10f PF: > { %s12_s9 = sadd.s32 1, %s1168_s9  }
 0x110   : > { %p9_p4 = scmp.ge.s32.totalorder %s12_s9, 4  }
 0x112   :  { %11 = sbr.rel (!%p9_p4) target bundleno = 1 (0x1), region = 95 }

// kernel: densenet_forward.26
= control target key start
LH: loop header
LB: loop body
LE: loop exit
PB: predicated region body
PF: predicated region fallthrough
CT: control target
= control target key end

     0   :  { %s308_s12 = smov 0   ;;  %s335_s0 = inlined_call_operand.vmem [shape: bf16[2,4,4,32], index: 0, kind: input, shape index: {}]   ;;  %s336_s1 = inlined_call_operand.vmem [shape: f32[1,1,32], index: 1, kind: input, shape index: {}]   ;;  %s337_s2 = inlined_call_operand.vmem [shape: f32[1,1,32], index: 2, kind: input, shape index: {}]   ;;  %s338_s3 = inlined_call_operand.vmem [shape: f32[2,1,32], index: 3, kind: output, shape index: {}]  }
   0x1 LB: > { %s260_s13 = sadd.s32 4294967295, %s286_s12   ;;  %p264_p0 = scmp.ge.s32.totalorder %s286_s12, 1  ;;  %s286_s12 = sphi %s308_s12, %s13_s12  }
   0x2   : > { %p137_p1 = scmp.lt.s32.totalorder %s286_s12, 3 }
   0x4   : > { %p138_p2 = pnand %p264_p0, %p137_p1 }
   0x5   : > { %p159_p3 = scmp.lt.s32.totalorder (!%p138_p2), %s260_s13, 1 }
   0x6   : > { %141 = sbr.rel (%p138_p2) target bundleno = 46 (0x2e), region = 32 }
   0xb   : > { %s340_s13 = smov (!%p159_p3, %s260_s13), 1  ;;  %v278_v0 = vld [vmem:[%s336_s1] ss:$0 sm:$0xff]  ;;  %vm195_vm0 = vcmask 257024   ;;  %vm211_vm1 = vcmask 253952  }
   0xc   : > { %s269_s14 = sshll.u32 %s340_s13, 3  ;;  %v279_v8 = vld [vmem:[%s337_s2] ss:$0 sm:$0xff]  ;;  %s166_s24 = scalar_lea.vmem %s338_s3, %s340_s13 }
   0xd   : > { %s163_s17 = scalar_lea.vmem %s335_s0, %s269_s14 }
   0xe   : > { %v167_v1 = vld [vmem:[%s163_s17] sm:$0x3]  ;;  %v168_v2 = vld [vmem:[%s163_s17 + $0x2] sm:$0x3]  ;;  %v169_v3 = vld [vmem:[%s163_s17 + $0x4] sm:$0x3] }
   0xf   : > { %v170_v4 = vld [vmem:[%s163_s17 + $0x6] sm:$0x3]  ;;  %v171_v5 = vunpack.c.l.bf16 %v167_v1  ;;  %v172_v6 = vunpack.c.l.bf16 %v168_v2  ;;  %v173_v7 = vunpack.c.l.bf16 %v169_v3 }
  0x10   : > { %v174_v9 = vunpack.c.l.bf16 %v170_v4 }
  0x11   : > { %v179_v10 = vmul.f32 %v278_v0, %v171_v5  ;;  %v180_v11 = vmul.f32 %v278_v0, %v172_v6  ;;  %v181_v12 = vmul.f32 %v278_v0, %v173_v7 }
  0x12   : > { %v182_v13 = vmul.f32 %v278_v0, %v174_v9 }
  0x13   : > { %v187_v14 = vadd.f32 %v279_v8, %v179_v10  ;;  %v188_v15 = vadd.f32 %v279_v8, %v180_v11  ;;  %v189_v16 = vadd.f32 %v279_v8, %v181_v12 }
  0x14   : > { %v190_v17 = vadd.f32 %v279_v8, %v182_v13 }
  0x15   : > { %v191_v18 = vmax.f32 %v187_v14, 0.0  ;;  %v192_v19 = vmax.f32 %v188_v15, 0.0  ;;  %v193_v20 = vmax.f32 %v189_v16, 0.0 }
  0x16   : > { %v194_v21 = vmax.f32 %v190_v17, 0.0 }
  0x17   : > { %v196_v22 = vsel %vm195_vm0, %v191_v18, 0.0  ;;  %v197_v23 = vsel %vm195_vm0, %v192_v19, 0.0  ;;  %v199_v24 = vsel %vm195_vm0, %v193_v20, 0.0 }
  0x18   : > { %v198_v25 = vadd.f32 %v197_v23, %v196_v22  ;;  %v201_v26 = vsel %vm195_vm0, %v194_v21, 0.0 }
  0x1a   : > { %v200_v27 = vadd.f32 %v199_v24, %v198_v25 }
  0x1c   : > { %v202_v28 = vadd.f32 %v201_v26, %v200_v27 }
  0x1e   : > { %v203_v29 = vsel %vm195_vm0, %v202_v28, 0.0 }
  0x1f   : > { %v204_v30 = vrot.slane %v203_v29, 4 }
  0x21   : > { %v205_v31 = vadd.f32 %v204_v30, %v203_v29 }
  0x23   : > { %v206_v32 = vrot.slane %v205_v31, 2 }
  0x25   : > { %v207_v33 = vadd.f32 %v206_v32, %v205_v31 }
  0x27   : > { %v208_v34 = vrot.slane %v207_v33, 1 }
  0x29   : > { %v209_v35 = vadd.f32 %v208_v34, %v207_v33 }
  0x2b   : > { %v210_v36 = vmul.f32 0.0625, %v209_v35 }
  0x2d   : > { %212 = vst.msk [vmem:[%s166_s24] sm:$0x1] %vm211_vm1, %v210_v36 }
  0x2e PF: > { %s13_s12 = sadd.s32 1, %s286_s12  }
  0x2f   : > { %p10_p4 = scmp.ge.s32.totalorder %s13_s12, 4  }
  0x31   :  { %12 = sbr.rel (!%p10_p4) target bundleno = 1 (0x1), region = 62 }

// kernel: densenet_forward.27
= control target key start
LH: loop header
LB: loop body
LE: loop exit
PB: predicated region body
PF: predicated region fallthrough
CT: control target
= control target key end

     0   :  { %s182_s0 = inlined_call_operand.vmem [shape: f32[2,32], index: 0, kind: input, shape index: {}]   ;;  %s183_s1 = inlined_call_operand.vmem [shape: bf16[32,10], index: 1, kind: input, shape index: {}]   ;;  %s184_s2 = inlined_call_operand.vmem [shape: f32[1,32], index: 2, kind: input, shape index: {}]   ;;  %s185_s3 = inlined_call_operand.vmem [shape: f32[1,32], index: 3, kind: input, shape index: {}]   ;;  %s186_s4 = inlined_call_operand.vmem [shape: f32[1,10], index: 4, kind: input, shape index: {}]   ;;  %s187_s5 = inlined_call_operand.vmem [shape: f32[1,10], index: 5, kind: input, shape index: {}]   ;;  %s188_s6 = inlined_call_operand.hbm [shape: f32[2,10], index: 6, kind: output, shape index: {}]  }
   0x1   :  { %v98_v0 = vld [vmem:[%s183_s1 + $0x8] sm:$0xff] }
   0x2   :  { %11 = vsyncpa [#allocation3], 0  ;;  %53 = vmatpush.bf16.msra.mxu0 %v98_v0  ;;  %v97_v1 = vld [vmem:[%s183_s1] sm:$0xff]  ;;  %vm43_vm0 = vcmask 261120   ;;  %s128_s29 = smov [#allocation2]   ;;  %s79_s8 = sshll.u32 %s188_s6, 4  ;;  %s80_s8 = int_to_ptr.hbm [resolvable:$true] %s79_s8 }
   0x3   :  { %v25_v2 = vld [vmem:[%s182_s0] sm:$0x3]  ;;  %s77_s30 = sshll.u32 %s128_s29, 4  ;;  %vm70_vm1 = vcmask 74752   ;;  %s78_s30 = int_to_ptr.vmem [resolvable:$true] %s77_s30 }
   0x4   :  { %v26_v3 = vpack.c.bf16 %v25_v2, %v25_v2  ;;  %v100_v4 = vld [vmem:[%s186_s4] ss:$0 sm:$0xff] }
   0x5   :  { %v101_v5 = vld [vmem:[%s187_s5] ss:$0 sm:$0xff] }
   0x6   :  { %54 = vmatpush.bf16.msra.mxu0 %v97_v1 }
   0x9   :  { %96 = vmatmul.msk.bf16.vlgmr.msra.gmra.mxu0 %vm43_vm0, %v26_v3 }
  0x86   :  { %v56_v6 = vpop.f32.mrf.mxu0 }
  0x87   :  { %v64_v7 = vmul.f32 %v100_v4, %v56_v6 }
  0x89   :  { %v69_v8 = vadd.f32 %v101_v5, %v64_v7 }
  0x8b   :  { %71 = vst.msk [vmem:[#allocation2] sm:$0x3] %vm70_vm1, %v69_v8 }
  0x8c   :  { %82 = dma.vmem_to_hbm [thread:$0]  %s78_s30, 32, %s80_s8, [#allocation3]  }
  0x8e   :  { %v58_v9 = vpop.f32.mrf.mxu0 }
  0x8f   :  { %126 = dma.done.wait [#allocation3], 32  }
  0x90   :  { %127 = vsyncadd [#allocation3], 4294967264 }
  0x91   :  { %87 = vsyncpa [#allocation3], 1 }

</bundles_post_ra>
